<compile_context>
chip_gen: v5e
topology: v5e:2x2
jax: 0.10.0
libtpu: 0.0.40
codegen_flags: <defaults>
</compile_context>

<pallas_src>
import functools

import jax
import jax.numpy as jnp
from jax.experimental import pallas as pl
from jax.experimental.pallas import tpu as pltpu


def _fast_sigmoid(x):
    # sigmoid(x) == 0.5 * tanh(0.5 * x) + 0.5  -> single EUP push instead of exp + recip.
    return 0.5 * jnp.tanh(0.5 * x) + 0.5


def _lstm_kernel(x_ref, wih_ref, whh_ref, b_ref, o_ref,
                 h_ref, c_ref, pg_ref, *, t_blk, b_tile, h_pad):
    """One grid step == one batch tile x one block of `t_blk` LSTM time steps.

    x_ref  : (t_blk * b_tile, C_in)    bf16 time-major rows for this block
    wih_ref: (C_in, 4 * h_pad)         bf16 W_ih^T (resident)
    whh_ref: (h_pad, 4 * h_pad)        bf16 W_hh^T (resident)
    b_ref  : (1, 4 * h_pad)            f32 (b_ih + b_hh) (resident)
    o_ref  : (t_blk * b_tile, h_pad)   f32 hidden-state outputs for this block
    h_ref, c_ref : (b_tile, h_pad)     f32 recurrent state, persists across time blocks
    pg_ref : (t_blk * b_tile, 4*h_pad) f32 pre-computed input gates (scratch)
    """
    @pl.when(pl.program_id(1) == 0)          # start of the sequence for this batch tile
    def _():
        h_ref[...] = jnp.zeros_like(h_ref)
        c_ref[...] = jnp.zeros_like(c_ref)

    # Hoisted input projection for the whole time block: one big bf16 MXU matmul
    # (f32 accumulate) + f32 bias.
    pg_ref[...] = (
        jnp.dot(x_ref[...], wih_ref[...], preferred_element_type=jnp.float32)
        + b_ref[...]
    )

    def step(t, carry):
        row = pl.multiple_of(t * b_tile, b_tile)
        # Only the h-recurrence is serialized: (b_tile, Hp) @ (Hp, 4*Hp), bf16 in / f32 acc.
        rec = jnp.dot(h_ref[...].astype(jnp.bfloat16), whh_ref[...],
                      preferred_element_type=jnp.float32)
        gates = pg_ref[pl.ds(row, b_tile), :] + rec
        # PyTorch gate order [i, f, g, o]; each slice is a whole 128-lane multiple.
        i = _fast_sigmoid(gates[:, 0 * h_pad:1 * h_pad])
        f = _fast_sigmoid(gates[:, 1 * h_pad:2 * h_pad])
        g = jnp.tanh(gates[:, 2 * h_pad:3 * h_pad])
        o = _fast_sigmoid(gates[:, 3 * h_pad:4 * h_pad])

        c_new = f * c_ref[...] + i * g
        h_new = o * jnp.tanh(c_new)

        c_ref[...] = c_new
        h_ref[...] = h_new
        o_ref[pl.ds(row, b_tile), :] = h_new.astype(o_ref.dtype)
        return carry

    # Partial unroll: keeps LLO scheduling visibility without vreg spills at large Hp/t_blk.
    jax.lax.fori_loop(0, t_blk, step, 0, unroll=min(t_blk, 8))


def temporal_feature_extractor(x, w_ih, w_hh, b_ih, b_hh, *, t_blk=None):
    """x: (B, T, C_in) float32. Returns (B, T, H) float32, same as nn.LSTM(...)[0]."""
    B, T, C_in = x.shape
    H = w_ih.shape[0] // 4

    # Pad batch to full sublanes, hidden to full lanes.
    Bp = pl.cdiv(B, 8) * 8
    Hp = pl.cdiv(H, 128) * 128

    # Batch tiles: independent recurrences that the "parallel" grid axis can shard across
    # the two v7x TensorCores (no effect on v5e/v6e, which have a single TC).
    n_bt = 2 if (Bp >= 16 and Bp % 16 == 0) else 1
    b_tile = Bp // n_bt

    if t_blk is None:
        t_blk = min(T, 32)
    n_blk = pl.cdiv(T, t_blk)
    T_pad = n_blk * t_blk

    f32 = jnp.float32
    bf16 = jnp.bfloat16

    # Per-gate zero padding of weights / bias to the padded hidden size, then
    # pre-transpose so the kernel does plain row-major matmuls.  Matmul operands in bf16.
    w_ih_g = jnp.zeros((4, Hp, C_in), f32).at[:, :H, :].set(
        w_ih.reshape(4, H, C_in).astype(f32))
    w_hh_g = jnp.zeros((4, Hp, Hp), f32).at[:, :H, :H].set(
        w_hh.reshape(4, H, H).astype(f32))
    b_g = jnp.zeros((4, Hp), f32).at[:, :H].set(
        (b_ih + b_hh).reshape(4, H).astype(f32))

    w_ih_t = w_ih_g.reshape(4 * Hp, C_in).T.astype(bf16)     # (C_in, 4*Hp)
    w_hh_t = w_hh_g.reshape(4 * Hp, Hp).T.astype(bf16)       # (Hp,   4*Hp)
    bias = b_g.reshape(1, 4 * Hp)                            # (1,    4*Hp) f32

    # Time-major, pad batch/time, split batch tiles, flatten (T, b_tile) rows so each
    # (batch tile, time block) is a contiguous, sublane-aligned row slab.
    x_tm = jnp.transpose(x, (1, 0, 2)).astype(f32)                   # (T, B, C_in)
    x_tm = jnp.pad(x_tm, ((0, T_pad - T), (0, Bp - B), (0, 0)))      # (T_pad, Bp, C_in)
    x_3d = (x_tm.reshape(T_pad, n_bt, b_tile, C_in)
                .transpose(1, 0, 2, 3)
                .reshape(n_bt, T_pad * b_tile, C_in)
                .astype(bf16))                                       # (n_bt, T_pad*b_tile, C_in)

    kernel = functools.partial(_lstm_kernel, t_blk=t_blk, b_tile=b_tile, h_pad=Hp)

    # VMEM budget: double-buffered x/out blocks + double-buffered resident weights/bias
    # + pg scratch + h/c, with 2x headroom (v5e scoped default is only 16 MiB).
    vmem_bytes = (
        2 * t_blk * b_tile * C_in * 2          # x blocks (bf16)
        + 2 * t_blk * b_tile * Hp * 4          # out blocks (f32)
        + 2 * (C_in + Hp) * 4 * Hp * 2         # W_ih^T + W_hh^T (bf16)
        + 2 * 4 * Hp * 4                       # bias (f32)
        + t_blk * b_tile * 4 * Hp * 4          # pg scratch (f32)
        + 2 * b_tile * Hp * 4                  # h, c (f32)
    )
    vmem_limit = int(min(max(2 * vmem_bytes, 32 * 1024 * 1024), 64 * 1024 * 1024))

    out_3d = pl.pallas_call(
        kernel,
        out_shape=jax.ShapeDtypeStruct((n_bt, T_pad * b_tile, Hp), f32),
        grid_spec=pltpu.PrefetchScalarGridSpec(
            num_scalar_prefetch=0,
            grid=(n_bt, n_blk),
            in_specs=[
                pl.BlockSpec((None, t_blk * b_tile, C_in),
                             lambda bi, tb: (bi, tb, 0)),              # x block
                pl.BlockSpec((C_in, 4 * Hp), lambda bi, tb: (0, 0)),   # W_ih^T resident
                pl.BlockSpec((Hp, 4 * Hp), lambda bi, tb: (0, 0)),     # W_hh^T resident
                pl.BlockSpec((1, 4 * Hp), lambda bi, tb: (0, 0)),      # bias   resident
            ],
            out_specs=pl.BlockSpec((None, t_blk * b_tile, Hp),
                                   lambda bi, tb: (bi, tb, 0)),
            scratch_shapes=[
                pltpu.VMEM((b_tile, Hp), f32),                  # h_{t-1}
                pltpu.VMEM((b_tile, Hp), f32),                  # c_{t-1}
                pltpu.VMEM((t_blk * b_tile, 4 * Hp), f32),      # block pre-gates
            ],
        ),
        compiler_params=pltpu.CompilerParams(
            # batch tiles are independent ("parallel"); recurrence carries across the
            # time-block axis ("arbitrary").
            dimension_semantics=("parallel", "arbitrary"),
            vmem_limit_bytes=vmem_limit,
        ),
    )(x_3d, w_ih_t, w_hh_t, bias)

    out = (out_3d.reshape(n_bt, T_pad, b_tile, Hp)
                 .transpose(1, 0, 2, 3)
                 .reshape(T_pad, Bp, Hp)[:T, :B, :H])   # drop time/batch/hidden padding
    return jnp.transpose(out, (1, 0, 2))                # back to (B, T, H)


def _lstm_reference(x, w_ih, w_hh, b_ih, b_hh):
    """Pure-JAX f32 reference matching torch.nn.LSTM(batch_first=True) semantics."""
    B, T, _ = x.shape
    H = w_hh.shape[1]
    b = b_ih + b_hh

    def step(carry, x_t):
        h, c = carry
        gates = x_t @ w_ih.T + h @ w_hh.T + b
        i, f, g, o = jnp.split(gates, 4, axis=-1)
        i, f, o = jax.nn.sigmoid(i), jax.nn.sigmoid(f), jax.nn.sigmoid(o)
        g = jnp.tanh(g)
        c = f * c + i * g
        h = o * jnp.tanh(c)
        return (h, c), h

    h0 = jnp.zeros((B, H), jnp.float32)
    c0 = jnp.zeros((B, H), jnp.float32)
    _, hs = jax.lax.scan(step, (h0, c0), jnp.transpose(x, (1, 0, 2)))
    return jnp.transpose(hs, (1, 0, 2))


if __name__ == "__main__":
    # Small shapes implied by the module: x is (batch, seq, in_channels).
    B, T, C_IN, H = 2, 8, 16, 32

    key = jax.random.PRNGKey(0)
    kx, k1, k2, k3, k4 = jax.random.split(key, 5)

    # Deterministic "PyTorch-style" init: U(-1/sqrt(H), 1/sqrt(H)).
    s = 1.0 / jnp.sqrt(jnp.float32(H))
    w_ih = jax.random.uniform(k1, (4 * H, C_IN), jnp.float32, -s, s)  # weight_ih_l0
    w_hh = jax.random.uniform(k2, (4 * H, H), jnp.float32, -s, s)     # weight_hh_l0
    b_ih = jax.random.uniform(k3, (4 * H,), jnp.float32, -s, s)       # bias_ih_l0
    b_hh = jax.random.uniform(k4, (4 * H,), jnp.float32, -s, s)       # bias_hh_l0

    x = jax.random.normal(kx, (B, T, C_IN), jnp.float32)

    out = temporal_feature_extractor(x, w_ih, w_hh, b_ih, b_hh)
    out = jax.block_until_ready(out)

    ref = _lstm_reference(x, w_ih, w_hh, b_ih, b_hh)
    assert out.shape == (B, T, H)
    # bf16 MXU operands => relaxed tolerance vs the f32 reference.
    assert jnp.allclose(out, ref, atol=2e-2, rtol=2e-2), "mismatch vs JAX LSTM reference"

    print("KERNEL_OK")
</pallas_src>

<mosaic_0001>
module attributes {stable_mosaic.version = 11 : i64} {
  func.func @_lstm_kernel(%arg0: i32, %arg1: i32, %arg2: memref<1x64x16xbf16, #tpu.memory_space<vmem>>, %arg3: memref<16x512xbf16, #tpu.memory_space<vmem>>, %arg4: memref<128x512xbf16, #tpu.memory_space<vmem>>, %arg5: memref<1x512xf32, #tpu.memory_space<vmem>>, %arg6: memref<1x64x128xf32, #tpu.memory_space<vmem>>, %arg7: memref<8x128xf32, #tpu.memory_space<vmem>>, %arg8: memref<8x128xf32, #tpu.memory_space<vmem>>, %arg9: memref<64x512xf32, #tpu.memory_space<vmem>>) attributes {dimension_semantics = [#tpu.dimension_semantics<parallel>, #tpu.dimension_semantics<arbitrary>], iteration_bounds = array<i64: 1, 1>, scalar_prefetch = 0 : i64, scratch_operands = 3 : i64, tpu.core_type = #tpu.core_type<tc>, window_params = [{transform_indices = @transform_0, window_bounds = array<i64: 1, 64, 16>}, {pipeline_mode = #tpu.pipeline_mode<synchronous>, transform_indices = @transform_1, window_bounds = array<i64: 16, 512>}, {pipeline_mode = #tpu.pipeline_mode<synchronous>, transform_indices = @transform_2, window_bounds = array<i64: 128, 512>}, {pipeline_mode = #tpu.pipeline_mode<synchronous>, transform_indices = @transform_3, window_bounds = array<i64: 1, 512>}, {transform_indices = @transform_4, window_bounds = array<i64: 1, 64, 128>}]} {
    %c0_i32 = arith.constant 0 : i32
    %0 = arith.cmpi eq, %arg1, %c0_i32 : i32
    %1 = arith.extui %0 : i1 to i32
    %c0_i32_0 = arith.constant 0 : i32
    %2 = arith.cmpi ne, %1, %c0_i32_0 : i32
    scf.if %2 {
      %cst_202 = arith.constant 0.000000e+00 : f32
      %387 = vector.broadcast %cst_202 : f32 to vector<8x128xf32>
      %c0_203 = arith.constant 0 : index
      %c0_204 = arith.constant 0 : index
      %388 = vector.load %arg7[%c0_203, %c0_204] : memref<8x128xf32, #tpu.memory_space<vmem>>, vector<8x128xf32>
      tpu.vector_store %arg7[%c0_203, %c0_204], %387 {strides = array<i32>} : memref<8x128xf32, #tpu.memory_space<vmem>>, vector<8x128xf32>,
      %cst_205 = arith.constant 0.000000e+00 : f32
      %389 = vector.broadcast %cst_205 : f32 to vector<8x128xf32>
      %c0_206 = arith.constant 0 : index
      %c0_207 = arith.constant 0 : index
      %390 = vector.load %arg8[%c0_206, %c0_207] : memref<8x128xf32, #tpu.memory_space<vmem>>, vector<8x128xf32>
      tpu.vector_store %arg8[%c0_206, %c0_207], %389 {strides = array<i32>} : memref<8x128xf32, #tpu.memory_space<vmem>>, vector<8x128xf32>,
    } else {
    }
    %c0 = arith.constant 0 : index
    %c0_1 = arith.constant 0 : index
    %c0_2 = arith.constant 0 : index
    %3 = vector.load %arg2[%c0, %c0_1, %c0_2] : memref<1x64x16xbf16, #tpu.memory_space<vmem>>, vector<1x64x16xbf16>
    %4 = vector.shape_cast %3 : vector<1x64x16xbf16> to vector<64x16xbf16>
    %c0_3 = arith.constant 0 : index
    %c0_4 = arith.constant 0 : index
    %5 = vector.load %arg3[%c0_3, %c0_4] : memref<16x512xbf16, #tpu.memory_space<vmem>>, vector<16x512xbf16>
    %cst = arith.constant dense<0.000000e+00> : vector<64x512xf32>
    %6 = tpu.matmul %4, %5, %cst {dimension_numbers = #tpu.dot_dimension_numbers<[1], [0], [0], [1], [0, 0, 1, 1], [], []>} : vector<64x16xbf16>, vector<16x512xbf16>, vector<64x512xf32> -> vector<64x512xf32>
    %c0_5 = arith.constant 0 : index
    %c0_6 = arith.constant 0 : index
    %7 = vector.load %arg5[%c0_5, %c0_6] : memref<1x512xf32, #tpu.memory_space<vmem>>, vector<1x512xf32>
    %8 = vector.broadcast %7 : vector<1x512xf32> to vector<64x512xf32>
    %9 = arith.addf %6, %8 : vector<64x512xf32>
    %c0_7 = arith.constant 0 : index
    %c0_8 = arith.constant 0 : index
    %10 = vector.load %arg9[%c0_7, %c0_8] : memref<64x512xf32, #tpu.memory_space<vmem>>, vector<64x512xf32>
    tpu.vector_store %arg9[%c0_7, %c0_8], %9 {strides = array<i32>} : memref<64x512xf32, #tpu.memory_space<vmem>>, vector<64x512xf32>,
    %c0_i32_9 = arith.constant 0 : i32
    %c8_i32 = arith.constant 8 : i32
    %11 = arith.muli %c0_i32_9, %c8_i32 : i32
    %12 = tpu.assume_multiple %11, 8 : i32
    %c0_10 = arith.constant 0 : index
    %c0_11 = arith.constant 0 : index
    %13 = vector.load %arg7[%c0_10, %c0_11] : memref<8x128xf32, #tpu.memory_space<vmem>>, vector<8x128xf32>
    %14 = arith.truncf %13 : vector<8x128xf32> to vector<8x128xbf16>
    %c0_12 = arith.constant 0 : index
    %c0_13 = arith.constant 0 : index
    %15 = vector.load %arg4[%c0_12, %c0_13] : memref<128x512xbf16, #tpu.memory_space<vmem>>, vector<128x512xbf16>
    %cst_14 = arith.constant dense<0.000000e+00> : vector<8x512xf32>
    %16 = tpu.matmul %14, %15, %cst_14 {dimension_numbers = #tpu.dot_dimension_numbers<[1], [0], [0], [1], [0, 0, 1, 1], [], []>} : vector<8x128xbf16>, vector<128x512xbf16>, vector<8x512xf32> -> vector<8x512xf32>
    %17 = arith.index_cast %12 : i32 to index
    %c0_15 = arith.constant 0 : index
    %18 = vector.load %arg9[%17, %c0_15] : memref<64x512xf32, #tpu.memory_space<vmem>>, vector<8x512xf32>
    %19 = arith.addf %18, %16 : vector<8x512xf32>
    %20 = vector.extract_strided_slice %19 {offsets = [0, 0], sizes = [8, 128], strides = [1, 1]} : vector<8x512xf32> to vector<8x128xf32>
    %cst_16 = arith.constant 5.000000e-01 : f32
    %21 = vector.broadcast %cst_16 : f32 to vector<8x128xf32>
    %22 = arith.mulf %21, %20 : vector<8x128xf32>
    %23 = math.tanh %22 : vector<8x128xf32>
    %cst_17 = arith.constant 5.000000e-01 : f32
    %24 = vector.broadcast %cst_17 : f32 to vector<8x128xf32>
    %25 = arith.mulf %24, %23 : vector<8x128xf32>
    %cst_18 = arith.constant 5.000000e-01 : f32
    %26 = vector.broadcast %cst_18 : f32 to vector<8x128xf32>
    %27 = arith.addf %25, %26 : vector<8x128xf32>
    %28 = vector.extract_strided_slice %19 {offsets = [0, 128], sizes = [8, 128], strides = [1, 1]} : vector<8x512xf32> to vector<8x128xf32>
    %cst_19 = arith.constant 5.000000e-01 : f32
    %29 = vector.broadcast %cst_19 : f32 to vector<8x128xf32>
    %30 = arith.mulf %29, %28 : vector<8x128xf32>
    %31 = math.tanh %30 : vector<8x128xf32>
    %cst_20 = arith.constant 5.000000e-01 : f32
    %32 = vector.broadcast %cst_20 : f32 to vector<8x128xf32>
    %33 = arith.mulf %32, %31 : vector<8x128xf32>
    %cst_21 = arith.constant 5.000000e-01 : f32
    %34 = vector.broadcast %cst_21 : f32 to vector<8x128xf32>
    %35 = arith.addf %33, %34 : vector<8x128xf32>
    %36 = vector.extract_strided_slice %19 {offsets = [0, 256], sizes = [8, 128], strides = [1, 1]} : vector<8x512xf32> to vector<8x128xf32>
    %37 = math.tanh %36 : vector<8x128xf32>
    %38 = vector.extract_strided_slice %19 {offsets = [0, 384], sizes = [8, 128], strides = [1, 1]} : vector<8x512xf32> to vector<8x128xf32>
    %cst_22 = arith.constant 5.000000e-01 : f32
    %39 = vector.broadcast %cst_22 : f32 to vector<8x128xf32>
    %40 = arith.mulf %39, %38 : vector<8x128xf32>
    %41 = math.tanh %40 : vector<8x128xf32>
    %cst_23 = arith.constant 5.000000e-01 : f32
    %42 = vector.broadcast %cst_23 : f32 to vector<8x128xf32>
    %43 = arith.mulf %42, %41 : vector<8x128xf32>
    %cst_24 = arith.constant 5.000000e-01 : f32
    %44 = vector.broadcast %cst_24 : f32 to vector<8x128xf32>
    %45 = arith.addf %43, %44 : vector<8x128xf32>
    %c0_25 = arith.constant 0 : index
    %c0_26 = arith.constant 0 : index
    %46 = vector.load %arg8[%c0_25, %c0_26] : memref<8x128xf32, #tpu.memory_space<vmem>>, vector<8x128xf32>
    %47 = arith.mulf %35, %46 : vector<8x128xf32>
    %48 = arith.mulf %27, %37 : vector<8x128xf32>
    %49 = arith.addf %47, %48 : vector<8x128xf32>
    %50 = math.tanh %49 : vector<8x128xf32>
    %51 = arith.mulf %45, %50 : vector<8x128xf32>
    %c0_27 = arith.constant 0 : index
    %c0_28 = arith.constant 0 : index
    %52 = vector.load %arg8[%c0_27, %c0_28] : memref<8x128xf32, #tpu.memory_space<vmem>>, vector<8x128xf32>
    tpu.vector_store %arg8[%c0_27, %c0_28], %49 {strides = array<i32>} : memref<8x128xf32, #tpu.memory_space<vmem>>, vector<8x128xf32>,
    %c0_29 = arith.constant 0 : index
    %c0_30 = arith.constant 0 : index
    %53 = vector.load %arg7[%c0_29, %c0_30] : memref<8x128xf32, #tpu.memory_space<vmem>>, vector<8x128xf32>
    tpu.vector_store %arg7[%c0_29, %c0_30], %51 {strides = array<i32>} : memref<8x128xf32, #tpu.memory_space<vmem>>, vector<8x128xf32>,
    %c0_31 = arith.constant 0 : index
    %54 = arith.index_cast %12 : i32 to index
    %c0_32 = arith.constant 0 : index
    %55 = vector.load %arg6[%c0_31, %54, %c0_32] : memref<1x64x128xf32, #tpu.memory_space<vmem>>, vector<1x8x128xf32>
    %56 = vector.shape_cast %55 : vector<1x8x128xf32> to vector<8x128xf32>
    %57 = vector.shape_cast %51 : vector<8x128xf32> to vector<1x8x128xf32>
    tpu.vector_store %arg6[%c0_31, %54, %c0_32], %57 {strides = array<i32>} : memref<1x64x128xf32, #tpu.memory_space<vmem>>, vector<1x8x128xf32>,
    %c1_i32 = arith.constant 1 : i32
    %c8_i32_33 = arith.constant 8 : i32
    %58 = arith.muli %c1_i32, %c8_i32_33 : i32
    %59 = tpu.assume_multiple %58, 8 : i32
    %c0_34 = arith.constant 0 : index
    %c0_35 = arith.constant 0 : index
    %60 = vector.load %arg7[%c0_34, %c0_35] : memref<8x128xf32, #tpu.memory_space<vmem>>, vector<8x128xf32>
    %61 = arith.truncf %60 : vector<8x128xf32> to vector<8x128xbf16>
    %c0_36 = arith.constant 0 : index
    %c0_37 = arith.constant 0 : index
    %62 = vector.load %arg4[%c0_36, %c0_37] : memref<128x512xbf16, #tpu.memory_space<vmem>>, vector<128x512xbf16>
    %cst_38 = arith.constant dense<0.000000e+00> : vector<8x512xf32>
    %63 = tpu.matmul %61, %62, %cst_38 {dimension_numbers = #tpu.dot_dimension_numbers<[1], [0], [0], [1], [0, 0, 1, 1], [], []>} : vector<8x128xbf16>, vector<128x512xbf16>, vector<8x512xf32> -> vector<8x512xf32>
    %64 = arith.index_cast %59 : i32 to index
    %c0_39 = arith.constant 0 : index
    %65 = vector.load %arg9[%64, %c0_39] : memref<64x512xf32, #tpu.memory_space<vmem>>, vector<8x512xf32>
    %66 = arith.addf %65, %63 : vector<8x512xf32>
    %67 = vector.extract_strided_slice %66 {offsets = [0, 0], sizes = [8, 128], strides = [1, 1]} : vector<8x512xf32> to vector<8x128xf32>
    %cst_40 = arith.constant 5.000000e-01 : f32
    %68 = vector.broadcast %cst_40 : f32 to vector<8x128xf32>
    %69 = arith.mulf %68, %67 : vector<8x128xf32>
    %70 = math.tanh %69 : vector<8x128xf32>
    %cst_41 = arith.constant 5.000000e-01 : f32
    %71 = vector.broadcast %cst_41 : f32 to vector<8x128xf32>
    %72 = arith.mulf %71, %70 : vector<8x128xf32>
    %cst_42 = arith.constant 5.000000e-01 : f32
    %73 = vector.broadcast %cst_42 : f32 to vector<8x128xf32>
    %74 = arith.addf %72, %73 : vector<8x128xf32>
    %75 = vector.extract_strided_slice %66 {offsets = [0, 128], sizes = [8, 128], strides = [1, 1]} : vector<8x512xf32> to vector<8x128xf32>
    %cst_43 = arith.constant 5.000000e-01 : f32
    %76 = vector.broadcast %cst_43 : f32 to vector<8x128xf32>
    %77 = arith.mulf %76, %75 : vector<8x128xf32>
    %78 = math.tanh %77 : vector<8x128xf32>
    %cst_44 = arith.constant 5.000000e-01 : f32
    %79 = vector.broadcast %cst_44 : f32 to vector<8x128xf32>
    %80 = arith.mulf %79, %78 : vector<8x128xf32>
    %cst_45 = arith.constant 5.000000e-01 : f32
    %81 = vector.broadcast %cst_45 : f32 to vector<8x128xf32>
    %82 = arith.addf %80, %81 : vector<8x128xf32>
    %83 = vector.extract_strided_slice %66 {offsets = [0, 256], sizes = [8, 128], strides = [1, 1]} : vector<8x512xf32> to vector<8x128xf32>
    %84 = math.tanh %83 : vector<8x128xf32>
    %85 = vector.extract_strided_slice %66 {offsets = [0, 384], sizes = [8, 128], strides = [1, 1]} : vector<8x512xf32> to vector<8x128xf32>
    %cst_46 = arith.constant 5.000000e-01 : f32
    %86 = vector.broadcast %cst_46 : f32 to vector<8x128xf32>
    %87 = arith.mulf %86, %85 : vector<8x128xf32>
    %88 = math.tanh %87 : vector<8x128xf32>
    %cst_47 = arith.constant 5.000000e-01 : f32
    %89 = vector.broadcast %cst_47 : f32 to vector<8x128xf32>
    %90 = arith.mulf %89, %88 : vector<8x128xf32>
    %cst_48 = arith.constant 5.000000e-01 : f32
    %91 = vector.broadcast %cst_48 : f32 to vector<8x128xf32>
    %92 = arith.addf %90, %91 : vector<8x128xf32>
    %c0_49 = arith.constant 0 : index
    %c0_50 = arith.constant 0 : index
    %93 = vector.load %arg8[%c0_49, %c0_50] : memref<8x128xf32, #tpu.memory_space<vmem>>, vector<8x128xf32>
    %94 = arith.mulf %82, %93 : vector<8x128xf32>
    %95 = arith.mulf %74, %84 : vector<8x128xf32>
    %96 = arith.addf %94, %95 : vector<8x128xf32>
    %97 = math.tanh %96 : vector<8x128xf32>
    %98 = arith.mulf %92, %97 : vector<8x128xf32>
    %c0_51 = arith.constant 0 : index
    %c0_52 = arith.constant 0 : index
    %99 = vector.load %arg8[%c0_51, %c0_52] : memref<8x128xf32, #tpu.memory_space<vmem>>, vector<8x128xf32>
    tpu.vector_store %arg8[%c0_51, %c0_52], %96 {strides = array<i32>} : memref<8x128xf32, #tpu.memory_space<vmem>>, vector<8x128xf32>,
    %c0_53 = arith.constant 0 : index
    %c0_54 = arith.constant 0 : index
    %100 = vector.load %arg7[%c0_53, %c0_54] : memref<8x128xf32, #tpu.memory_space<vmem>>, vector<8x128xf32>
    tpu.vector_store %arg7[%c0_53, %c0_54], %98 {strides = array<i32>} : memref<8x128xf32, #tpu.memory_space<vmem>>, vector<8x128xf32>,
    %c0_55 = arith.constant 0 : index
    %101 = arith.index_cast %59 : i32 to index
    %c0_56 = arith.constant 0 : index
    %102 = vector.load %arg6[%c0_55, %101, %c0_56] : memref<1x64x128xf32, #tpu.memory_space<vmem>>, vector<1x8x128xf32>
    %103 = vector.shape_cast %102 : vector<1x8x128xf32> to vector<8x128xf32>
    %104 = vector.shape_cast %98 : vector<8x128xf32> to vector<1x8x128xf32>
    tpu.vector_store %arg6[%c0_55, %101, %c0_56], %104 {strides = array<i32>} : memref<1x64x128xf32, #tpu.memory_space<vmem>>, vector<1x8x128xf32>,
    %c2_i32 = arith.constant 2 : i32
    %c8_i32_57 = arith.constant 8 : i32
    %105 = arith.muli %c2_i32, %c8_i32_57 : i32
    %106 = tpu.assume_multiple %105, 8 : i32
    %c0_58 = arith.constant 0 : index
    %c0_59 = arith.constant 0 : index
    %107 = vector.load %arg7[%c0_58, %c0_59] : memref<8x128xf32, #tpu.memory_space<vmem>>, vector<8x128xf32>
    %108 = arith.truncf %107 : vector<8x128xf32> to vector<8x128xbf16>
    %c0_60 = arith.constant 0 : index
    %c0_61 = arith.constant 0 : index
    %109 = vector.load %arg4[%c0_60, %c0_61] : memref<128x512xbf16, #tpu.memory_space<vmem>>, vector<128x512xbf16>
    %cst_62 = arith.constant dense<0.000000e+00> : vector<8x512xf32>
    %110 = tpu.matmul %108, %109, %cst_62 {dimension_numbers = #tpu.dot_dimension_numbers<[1], [0], [0], [1], [0, 0, 1, 1], [], []>} : vector<8x128xbf16>, vector<128x512xbf16>, vector<8x512xf32> -> vector<8x512xf32>
    %111 = arith.index_cast %106 : i32 to index
    %c0_63 = arith.constant 0 : index
    %112 = vector.load %arg9[%111, %c0_63] : memref<64x512xf32, #tpu.memory_space<vmem>>, vector<8x512xf32>
    %113 = arith.addf %112, %110 : vector<8x512xf32>
    %114 = vector.extract_strided_slice %113 {offsets = [0, 0], sizes = [8, 128], strides = [1, 1]} : vector<8x512xf32> to vector<8x128xf32>
    %cst_64 = arith.constant 5.000000e-01 : f32
    %115 = vector.broadcast %cst_64 : f32 to vector<8x128xf32>
    %116 = arith.mulf %115, %114 : vector<8x128xf32>
    %117 = math.tanh %116 : vector<8x128xf32>
    %cst_65 = arith.constant 5.000000e-01 : f32
    %118 = vector.broadcast %cst_65 : f32 to vector<8x128xf32>
    %119 = arith.mulf %118, %117 : vector<8x128xf32>
    %cst_66 = arith.constant 5.000000e-01 : f32
    %120 = vector.broadcast %cst_66 : f32 to vector<8x128xf32>
    %121 = arith.addf %119, %120 : vector<8x128xf32>
    %122 = vector.extract_strided_slice %113 {offsets = [0, 128], sizes = [8, 128], strides = [1, 1]} : vector<8x512xf32> to vector<8x128xf32>
    %cst_67 = arith.constant 5.000000e-01 : f32
    %123 = vector.broadcast %cst_67 : f32 to vector<8x128xf32>
    %124 = arith.mulf %123, %122 : vector<8x128xf32>
    %125 = math.tanh %124 : vector<8x128xf32>
    %cst_68 = arith.constant 5.000000e-01 : f32
    %126 = vector.broadcast %cst_68 : f32 to vector<8x128xf32>
    %127 = arith.mulf %126, %125 : vector<8x128xf32>
    %cst_69 = arith.constant 5.000000e-01 : f32
    %128 = vector.broadcast %cst_69 : f32 to vector<8x128xf32>
    %129 = arith.addf %127, %128 : vector<8x128xf32>
    %130 = vector.extract_strided_slice %113 {offsets = [0, 256], sizes = [8, 128], strides = [1, 1]} : vector<8x512xf32> to vector<8x128xf32>
    %131 = math.tanh %130 : vector<8x128xf32>
    %132 = vector.extract_strided_slice %113 {offsets = [0, 384], sizes = [8, 128], strides = [1, 1]} : vector<8x512xf32> to vector<8x128xf32>
    %cst_70 = arith.constant 5.000000e-01 : f32
    %133 = vector.broadcast %cst_70 : f32 to vector<8x128xf32>
    %134 = arith.mulf %133, %132 : vector<8x128xf32>
    %135 = math.tanh %134 : vector<8x128xf32>
    %cst_71 = arith.constant 5.000000e-01 : f32
    %136 = vector.broadcast %cst_71 : f32 to vector<8x128xf32>
    %137 = arith.mulf %136, %135 : vector<8x128xf32>
    %cst_72 = arith.constant 5.000000e-01 : f32
    %138 = vector.broadcast %cst_72 : f32 to vector<8x128xf32>
    %139 = arith.addf %137, %138 : vector<8x128xf32>
    %c0_73 = arith.constant 0 : index
    %c0_74 = arith.constant 0 : index
    %140 = vector.load %arg8[%c0_73, %c0_74] : memref<8x128xf32, #tpu.memory_space<vmem>>, vector<8x128xf32>
    %141 = arith.mulf %129, %140 : vector<8x128xf32>
    %142 = arith.mulf %121, %131 : vector<8x128xf32>
    %143 = arith.addf %141, %142 : vector<8x128xf32>
    %144 = math.tanh %143 : vector<8x128xf32>
    %145 = arith.mulf %139, %144 : vector<8x128xf32>
    %c0_75 = arith.constant 0 : index
    %c0_76 = arith.constant 0 : index
    %146 = vector.load %arg8[%c0_75, %c0_76] : memref<8x128xf32, #tpu.memory_space<vmem>>, vector<8x128xf32>
    tpu.vector_store %arg8[%c0_75, %c0_76], %143 {strides = array<i32>} : memref<8x128xf32, #tpu.memory_space<vmem>>, vector<8x128xf32>,
    %c0_77 = arith.constant 0 : index
    %c0_78 = arith.constant 0 : index
    %147 = vector.load %arg7[%c0_77, %c0_78] : memref<8x128xf32, #tpu.memory_space<vmem>>, vector<8x128xf32>
    tpu.vector_store %arg7[%c0_77, %c0_78], %145 {strides = array<i32>} : memref<8x128xf32, #tpu.memory_space<vmem>>, vector<8x128xf32>,
    %c0_79 = arith.constant 0 : index
    %148 = arith.index_cast %106 : i32 to index
    %c0_80 = arith.constant 0 : index
    %149 = vector.load %arg6[%c0_79, %148, %c0_80] : memref<1x64x128xf32, #tpu.memory_space<vmem>>, vector<1x8x128xf32>
    %150 = vector.shape_cast %149 : vector<1x8x128xf32> to vector<8x128xf32>
    %151 = vector.shape_cast %145 : vector<8x128xf32> to vector<1x8x128xf32>
    tpu.vector_store %arg6[%c0_79, %148, %c0_80], %151 {strides = array<i32>} : memref<1x64x128xf32, #tpu.memory_space<vmem>>, vector<1x8x128xf32>,
    %c3_i32 = arith.constant 3 : i32
    %c8_i32_81 = arith.constant 8 : i32
    %152 = arith.muli %c3_i32, %c8_i32_81 : i32
    %153 = tpu.assume_multiple %152, 8 : i32
    %c0_82 = arith.constant 0 : index
    %c0_83 = arith.constant 0 : index
    %154 = vector.load %arg7[%c0_82, %c0_83] : memref<8x128xf32, #tpu.memory_space<vmem>>, vector<8x128xf32>
    %155 = arith.truncf %154 : vector<8x128xf32> to vector<8x128xbf16>
    %c0_84 = arith.constant 0 : index
    %c0_85 = arith.constant 0 : index
    %156 = vector.load %arg4[%c0_84, %c0_85] : memref<128x512xbf16, #tpu.memory_space<vmem>>, vector<128x512xbf16>
    %cst_86 = arith.constant dense<0.000000e+00> : vector<8x512xf32>
    %157 = tpu.matmul %155, %156, %cst_86 {dimension_numbers = #tpu.dot_dimension_numbers<[1], [0], [0], [1], [0, 0, 1, 1], [], []>} : vector<8x128xbf16>, vector<128x512xbf16>, vector<8x512xf32> -> vector<8x512xf32>
    %158 = arith.index_cast %153 : i32 to index
    %c0_87 = arith.constant 0 : index
    %159 = vector.load %arg9[%158, %c0_87] : memref<64x512xf32, #tpu.memory_space<vmem>>, vector<8x512xf32>
    %160 = arith.addf %159, %157 : vector<8x512xf32>
    %161 = vector.extract_strided_slice %160 {offsets = [0, 0], sizes = [8, 128], strides = [1, 1]} : vector<8x512xf32> to vector<8x128xf32>
    %cst_88 = arith.constant 5.000000e-01 : f32
    %162 = vector.broadcast %cst_88 : f32 to vector<8x128xf32>
    %163 = arith.mulf %162, %161 : vector<8x128xf32>
    %164 = math.tanh %163 : vector<8x128xf32>
    %cst_89 = arith.constant 5.000000e-01 : f32
    %165 = vector.broadcast %cst_89 : f32 to vector<8x128xf32>
    %166 = arith.mulf %165, %164 : vector<8x128xf32>
    %cst_90 = arith.constant 5.000000e-01 : f32
    %167 = vector.broadcast %cst_90 : f32 to vector<8x128xf32>
    %168 = arith.addf %166, %167 : vector<8x128xf32>
    %169 = vector.extract_strided_slice %160 {offsets = [0, 128], sizes = [8, 128], strides = [1, 1]} : vector<8x512xf32> to vector<8x128xf32>
    %cst_91 = arith.constant 5.000000e-01 : f32
    %170 = vector.broadcast %cst_91 : f32 to vector<8x128xf32>
    %171 = arith.mulf %170, %169 : vector<8x128xf32>
    %172 = math.tanh %171 : vector<8x128xf32>
    %cst_92 = arith.constant 5.000000e-01 : f32
    %173 = vector.broadcast %cst_92 : f32 to vector<8x128xf32>
    %174 = arith.mulf %173, %172 : vector<8x128xf32>
    %cst_93 = arith.constant 5.000000e-01 : f32
    %175 = vector.broadcast %cst_93 : f32 to vector<8x128xf32>
    %176 = arith.addf %174, %175 : vector<8x128xf32>
    %177 = vector.extract_strided_slice %160 {offsets = [0, 256], sizes = [8, 128], strides = [1, 1]} : vector<8x512xf32> to vector<8x128xf32>
    %178 = math.tanh %177 : vector<8x128xf32>
    %179 = vector.extract_strided_slice %160 {offsets = [0, 384], sizes = [8, 128], strides = [1, 1]} : vector<8x512xf32> to vector<8x128xf32>
    %cst_94 = arith.constant 5.000000e-01 : f32
    %180 = vector.broadcast %cst_94 : f32 to vector<8x128xf32>
    %181 = arith.mulf %180, %179 : vector<8x128xf32>
    %182 = math.tanh %181 : vector<8x128xf32>
    %cst_95 = arith.constant 5.000000e-01 : f32
    %183 = vector.broadcast %cst_95 : f32 to vector<8x128xf32>
    %184 = arith.mulf %183, %182 : vector<8x128xf32>
    %cst_96 = arith.constant 5.000000e-01 : f32
    %185 = vector.broadcast %cst_96 : f32 to vector<8x128xf32>
    %186 = arith.addf %184, %185 : vector<8x128xf32>
    %c0_97 = arith.constant 0 : index
    %c0_98 = arith.constant 0 : index
    %187 = vector.load %arg8[%c0_97, %c0_98] : memref<8x128xf32, #tpu.memory_space<vmem>>, vector<8x128xf32>
    %188 = arith.mulf %176, %187 : vector<8x128xf32>
    %189 = arith.mulf %168, %178 : vector<8x128xf32>
    %190 = arith.addf %188, %189 : vector<8x128xf32>
    %191 = math.tanh %190 : vector<8x128xf32>
    %192 = arith.mulf %186, %191 : vector<8x128xf32>
    %c0_99 = arith.constant 0 : index
    %c0_100 = arith.constant 0 : index
    %193 = vector.load %arg8[%c0_99, %c0_100] : memref<8x128xf32, #tpu.memory_space<vmem>>, vector<8x128xf32>
    tpu.vector_store %arg8[%c0_99, %c0_100], %190 {strides = array<i32>} : memref<8x128xf32, #tpu.memory_space<vmem>>, vector<8x128xf32>,
    %c0_101 = arith.constant 0 : index
    %c0_102 = arith.constant 0 : index
    %194 = vector.load %arg7[%c0_101, %c0_102] : memref<8x128xf32, #tpu.memory_space<vmem>>, vector<8x128xf32>
    tpu.vector_store %arg7[%c0_101, %c0_102], %192 {strides = array<i32>} : memref<8x128xf32, #tpu.memory_space<vmem>>, vector<8x128xf32>,
    %c0_103 = arith.constant 0 : index
    %195 = arith.index_cast %153 : i32 to index
    %c0_104 = arith.constant 0 : index
    %196 = vector.load %arg6[%c0_103, %195, %c0_104] : memref<1x64x128xf32, #tpu.memory_space<vmem>>, vector<1x8x128xf32>
    %197 = vector.shape_cast %196 : vector<1x8x128xf32> to vector<8x128xf32>
    %198 = vector.shape_cast %192 : vector<8x128xf32> to vector<1x8x128xf32>
    tpu.vector_store %arg6[%c0_103, %195, %c0_104], %198 {strides = array<i32>} : memref<1x64x128xf32, #tpu.memory_space<vmem>>, vector<1x8x128xf32>,
    %c4_i32 = arith.constant 4 : i32
    %c8_i32_105 = arith.constant 8 : i32
    %199 = arith.muli %c4_i32, %c8_i32_105 : i32
    %200 = tpu.assume_multiple %199, 8 : i32
    %c0_106 = arith.constant 0 : index
    %c0_107 = arith.constant 0 : index
    %201 = vector.load %arg7[%c0_106, %c0_107] : memref<8x128xf32, #tpu.memory_space<vmem>>, vector<8x128xf32>
    %202 = arith.truncf %201 : vector<8x128xf32> to vector<8x128xbf16>
    %c0_108 = arith.constant 0 : index
    %c0_109 = arith.constant 0 : index
    %203 = vector.load %arg4[%c0_108, %c0_109] : memref<128x512xbf16, #tpu.memory_space<vmem>>, vector<128x512xbf16>
    %cst_110 = arith.constant dense<0.000000e+00> : vector<8x512xf32>
    %204 = tpu.matmul %202, %203, %cst_110 {dimension_numbers = #tpu.dot_dimension_numbers<[1], [0], [0], [1], [0, 0, 1, 1], [], []>} : vector<8x128xbf16>, vector<128x512xbf16>, vector<8x512xf32> -> vector<8x512xf32>
    %205 = arith.index_cast %200 : i32 to index
    %c0_111 = arith.constant 0 : index
    %206 = vector.load %arg9[%205, %c0_111] : memref<64x512xf32, #tpu.memory_space<vmem>>, vector<8x512xf32>
    %207 = arith.addf %206, %204 : vector<8x512xf32>
    %208 = vector.extract_strided_slice %207 {offsets = [0, 0], sizes = [8, 128], strides = [1, 1]} : vector<8x512xf32> to vector<8x128xf32>
    %cst_112 = arith.constant 5.000000e-01 : f32
    %209 = vector.broadcast %cst_112 : f32 to vector<8x128xf32>
    %210 = arith.mulf %209, %208 : vector<8x128xf32>
    %211 = math.tanh %210 : vector<8x128xf32>
    %cst_113 = arith.constant 5.000000e-01 : f32
    %212 = vector.broadcast %cst_113 : f32 to vector<8x128xf32>
    %213 = arith.mulf %212, %211 : vector<8x128xf32>
    %cst_114 = arith.constant 5.000000e-01 : f32
    %214 = vector.broadcast %cst_114 : f32 to vector<8x128xf32>
    %215 = arith.addf %213, %214 : vector<8x128xf32>
    %216 = vector.extract_strided_slice %207 {offsets = [0, 128], sizes = [8, 128], strides = [1, 1]} : vector<8x512xf32> to vector<8x128xf32>
    %cst_115 = arith.constant 5.000000e-01 : f32
    %217 = vector.broadcast %cst_115 : f32 to vector<8x128xf32>
    %218 = arith.mulf %217, %216 : vector<8x128xf32>
    %219 = math.tanh %218 : vector<8x128xf32>
    %cst_116 = arith.constant 5.000000e-01 : f32
    %220 = vector.broadcast %cst_116 : f32 to vector<8x128xf32>
    %221 = arith.mulf %220, %219 : vector<8x128xf32>
    %cst_117 = arith.constant 5.000000e-01 : f32
    %222 = vector.broadcast %cst_117 : f32 to vector<8x128xf32>
    %223 = arith.addf %221, %222 : vector<8x128xf32>
    %224 = vector.extract_strided_slice %207 {offsets = [0, 256], sizes = [8, 128], strides = [1, 1]} : vector<8x512xf32> to vector<8x128xf32>
    %225 = math.tanh %224 : vector<8x128xf32>
    %226 = vector.extract_strided_slice %207 {offsets = [0, 384], sizes = [8, 128], strides = [1, 1]} : vector<8x512xf32> to vector<8x128xf32>
    %cst_118 = arith.constant 5.000000e-01 : f32
    %227 = vector.broadcast %cst_118 : f32 to vector<8x128xf32>
    %228 = arith.mulf %227, %226 : vector<8x128xf32>
    %229 = math.tanh %228 : vector<8x128xf32>
    %cst_119 = arith.constant 5.000000e-01 : f32
    %230 = vector.broadcast %cst_119 : f32 to vector<8x128xf32>
    %231 = arith.mulf %230, %229 : vector<8x128xf32>
    %cst_120 = arith.constant 5.000000e-01 : f32
    %232 = vector.broadcast %cst_120 : f32 to vector<8x128xf32>
    %233 = arith.addf %231, %232 : vector<8x128xf32>
    %c0_121 = arith.constant 0 : index
    %c0_122 = arith.constant 0 : index
    %234 = vector.load %arg8[%c0_121, %c0_122] : memref<8x128xf32, #tpu.memory_space<vmem>>, vector<8x128xf32>
    %235 = arith.mulf %223, %234 : vector<8x128xf32>
    %236 = arith.mulf %215, %225 : vector<8x128xf32>
    %237 = arith.addf %235, %236 : vector<8x128xf32>
    %238 = math.tanh %237 : vector<8x128xf32>
    %239 = arith.mulf %233, %238 : vector<8x128xf32>
    %c0_123 = arith.constant 0 : index
    %c0_124 = arith.constant 0 : index
    %240 = vector.load %arg8[%c0_123, %c0_124] : memref<8x128xf32, #tpu.memory_space<vmem>>, vector<8x128xf32>
    tpu.vector_store %arg8[%c0_123, %c0_124], %237 {strides = array<i32>} : memref<8x128xf32, #tpu.memory_space<vmem>>, vector<8x128xf32>,
    %c0_125 = arith.constant 0 : index
    %c0_126 = arith.constant 0 : index
    %241 = vector.load %arg7[%c0_125, %c0_126] : memref<8x128xf32, #tpu.memory_space<vmem>>, vector<8x128xf32>
    tpu.vector_store %arg7[%c0_125, %c0_126], %239 {strides = array<i32>} : memref<8x128xf32, #tpu.memory_space<vmem>>, vector<8x128xf32>,
    %c0_127 = arith.constant 0 : index
    %242 = arith.index_cast %200 : i32 to index
    %c0_128 = arith.constant 0 : index
    %243 = vector.load %arg6[%c0_127, %242, %c0_128] : memref<1x64x128xf32, #tpu.memory_space<vmem>>, vector<1x8x128xf32>
    %244 = vector.shape_cast %243 : vector<1x8x128xf32> to vector<8x128xf32>
    %245 = vector.shape_cast %239 : vector<8x128xf32> to vector<1x8x128xf32>
    tpu.vector_store %arg6[%c0_127, %242, %c0_128], %245 {strides = array<i32>} : memref<1x64x128xf32, #tpu.memory_space<vmem>>, vector<1x8x128xf32>,
    %c5_i32 = arith.constant 5 : i32
    %c8_i32_129 = arith.constant 8 : i32
    %246 = arith.muli %c5_i32, %c8_i32_129 : i32
    %247 = tpu.assume_multiple %246, 8 : i32
    %c0_130 = arith.constant 0 : index
    %c0_131 = arith.constant 0 : index
    %248 = vector.load %arg7[%c0_130, %c0_131] : memref<8x128xf32, #tpu.memory_space<vmem>>, vector<8x128xf32>
    %249 = arith.truncf %248 : vector<8x128xf32> to vector<8x128xbf16>
    %c0_132 = arith.constant 0 : index
    %c0_133 = arith.constant 0 : index
    %250 = vector.load %arg4[%c0_132, %c0_133] : memref<128x512xbf16, #tpu.memory_space<vmem>>, vector<128x512xbf16>
    %cst_134 = arith.constant dense<0.000000e+00> : vector<8x512xf32>
    %251 = tpu.matmul %249, %250, %cst_134 {dimension_numbers = #tpu.dot_dimension_numbers<[1], [0], [0], [1], [0, 0, 1, 1], [], []>} : vector<8x128xbf16>, vector<128x512xbf16>, vector<8x512xf32> -> vector<8x512xf32>
    %252 = arith.index_cast %247 : i32 to index
    %c0_135 = arith.constant 0 : index
    %253 = vector.load %arg9[%252, %c0_135] : memref<64x512xf32, #tpu.memory_space<vmem>>, vector<8x512xf32>
    %254 = arith.addf %253, %251 : vector<8x512xf32>
    %255 = vector.extract_strided_slice %254 {offsets = [0, 0], sizes = [8, 128], strides = [1, 1]} : vector<8x512xf32> to vector<8x128xf32>
    %cst_136 = arith.constant 5.000000e-01 : f32
    %256 = vector.broadcast %cst_136 : f32 to vector<8x128xf32>
    %257 = arith.mulf %256, %255 : vector<8x128xf32>
    %258 = math.tanh %257 : vector<8x128xf32>
    %cst_137 = arith.constant 5.000000e-01 : f32
    %259 = vector.broadcast %cst_137 : f32 to vector<8x128xf32>
    %260 = arith.mulf %259, %258 : vector<8x128xf32>
    %cst_138 = arith.constant 5.000000e-01 : f32
    %261 = vector.broadcast %cst_138 : f32 to vector<8x128xf32>
    %262 = arith.addf %260, %261 : vector<8x128xf32>
    %263 = vector.extract_strided_slice %254 {offsets = [0, 128], sizes = [8, 128], strides = [1, 1]} : vector<8x512xf32> to vector<8x128xf32>
    %cst_139 = arith.constant 5.000000e-01 : f32
    %264 = vector.broadcast %cst_139 : f32 to vector<8x128xf32>
    %265 = arith.mulf %264, %263 : vector<8x128xf32>
    %266 = math.tanh %265 : vector<8x128xf32>
    %cst_140 = arith.constant 5.000000e-01 : f32
    %267 = vector.broadcast %cst_140 : f32 to vector<8x128xf32>
    %268 = arith.mulf %267, %266 : vector<8x128xf32>
    %cst_141 = arith.constant 5.000000e-01 : f32
    %269 = vector.broadcast %cst_141 : f32 to vector<8x128xf32>
    %270 = arith.addf %268, %269 : vector<8x128xf32>
    %271 = vector.extract_strided_slice %254 {offsets = [0, 256], sizes = [8, 128], strides = [1, 1]} : vector<8x512xf32> to vector<8x128xf32>
    %272 = math.tanh %271 : vector<8x128xf32>
    %273 = vector.extract_strided_slice %254 {offsets = [0, 384], sizes = [8, 128], strides = [1, 1]} : vector<8x512xf32> to vector<8x128xf32>
    %cst_142 = arith.constant 5.000000e-01 : f32
    %274 = vector.broadcast %cst_142 : f32 to vector<8x128xf32>
    %275 = arith.mulf %274, %273 : vector<8x128xf32>
    %276 = math.tanh %275 : vector<8x128xf32>
    %cst_143 = arith.constant 5.000000e-01 : f32
    %277 = vector.broadcast %cst_143 : f32 to vector<8x128xf32>
    %278 = arith.mulf %277, %276 : vector<8x128xf32>
    %cst_144 = arith.constant 5.000000e-01 : f32
    %279 = vector.broadcast %cst_144 : f32 to vector<8x128xf32>
    %280 = arith.addf %278, %279 : vector<8x128xf32>
    %c0_145 = arith.constant 0 : index
    %c0_146 = arith.constant 0 : index
    %281 = vector.load %arg8[%c0_145, %c0_146] : memref<8x128xf32, #tpu.memory_space<vmem>>, vector<8x128xf32>
    %282 = arith.mulf %270, %281 : vector<8x128xf32>
    %283 = arith.mulf %262, %272 : vector<8x128xf32>
    %284 = arith.addf %282, %283 : vector<8x128xf32>
    %285 = math.tanh %284 : vector<8x128xf32>
    %286 = arith.mulf %280, %285 : vector<8x128xf32>
    %c0_147 = arith.constant 0 : index
    %c0_148 = arith.constant 0 : index
    %287 = vector.load %arg8[%c0_147, %c0_148] : memref<8x128xf32, #tpu.memory_space<vmem>>, vector<8x128xf32>
    tpu.vector_store %arg8[%c0_147, %c0_148], %284 {strides = array<i32>} : memref<8x128xf32, #tpu.memory_space<vmem>>, vector<8x128xf32>,
    %c0_149 = arith.constant 0 : index
    %c0_150 = arith.constant 0 : index
    %288 = vector.load %arg7[%c0_149, %c0_150] : memref<8x128xf32, #tpu.memory_space<vmem>>, vector<8x128xf32>
    tpu.vector_store %arg7[%c0_149, %c0_150], %286 {strides = array<i32>} : memref<8x128xf32, #tpu.memory_space<vmem>>, vector<8x128xf32>,
    %c0_151 = arith.constant 0 : index
    %289 = arith.index_cast %247 : i32 to index
    %c0_152 = arith.constant 0 : index
    %290 = vector.load %arg6[%c0_151, %289, %c0_152] : memref<1x64x128xf32, #tpu.memory_space<vmem>>, vector<1x8x128xf32>
    %291 = vector.shape_cast %290 : vector<1x8x128xf32> to vector<8x128xf32>
    %292 = vector.shape_cast %286 : vector<8x128xf32> to vector<1x8x128xf32>
    tpu.vector_store %arg6[%c0_151, %289, %c0_152], %292 {strides = array<i32>} : memref<1x64x128xf32, #tpu.memory_space<vmem>>, vector<1x8x128xf32>,
    %c6_i32 = arith.constant 6 : i32
    %c8_i32_153 = arith.constant 8 : i32
    %293 = arith.muli %c6_i32, %c8_i32_153 : i32
    %294 = tpu.assume_multiple %293, 8 : i32
    %c0_154 = arith.constant 0 : index
    %c0_155 = arith.constant 0 : index
    %295 = vector.load %arg7[%c0_154, %c0_155] : memref<8x128xf32, #tpu.memory_space<vmem>>, vector<8x128xf32>
    %296 = arith.truncf %295 : vector<8x128xf32> to vector<8x128xbf16>
    %c0_156 = arith.constant 0 : index
    %c0_157 = arith.constant 0 : index
    %297 = vector.load %arg4[%c0_156, %c0_157] : memref<128x512xbf16, #tpu.memory_space<vmem>>, vector<128x512xbf16>
    %cst_158 = arith.constant dense<0.000000e+00> : vector<8x512xf32>
    %298 = tpu.matmul %296, %297, %cst_158 {dimension_numbers = #tpu.dot_dimension_numbers<[1], [0], [0], [1], [0, 0, 1, 1], [], []>} : vector<8x128xbf16>, vector<128x512xbf16>, vector<8x512xf32> -> vector<8x512xf32>
    %299 = arith.index_cast %294 : i32 to index
    %c0_159 = arith.constant 0 : index
    %300 = vector.load %arg9[%299, %c0_159] : memref<64x512xf32, #tpu.memory_space<vmem>>, vector<8x512xf32>
    %301 = arith.addf %300, %298 : vector<8x512xf32>
    %302 = vector.extract_strided_slice %301 {offsets = [0, 0], sizes = [8, 128], strides = [1, 1]} : vector<8x512xf32> to vector<8x128xf32>
    %cst_160 = arith.constant 5.000000e-01 : f32
    %303 = vector.broadcast %cst_160 : f32 to vector<8x128xf32>
    %304 = arith.mulf %303, %302 : vector<8x128xf32>
    %305 = math.tanh %304 : vector<8x128xf32>
    %cst_161 = arith.constant 5.000000e-01 : f32
    %306 = vector.broadcast %cst_161 : f32 to vector<8x128xf32>
    %307 = arith.mulf %306, %305 : vector<8x128xf32>
    %cst_162 = arith.constant 5.000000e-01 : f32
    %308 = vector.broadcast %cst_162 : f32 to vector<8x128xf32>
    %309 = arith.addf %307, %308 : vector<8x128xf32>
    %310 = vector.extract_strided_slice %301 {offsets = [0, 128], sizes = [8, 128], strides = [1, 1]} : vector<8x512xf32> to vector<8x128xf32>
    %cst_163 = arith.constant 5.000000e-01 : f32
    %311 = vector.broadcast %cst_163 : f32 to vector<8x128xf32>
    %312 = arith.mulf %311, %310 : vector<8x128xf32>
    %313 = math.tanh %312 : vector<8x128xf32>
    %cst_164 = arith.constant 5.000000e-01 : f32
    %314 = vector.broadcast %cst_164 : f32 to vector<8x128xf32>
    %315 = arith.mulf %314, %313 : vector<8x128xf32>
    %cst_165 = arith.constant 5.000000e-01 : f32
    %316 = vector.broadcast %cst_165 : f32 to vector<8x128xf32>
    %317 = arith.addf %315, %316 : vector<8x128xf32>
    %318 = vector.extract_strided_slice %301 {offsets = [0, 256], sizes = [8, 128], strides = [1, 1]} : vector<8x512xf32> to vector<8x128xf32>
    %319 = math.tanh %318 : vector<8x128xf32>
    %320 = vector.extract_strided_slice %301 {offsets = [0, 384], sizes = [8, 128], strides = [1, 1]} : vector<8x512xf32> to vector<8x128xf32>
    %cst_166 = arith.constant 5.000000e-01 : f32
    %321 = vector.broadcast %cst_166 : f32 to vector<8x128xf32>
    %322 = arith.mulf %321, %320 : vector<8x128xf32>
    %323 = math.tanh %322 : vector<8x128xf32>
    %cst_167 = arith.constant 5.000000e-01 : f32
    %324 = vector.broadcast %cst_167 : f32 to vector<8x128xf32>
    %325 = arith.mulf %324, %323 : vector<8x128xf32>
    %cst_168 = arith.constant 5.000000e-01 : f32
    %326 = vector.broadcast %cst_168 : f32 to vector<8x128xf32>
    %327 = arith.addf %325, %326 : vector<8x128xf32>
    %c0_169 = arith.constant 0 : index
    %c0_170 = arith.constant 0 : index
    %328 = vector.load %arg8[%c0_169, %c0_170] : memref<8x128xf32, #tpu.memory_space<vmem>>, vector<8x128xf32>
    %329 = arith.mulf %317, %328 : vector<8x128xf32>
    %330 = arith.mulf %309, %319 : vector<8x128xf32>
    %331 = arith.addf %329, %330 : vector<8x128xf32>
    %332 = math.tanh %331 : vector<8x128xf32>
    %333 = arith.mulf %327, %332 : vector<8x128xf32>
    %c0_171 = arith.constant 0 : index
    %c0_172 = arith.constant 0 : index
    %334 = vector.load %arg8[%c0_171, %c0_172] : memref<8x128xf32, #tpu.memory_space<vmem>>, vector<8x128xf32>
    tpu.vector_store %arg8[%c0_171, %c0_172], %331 {strides = array<i32>} : memref<8x128xf32, #tpu.memory_space<vmem>>, vector<8x128xf32>,
    %c0_173 = arith.constant 0 : index
    %c0_174 = arith.constant 0 : index
    %335 = vector.load %arg7[%c0_173, %c0_174] : memref<8x128xf32, #tpu.memory_space<vmem>>, vector<8x128xf32>
    tpu.vector_store %arg7[%c0_173, %c0_174], %333 {strides = array<i32>} : memref<8x128xf32, #tpu.memory_space<vmem>>, vector<8x128xf32>,
    %c0_175 = arith.constant 0 : index
    %336 = arith.index_cast %294 : i32 to index
    %c0_176 = arith.constant 0 : index
    %337 = vector.load %arg6[%c0_175, %336, %c0_176] : memref<1x64x128xf32, #tpu.memory_space<vmem>>, vector<1x8x128xf32>
    %338 = vector.shape_cast %337 : vector<1x8x128xf32> to vector<8x128xf32>
    %339 = vector.shape_cast %333 : vector<8x128xf32> to vector<1x8x128xf32>
    tpu.vector_store %arg6[%c0_175, %336, %c0_176], %339 {strides = array<i32>} : memref<1x64x128xf32, #tpu.memory_space<vmem>>, vector<1x8x128xf32>,
    %c7_i32 = arith.constant 7 : i32
    %c8_i32_177 = arith.constant 8 : i32
    %340 = arith.muli %c7_i32, %c8_i32_177 : i32
    %341 = tpu.assume_multiple %340, 8 : i32
    %c0_178 = arith.constant 0 : index
    %c0_179 = arith.constant 0 : index
    %342 = vector.load %arg7[%c0_178, %c0_179] : memref<8x128xf32, #tpu.memory_space<vmem>>, vector<8x128xf32>
    %343 = arith.truncf %342 : vector<8x128xf32> to vector<8x128xbf16>
    %c0_180 = arith.constant 0 : index
    %c0_181 = arith.constant 0 : index
    %344 = vector.load %arg4[%c0_180, %c0_181] : memref<128x512xbf16, #tpu.memory_space<vmem>>, vector<128x512xbf16>
    %cst_182 = arith.constant dense<0.000000e+00> : vector<8x512xf32>
    %345 = tpu.matmul %343, %344, %cst_182 {dimension_numbers = #tpu.dot_dimension_numbers<[1], [0], [0], [1], [0, 0, 1, 1], [], []>} : vector<8x128xbf16>, vector<128x512xbf16>, vector<8x512xf32> -> vector<8x512xf32>
    %346 = arith.index_cast %341 : i32 to index
    %c0_183 = arith.constant 0 : index
    %347 = vector.load %arg9[%346, %c0_183] : memref<64x512xf32, #tpu.memory_space<vmem>>, vector<8x512xf32>
    %348 = arith.addf %347, %345 : vector<8x512xf32>
    %349 = vector.extract_strided_slice %348 {offsets = [0, 0], sizes = [8, 128], strides = [1, 1]} : vector<8x512xf32> to vector<8x128xf32>
    %cst_184 = arith.constant 5.000000e-01 : f32
    %350 = vector.broadcast %cst_184 : f32 to vector<8x128xf32>
    %351 = arith.mulf %350, %349 : vector<8x128xf32>
    %352 = math.tanh %351 : vector<8x128xf32>
    %cst_185 = arith.constant 5.000000e-01 : f32
    %353 = vector.broadcast %cst_185 : f32 to vector<8x128xf32>
    %354 = arith.mulf %353, %352 : vector<8x128xf32>
    %cst_186 = arith.constant 5.000000e-01 : f32
    %355 = vector.broadcast %cst_186 : f32 to vector<8x128xf32>
    %356 = arith.addf %354, %355 : vector<8x128xf32>
    %357 = vector.extract_strided_slice %348 {offsets = [0, 128], sizes = [8, 128], strides = [1, 1]} : vector<8x512xf32> to vector<8x128xf32>
    %cst_187 = arith.constant 5.000000e-01 : f32
    %358 = vector.broadcast %cst_187 : f32 to vector<8x128xf32>
    %359 = arith.mulf %358, %357 : vector<8x128xf32>
    %360 = math.tanh %359 : vector<8x128xf32>
    %cst_188 = arith.constant 5.000000e-01 : f32
    %361 = vector.broadcast %cst_188 : f32 to vector<8x128xf32>
    %362 = arith.mulf %361, %360 : vector<8x128xf32>
    %cst_189 = arith.constant 5.000000e-01 : f32
    %363 = vector.broadcast %cst_189 : f32 to vector<8x128xf32>
    %364 = arith.addf %362, %363 : vector<8x128xf32>
    %365 = vector.extract_strided_slice %348 {offsets = [0, 256], sizes = [8, 128], strides = [1, 1]} : vector<8x512xf32> to vector<8x128xf32>
    %366 = math.tanh %365 : vector<8x128xf32>
    %367 = vector.extract_strided_slice %348 {offsets = [0, 384], sizes = [8, 128], strides = [1, 1]} : vector<8x512xf32> to vector<8x128xf32>
    %cst_190 = arith.constant 5.000000e-01 : f32
    %368 = vector.broadcast %cst_190 : f32 to vector<8x128xf32>
    %369 = arith.mulf %368, %367 : vector<8x128xf32>
    %370 = math.tanh %369 : vector<8x128xf32>
    %cst_191 = arith.constant 5.000000e-01 : f32
    %371 = vector.broadcast %cst_191 : f32 to vector<8x128xf32>
    %372 = arith.mulf %371, %370 : vector<8x128xf32>
    %cst_192 = arith.constant 5.000000e-01 : f32
    %373 = vector.broadcast %cst_192 : f32 to vector<8x128xf32>
    %374 = arith.addf %372, %373 : vector<8x128xf32>
    %c0_193 = arith.constant 0 : index
    %c0_194 = arith.constant 0 : index
    %375 = vector.load %arg8[%c0_193, %c0_194] : memref<8x128xf32, #tpu.memory_space<vmem>>, vector<8x128xf32>
    %376 = arith.mulf %364, %375 : vector<8x128xf32>
    %377 = arith.mulf %356, %366 : vector<8x128xf32>
    %378 = arith.addf %376, %377 : vector<8x128xf32>
    %379 = math.tanh %378 : vector<8x128xf32>
    %380 = arith.mulf %374, %379 : vector<8x128xf32>
    %c0_195 = arith.constant 0 : index
    %c0_196 = arith.constant 0 : index
    %381 = vector.load %arg8[%c0_195, %c0_196] : memref<8x128xf32, #tpu.memory_space<vmem>>, vector<8x128xf32>
    tpu.vector_store %arg8[%c0_195, %c0_196], %378 {strides = array<i32>} : memref<8x128xf32, #tpu.memory_space<vmem>>, vector<8x128xf32>,
    %c0_197 = arith.constant 0 : index
    %c0_198 = arith.constant 0 : index
    %382 = vector.load %arg7[%c0_197, %c0_198] : memref<8x128xf32, #tpu.memory_space<vmem>>, vector<8x128xf32>
    tpu.vector_store %arg7[%c0_197, %c0_198], %380 {strides = array<i32>} : memref<8x128xf32, #tpu.memory_space<vmem>>, vector<8x128xf32>,
    %c0_199 = arith.constant 0 : index
    %383 = arith.index_cast %341 : i32 to index
    %c0_200 = arith.constant 0 : index
    %384 = vector.load %arg6[%c0_199, %383, %c0_200] : memref<1x64x128xf32, #tpu.memory_space<vmem>>, vector<1x8x128xf32>
    %385 = vector.shape_cast %384 : vector<1x8x128xf32> to vector<8x128xf32>
    %386 = vector.shape_cast %380 : vector<8x128xf32> to vector<1x8x128xf32>
    tpu.vector_store %arg6[%c0_199, %383, %c0_200], %386 {strides = array<i32>} : memref<1x64x128xf32, #tpu.memory_space<vmem>>, vector<1x8x128xf32>,
    %c8_i32_201 = arith.constant 8 : i32
    return
  }
  func.func @transform_0(%arg0: i32, %arg1: i32) -> (i32, i32, i32) {
    %c0_i32 = arith.constant 0 : i32
    %c0_i32_0 = arith.constant 0 : i32
    return %arg0, %arg1, %c0_i32 : i32, i32, i32
  }
  func.func @transform_1(%arg0: i32, %arg1: i32) -> (i32, i32) {
    %c0_i32 = arith.constant 0 : i32
    %c0_i32_0 = arith.constant 0 : i32
    %c0_i32_1 = arith.constant 0 : i32
    return %c0_i32, %c0_i32_0 : i32, i32
  }
  func.func @transform_2(%arg0: i32, %arg1: i32) -> (i32, i32) {
    %c0_i32 = arith.constant 0 : i32
    %c0_i32_0 = arith.constant 0 : i32
    %c0_i32_1 = arith.constant 0 : i32
    return %c0_i32, %c0_i32_0 : i32, i32
  }
  func.func @transform_3(%arg0: i32, %arg1: i32) -> (i32, i32) {
    %c0_i32 = arith.constant 0 : i32
    %c0_i32_0 = arith.constant 0 : i32
    %c0_i32_1 = arith.constant 0 : i32
    return %c0_i32, %c0_i32_0 : i32, i32
  }
  func.func @transform_4(%arg0: i32, %arg1: i32) -> (i32, i32, i32) {
    %c0_i32 = arith.constant 0 : i32
    %c0_i32_0 = arith.constant 0 : i32
    return %arg0, %arg1, %c0_i32 : i32, i32, i32
  }
}

</mosaic_0001>

<bundles_post_ra>
// kernel: tpu_custom_call.1
= control target key start
LH: loop header
LB: loop body
LE: loop exit
PB: predicated region body
PF: predicated region fallthrough
CT: control target
= control target key end

     0   :  { %9 = vsyncpa [#allocation6], 0  ;;  %s4257_s0 = inlined_call_operand.vmem [shape: bf16[1,64,16], index: 0, kind: input, shape index: {}]   ;;  %s4258_s1 = inlined_call_operand.vmem [shape: bf16[16,512], index: 1, kind: input, shape index: {}]   ;;  %s4259_s2 = inlined_call_operand.hbm [shape: bf16[128,512], index: 2, kind: input, shape index: {}]   ;;  %s4260_s3 = inlined_call_operand.vmem [shape: f32[1,512], index: 3, kind: input, shape index: {}]   ;;  %s4261_s4 = inlined_call_operand.hbm [shape: f32[1,64,128], index: 4, kind: output, shape index: {}]  }
   0x1   :  { %10 = vsyncpa [#allocation7], 0  ;;  %s19_s17 = sshll.u32 %s4259_s2, 4  ;;  %s4004_s18 = smov [#allocation5]   ;;  %s20_s17 = int_to_ptr.hbm [resolvable:$true] %s19_s17 }
   0x2   :  { %s21_s19 = sshll.u32 %s4004_s18, 4  ;;  %s4005_s20 = smov 256   ;;  %s22_s19 = int_to_ptr.vmem [resolvable:$true] %s21_s19 }
   0x3   :  { %s4006_s21 = smov 16  }
   0x4   :  { %27 = dma.hbm_to_vmem [thread:$0]  %s20_s17, 4096, %s22_s19, [#allocation6], %s4005_s20, %s4005_s20, %s4006_s21  }
   0x5   :  { %4000 = dma.done.wait [#allocation6], 4096  }
   0x6   :  { %4001 = vsyncadd [#allocation6], 4294963200  ;;  %v2547_v0 = vld [vmem:[%s4258_s1] sm:$0xf]  ;;  %v3607_v1 = vld [vmem:[%s4258_s1 + $0xc] sm:$0xf0] }
   0x7   :  { %v3605_v2 = vld [vmem:[%s4258_s1 + $0x4] sm:$0xf]  ;;  %v2548_v3 = vor.u32 %v3607_v1, %v2547_v0  ;;  %v2549_v4 = vld [vmem:[%s4258_s1 + $0x10] sm:$0xf0]  ;;  %v2555_v5 = vld [vmem:[%s4258_s1 + $0x8] sm:$0xf] }
   0x8   :  { %v3608_v6 = vld [vmem:[%s4258_s1 + $0x14] sm:$0xf0]  ;;  %v2552_v7 = vor.u32 %v3605_v2, %v2549_v4  ;;  %v3606_v9 = vld [vmem:[%s4258_s1 + $0xc] sm:$0xf]  ;;  %v2557_v10 = vld [vmem:[%s4258_s1 + $0x18] sm:$0xf0] }
   0x9   :  { %v2556_v8 = vor.u32 %v3608_v6, %v2555_v5  ;;  %v3601_v11 = vld [vmem:[%s4257_s0] sm:$0xff]  ;;  %vm103_vm0 = vcmask 130048   ;;  %123 = vmatpush.bf16.msra.mxu0 %v2548_v3  ;;  %v2560_v12 = vor.u32 %v3606_v9, %v2557_v10  ;;  %v3639_v14 = vld [vmem:[#allocation5 + $0xec] sm:$0xf0]  ;;  %v2693_v17 = vld [vmem:[#allocation5 + $0xf0] sm:$0xf0] }
   0xa   :  { %v2691_v13 = vld [vmem:[#allocation5 + $0xe0] sm:$0xf]  ;;  %v3637_v15 = vld [vmem:[#allocation5 + $0xe4] sm:$0xf]  ;;  %152 = vmatpush.bf16.msra.mxu1 %v2552_v7  ;;  %v2699_v18 = vld [vmem:[#allocation5 + $0xe8] sm:$0xf] }
   0xb   :  { %181 = vmatpush.bf16.msra.mxu2 %v2556_v8  ;;  %v2692_v16 = vor.u32 %v3639_v14, %v2691_v13  ;;  %v3640_v19 = vld [vmem:[#allocation5 + $0xf4] sm:$0xf0]  ;;  %210 = vmatpush.bf16.msra.mxu3 %v2560_v12  ;;  %v2696_v20 = vor.u32 %v3637_v15, %v2693_v17  ;;  %v3638_v22 = vld [vmem:[#allocation5 + $0xec] sm:$0xf]  ;;  %v2701_v23 = vld [vmem:[#allocation5 + $0xf8] sm:$0xf0] }
   0xc   :  { %v2700_v21 = vor.u32 %v3640_v19, %v2699_v18  ;;  %v2675_v24 = vld [vmem:[#allocation5 + $0xc0] sm:$0xf]  ;;  %2561 = vmatmul.msk.bf16.vlgmr.msra.gmra.mxu0 %vm103_vm0, %v3601_v11  ;;  %v2704_v25 = vor.u32 %v3638_v22, %v2701_v23  ;;  %v3635_v26 = vld [vmem:[#allocation5 + $0xcc] sm:$0xf0]  ;;  %v3633_v27 = vld [vmem:[#allocation5 + $0xc4] sm:$0xf] }
   0xd   :  { %v2677_v28 = vld [vmem:[#allocation5 + $0xd0] sm:$0xf0]  ;;  %2565 = vmatmul.msk.bf16.vlgmr.msra.gmra.mxu1 %vm103_vm0, %v3601_v11  ;;  %v2683_v29 = vld [vmem:[#allocation5 + $0xc8] sm:$0xf]  ;;  %v3636_v30 = vld [vmem:[#allocation5 + $0xd4] sm:$0xf0]  ;;  %458 = vmatpush.bf16.msrb.mxu0 %v2692_v16  ;;  %v2676_v32 = vor.u32 %v3635_v26, %v2675_v24 }
   0xe   :  { %2569 = vmatmul.msk.bf16.vlgmr.msra.gmra.mxu2 %vm103_vm0, %v3601_v11  ;;  %v3634_v31 = vld [vmem:[#allocation5 + $0xcc] sm:$0xf]  ;;  %2573 = vmatmul.msk.bf16.vlgmr.msra.gmra.mxu3 %vm103_vm0, %v3601_v11  ;;  %v2685_v33 = vld [vmem:[#allocation5 + $0xd8] sm:$0xf0]  ;;  %v2680_v34 = vor.u32 %v3633_v27, %v2677_v28  ;;  %v2684_v35 = vor.u32 %v3636_v30, %v2683_v29  ;;  %v2659_v36 = vld [vmem:[#allocation5 + $0xa0] sm:$0xf] }
   0xf   :  { %471 = vmatpush.bf16.msrb.mxu1 %v2696_v20  ;;  %484 = vmatpush.bf16.msrb.mxu2 %v2700_v21  ;;  %v3631_v37 = vld [vmem:[#allocation5 + $0xac] sm:$0xf0]  ;;  %v3629_v38 = vld [vmem:[#allocation5 + $0xa4] sm:$0xf]  ;;  %v2688_v39 = vor.u32 %v3634_v31, %v2685_v33  ;;  %v2661_v40 = vld [vmem:[#allocation5 + $0xb0] sm:$0xf0] }
  0x10   :  { %497 = vmatpush.bf16.msrb.mxu3 %v2704_v25  ;;  %v2667_v41 = vld [vmem:[#allocation5 + $0xa8] sm:$0xf]  ;;  %v3632_v42 = vld [vmem:[#allocation5 + $0xb4] sm:$0xf0]  ;;  %v3630_v43 = vld [vmem:[#allocation5 + $0xac] sm:$0xf]  ;;  %v2660_v45 = vor.u32 %v3631_v37, %v2659_v36  ;;  %v2664_v46 = vor.u32 %v3629_v38, %v2661_v40 }
  0x11   :  { %v2669_v44 = vld [vmem:[#allocation5 + $0xb8] sm:$0xf0]  ;;  %459 = vmatpush.bf16.msrb.mxu0 %v2676_v32  ;;  %v2668_v47 = vor.u32 %v3632_v42, %v2667_v41  ;;  %v2643_v48 = vld [vmem:[#allocation5 + $0x80] sm:$0xf]  ;;  %v3627_v49 = vld [vmem:[#allocation5 + $0x8c] sm:$0xf0] }
  0x12   :  { %v3625_v50 = vld [vmem:[#allocation5 + $0x84] sm:$0xf]  ;;  %v2672_v51 = vor.u32 %v3630_v43, %v2669_v44  ;;  %v2645_v52 = vld [vmem:[#allocation5 + $0x90] sm:$0xf0]  ;;  %v2651_v53 = vld [vmem:[#allocation5 + $0x88] sm:$0xf]  ;;  %v2644_v58 = vor.u32 %v3627_v49, %v2643_v48 }
  0x13   :  { %472 = vmatpush.bf16.msrb.mxu1 %v2680_v34  ;;  %485 = vmatpush.bf16.msrb.mxu2 %v2684_v35  ;;  %v3628_v54 = vld [vmem:[#allocation5 + $0x94] sm:$0xf0]  ;;  %v3626_v55 = vld [vmem:[#allocation5 + $0x8c] sm:$0xf]  ;;  %v2653_v56 = vld [vmem:[#allocation5 + $0x98] sm:$0xf0]  ;;  %v2648_v59 = vor.u32 %v3625_v50, %v2645_v52 }
  0x14   :  { %498 = vmatpush.bf16.msrb.mxu3 %v2688_v39  ;;  %v3602_v57 = vld [vmem:[%s4257_s0 + $0x8] sm:$0xff]  ;;  %v2652_v60 = vor.u32 %v3628_v54, %v2651_v53  ;;  %v2627_v61 = vld [vmem:[#allocation5 + $0x60] sm:$0xf]  ;;  %v3623_v62 = vld [vmem:[#allocation5 + $0x6c] sm:$0xf0]  ;;  %v2656_v0 = vor.u32 %v3626_v55, %v2653_v56  ;;  %v4007_v48 = vmov 0.0|0.0  }
  0x15   :  { %460 = vmatpush.bf16.msrb.mxu0 %v2660_v45  ;;  %v3621_v63 = vld [vmem:[#allocation5 + $0x64] sm:$0xf]  ;;  %v2629_v1 = vld [vmem:[#allocation5 + $0x70] sm:$0xf0]  ;;  %v2635_v2 = vld [vmem:[#allocation5 + $0x68] sm:$0xf]  ;;  %v2628_v6 = vor.u32 %v3623_v62, %v2627_v61 }
  0x16   :  { %v3624_v3 = vld [vmem:[#allocation5 + $0x74] sm:$0xf0]  ;;  %v3622_v4 = vld [vmem:[#allocation5 + $0x6c] sm:$0xf]  ;;  %v2637_v5 = vld [vmem:[#allocation5 + $0x78] sm:$0xf0]  ;;  %v2632_v7 = vor.u32 %v3621_v63, %v2629_v1 }
  0x17   :  { %473 = vmatpush.bf16.msrb.mxu1 %v2664_v46  ;;  %486 = vmatpush.bf16.msrb.mxu2 %v2668_v47  ;;  %v2636_v8 = vor.u32 %v3624_v3, %v2635_v2  ;;  %v2611_v9 = vld [vmem:[#allocation5 + $0x40] sm:$0xf]  ;;  %v3619_v10 = vld [vmem:[#allocation5 + $0x4c] sm:$0xf0]  ;;  %v3617_v11 = vld [vmem:[#allocation5 + $0x44] sm:$0xf]  ;;  %v2640_v12 = vor.u32 %v3622_v4, %v2637_v5 }
  0x18   :  { %499 = vmatpush.bf16.msrb.mxu3 %v2672_v51  ;;  %v2613_v13 = vld [vmem:[#allocation5 + $0x50] sm:$0xf0]  ;;  %v2619_v14 = vld [vmem:[#allocation5 + $0x48] sm:$0xf]  ;;  %v3620_v15 = vld [vmem:[#allocation5 + $0x54] sm:$0xf0]  ;;  %v2612_v18 = vor.u32 %v3619_v10, %v2611_v9 }
  0x19   :  { %461 = vmatpush.bf16.msrb.mxu0 %v2644_v58  ;;  %v3618_v16 = vld [vmem:[#allocation5 + $0x4c] sm:$0xf]  ;;  %v2621_v17 = vld [vmem:[#allocation5 + $0x58] sm:$0xf0]  ;;  %v2616_v19 = vor.u32 %v3617_v11, %v2613_v13  ;;  %v2620_v20 = vor.u32 %v3620_v15, %v2619_v14  ;;  %v2595_v21 = vld [vmem:[#allocation5 + $0x20] sm:$0xf] }
  0x1a   :  { %v3615_v22 = vld [vmem:[#allocation5 + $0x2c] sm:$0xf0]  ;;  %v3613_v23 = vld [vmem:[#allocation5 + $0x24] sm:$0xf]  ;;  %v2624_v24 = vor.u32 %v3618_v16, %v2621_v17  ;;  %v2597_v25 = vld [vmem:[#allocation5 + $0x30] sm:$0xf0] }
  0x1b   :  { %474 = vmatpush.bf16.msrb.mxu1 %v2648_v59  ;;  %487 = vmatpush.bf16.msrb.mxu2 %v2652_v60  ;;  %v2603_v26 = vld [vmem:[#allocation5 + $0x28] sm:$0xf]  ;;  %v3616_v27 = vld [vmem:[#allocation5 + $0x34] sm:$0xf0]  ;;  %v3614_v28 = vld [vmem:[#allocation5 + $0x2c] sm:$0xf]  ;;  %v2596_v30 = vor.u32 %v3615_v22, %v2595_v21  ;;  %v2600_v31 = vor.u32 %v3613_v23, %v2597_v25 }
  0x1c   :  { %2562 = vmatmul.msk.bf16.gmra.mxu0 %vm103_vm0, %v3602_v57  ;;  %500 = vmatpush.bf16.msrb.mxu3 %v2656_v0  ;;  %v2605_v29 = vld [vmem:[#allocation5 + $0x38] sm:$0xf0]  ;;  %v2604_v32 = vor.u32 %v3616_v27, %v2603_v26  ;;  %v2579_v33 = vld [vmem:[#allocation5] sm:$0xf]  ;;  %v3611_v34 = vld [vmem:[#allocation5 + $0xc] sm:$0xf0] }
  0x1d   :  { %2566 = vmatmul.msk.bf16.gmra.mxu1 %vm103_vm0, %v3602_v57  ;;  %462 = vmatpush.bf16.msrb.mxu0 %v2628_v6  ;;  %v3609_v35 = vld [vmem:[#allocation5 + $0x4] sm:$0xf]  ;;  %v2608_v36 = vor.u32 %v3614_v28, %v2605_v29  ;;  %v2581_v37 = vld [vmem:[#allocation5 + $0x10] sm:$0xf0]  ;;  %v2587_v38 = vld [vmem:[#allocation5 + $0x8] sm:$0xf]  ;;  %v2580_v42 = vor.u32 %v3611_v34, %v2579_v33 }
  0x1e   :  { %2570 = vmatmul.msk.bf16.gmra.mxu2 %vm103_vm0, %v3602_v57  ;;  %2574 = vmatmul.msk.bf16.gmra.mxu3 %vm103_vm0, %v3602_v57  ;;  %v3612_v39 = vld [vmem:[#allocation5 + $0x14] sm:$0xf0]  ;;  %v3610_v40 = vld [vmem:[#allocation5 + $0xc] sm:$0xf]  ;;  %v2589_v41 = vld [vmem:[#allocation5 + $0x18] sm:$0xf0]  ;;  %v2584_v43 = vor.u32 %v3609_v35, %v2581_v37 }
  0x1f   :  { %475 = vmatpush.bf16.msrb.mxu1 %v2632_v7  ;;  %488 = vmatpush.bf16.msrb.mxu2 %v2636_v8  ;;  %v2588_v44 = vor.u32 %v3612_v39, %v2587_v38  ;;  %v3603_v45 = vld [vmem:[%s4257_s0 + $0x10] sm:$0xff]  ;;  %v2592_v46 = vor.u32 %v3610_v40, %v2589_v41  ;;  %v3604_v47 = vld [vmem:[%s4257_s0 + $0x18] sm:$0xff]  ;;  %v53_v51 = vld [vmem:[%s4260_s3] sm:$0xf]  ;;  %s4008_s0 = smov [#allocation8]   ;;  %s2509_s22 = sshll.u32 %s4261_s4, 4  ;;  %s2510_s22 = int_to_ptr.hbm [resolvable:$true] %s2509_s22 }
  0x20   :  { %501 = vmatpush.bf16.msrb.mxu3 %v2640_v12  ;;  %v4098_v52 = vperm.slane %v53_v51, 0  ;;  %v4102_v54 = vperm.slane %v53_v51, 1  ;;  %v4112_v60 = vperm.slane %v53_v51, 2  ;;  %v4114_v61 = vperm.slane %v53_v51, 3  ;;  %v2819_v15 = vld [vmem:[#allocation5 + $0xe0] sm:$0xf] }
  0x21   :  { %463 = vmatpush.bf16.msrb.mxu0 %v2612_v18  ;;  %v3671_v16 = vld [vmem:[#allocation5 + $0xec] sm:$0xf0]  ;;  %v3669_v17 = vld [vmem:[#allocation5 + $0xe4] sm:$0xf]  ;;  %v2821_v22 = vld [vmem:[#allocation5 + $0xf0] sm:$0xf0] }
  0x22   :  { %v2820_v21 = vor.u32 %v3671_v16, %v2819_v15  ;;  %v2827_v23 = vld [vmem:[#allocation5 + $0xe8] sm:$0xf]  ;;  %v2824_v28 = vor.u32 %v3669_v17, %v2821_v22  ;;  %v2803_v34 = vld [vmem:[#allocation5 + $0xc0] sm:$0xf]  ;;  %v3667_v35 = vld [vmem:[#allocation5 + $0xcc] sm:$0xf0] }
  0x23   :  { %476 = vmatpush.bf16.msrb.mxu1 %v2616_v19  ;;  %489 = vmatpush.bf16.msrb.mxu2 %v2620_v20  ;;  %v2804_v37 = vor.u32 %v3667_v35, %v2803_v34  ;;  %v2805_v38 = vld [vmem:[#allocation5 + $0xd0] sm:$0xf0]  ;;  %v2811_v39 = vld [vmem:[#allocation5 + $0xc8] sm:$0xf]  ;;  %v3668_v40 = vld [vmem:[#allocation5 + $0xd4] sm:$0xf0] }
  0x24   :  { %502 = vmatpush.bf16.msrb.mxu3 %v2624_v24  ;;  %v3672_v24 = vld [vmem:[#allocation5 + $0xf4] sm:$0xf0]  ;;  %v3661_v51 = vld [vmem:[#allocation5 + $0xa4] sm:$0xf]  ;;  %v3662_v16 = vld [vmem:[#allocation5 + $0xac] sm:$0xf] }
  0x25   :  { %464 = vmatpush.bf16.msrb.mxu0 %v2596_v30  ;;  %v2828_v29 = vor.u32 %v3672_v24, %v2827_v23  ;;  %v3670_v30 = vld [vmem:[#allocation5 + $0xec] sm:$0xf]  ;;  %v2797_v17 = vld [vmem:[#allocation5 + $0xb8] sm:$0xf0]  ;;  %v3659_v22 = vld [vmem:[#allocation5 + $0x8c] sm:$0xf0] }
  0x26   :  { %v3657_v23 = vld [vmem:[#allocation5 + $0x84] sm:$0xf]  ;;  %v2781_v34 = vld [vmem:[#allocation5 + $0x98] sm:$0xf0]  ;;  %s2507_s3 = sshll.u32 %s4008_s0, 4  ;;  %s4009_s23 = smov 128   ;;  %s2508_s3 = int_to_ptr.vmem [resolvable:$true] %s2507_s3 }
  0x27   :  { %477 = vmatpush.bf16.msrb.mxu1 %v2600_v31  ;;  %490 = vmatpush.bf16.msrb.mxu2 %v2604_v32  ;;  %v2829_v31 = vld [vmem:[#allocation5 + $0xf8] sm:$0xf0]  ;;  %s4010_s24 = smov 8  }
  0x28   :  { %503 = vmatpush.bf16.msrb.mxu3 %v2608_v36  ;;  %v2832_v33 = vor.u32 %v3670_v30, %v2829_v31  ;;  %v3665_v36 = vld [vmem:[#allocation5 + $0xc4] sm:$0xf] }
  0x29   :  { %465 = vmatpush.bf16.msrb.mxu0 %v2580_v42  ;;  %v2808_v41 = vor.u32 %v3665_v36, %v2805_v38  ;;  %v2812_v42 = vor.u32 %v3668_v40, %v2811_v39  ;;  %v3655_v38 = vld [vmem:[#allocation5 + $0x6c] sm:$0xf0]  ;;  %v3653_v39 = vld [vmem:[#allocation5 + $0x64] sm:$0xf] }
  0x2b   :  { %478 = vmatpush.bf16.msrb.mxu1 %v2584_v43  ;;  %491 = vmatpush.bf16.msrb.mxu2 %v2588_v44  ;;  %v3666_v43 = vld [vmem:[#allocation5 + $0xcc] sm:$0xf]  ;;  %v2813_v44 = vld [vmem:[#allocation5 + $0xd8] sm:$0xf0] }
  0x2c   :  { %2563 = vmatmul.msk.bf16.gmra.mxu0 %vm103_vm0, %v3603_v45  ;;  %504 = vmatpush.bf16.msrb.mxu3 %v2592_v46 }
  0x2d   :  { %2567 = vmatmul.msk.bf16.gmra.mxu1 %vm103_vm0, %v3603_v45  ;;  %737 = vmatpush.bf16.msra.mxu0 %v2820_v21  ;;  %v2771_v21 = vld [vmem:[#allocation5 + $0x80] sm:$0xf] }
  0x2e   :  { %2571 = vmatmul.msk.bf16.gmra.mxu2 %vm103_vm0, %v3603_v45  ;;  %2575 = vmatmul.msk.bf16.gmra.mxu3 %vm103_vm0, %v3603_v45  ;;  %v2816_v45 = vor.u32 %v3666_v43, %v2813_v44  ;;  %v2772_v24 = vor.u32 %v3659_v22, %v2771_v21  ;;  %v2757_v44 = vld [vmem:[#allocation5 + $0x70] sm:$0xf0]  ;;  %v3652_v21 = vld [vmem:[#allocation5 + $0x54] sm:$0xf0] }
  0x2f   :  { %750 = vmatpush.bf16.msra.mxu1 %v2824_v28  ;;  %763 = vmatpush.bf16.msra.mxu2 %v2828_v29  ;;  %v2779_v28 = vld [vmem:[#allocation5 + $0x88] sm:$0xf]  ;;  %v3660_v29 = vld [vmem:[#allocation5 + $0x94] sm:$0xf0] }
  0x30   :  { %776 = vmatpush.bf16.msra.mxu3 %v2832_v33  ;;  %v2780_v31 = vor.u32 %v3660_v29, %v2779_v28  ;;  %v3658_v33 = vld [vmem:[#allocation5 + $0x8c] sm:$0xf] }
  0x31   :  { %738 = vmatpush.bf16.msra.mxu0 %v2804_v37  ;;  %v2784_v35 = vor.u32 %v3658_v33, %v2781_v34  ;;  %v2755_v37 = vld [vmem:[#allocation5 + $0x60] sm:$0xf]  ;;  %v3645_v33 = vld [vmem:[#allocation5 + $0x24] sm:$0xf] }
  0x32   :  { %v2756_v43 = vor.u32 %v3655_v38, %v2755_v37  ;;  %v2725_v38 = vld [vmem:[#allocation5 + $0x30] sm:$0xf0] }
  0x33   :  { %751 = vmatpush.bf16.msra.mxu1 %v2808_v41  ;;  %764 = vmatpush.bf16.msra.mxu2 %v2812_v42 }
  0x34   :  { %777 = vmatpush.bf16.msra.mxu3 %v2816_v45  ;;  %v2763_v45 = vld [vmem:[#allocation5 + $0x68] sm:$0xf] }
  0x3c   :  { %2564 = vmatmul.msk.bf16.gmra.mxu0 %vm103_vm0, %v3604_v47 }
  0x3d   :  { %2568 = vmatmul.msk.bf16.gmra.mxu1 %vm103_vm0, %v3604_v47 }
  0x3e   :  { %2572 = vmatmul.msk.bf16.gmra.mxu2 %vm103_vm0, %v3604_v47  ;;  %2576 = vmatmul.msk.bf16.gmra.mxu3 %vm103_vm0, %v3604_v47  ;;  %v2787_v47 = vld [vmem:[#allocation5 + $0xa0] sm:$0xf] }
  0x4c   :  { %466 = vmatmul.bf16.vlgmr.msrb.gmra.mxu0 %v4007_v48 }
  0x4d   :  { %479 = vmatmul.bf16.vlgmr.msrb.gmra.mxu1 %v4007_v48 }
  0x4e   :  { %492 = vmatmul.bf16.vlgmr.msrb.gmra.mxu2 %v4007_v48  ;;  %505 = vmatmul.bf16.vlgmr.msrb.gmra.mxu3 %v4007_v48  ;;  %v3663_v48 = vld [vmem:[#allocation5 + $0xac] sm:$0xf0] }
  0x89   :  { %v4091_v49 = vpop.f32.mrf.mxu0 }
  0x8a   :  { %v4093_v50 = vpop.f32.mrf.mxu1 }
  0x91   :  { %v4100_v53 = vpop.f32.mrf.mxu2  ;;  %v4104_v55 = vpop.f32.mrf.mxu3 }
  0x92   :  { %v127_v56 = vpop.f32.mrf.mxu0  ;;  %v156_v58 = vpop.f32.mrf.mxu1 }
  0x93   :  { %v4107_v57 = vadd.f32 %v127_v56, %v4098_v52  ;;  %v4110_v59 = vadd.f32 %v156_v58, %v4102_v54 }
  0x99   :  { %v185_v62 = vpop.f32.mrf.mxu2  ;;  %v214_v0 = vpop.f32.mrf.mxu3 }
  0x9a   :  { %v4117_v63 = vadd.f32 %v185_v62, %v4112_v60  ;;  %v130_v1 = vpop.f32.mrf.mxu0  ;;  %v4120_v2 = vadd.f32 %v214_v0, %v4114_v61  ;;  %v159_v4 = vpop.f32.mrf.mxu1  ;;  %v2788_v0 = vor.u32 %v3663_v48, %v2787_v47 }
  0x9b   :  { %v4123_v3 = vadd.f32 %v130_v1, %v4098_v52  ;;  %v4126_v5 = vadd.f32 %v159_v4, %v4102_v54  ;;  %v2789_v1 = vld [vmem:[#allocation5 + $0xb0] sm:$0xf0]  ;;  %v2795_v4 = vld [vmem:[#allocation5 + $0xa8] sm:$0xf] }
  0x9c   :  { %739 = vmatpush.bf16.msra.mxu0 %v2788_v0  ;;  %v3654_v0 = vld [vmem:[#allocation5 + $0x6c] sm:$0xf] }
  0xa0   :  { %740 = vmatpush.bf16.msra.mxu0 %v2772_v24  ;;  %v3650_v24 = vld [vmem:[#allocation5 + $0x4c] sm:$0xf] }
  0xa1   :  { %v188_v6 = vpop.f32.mrf.mxu2  ;;  %v217_v8 = vpop.f32.mrf.mxu3 }
  0xa2   :  { %v4129_v7 = vadd.f32 %v188_v6, %v4112_v60  ;;  %v132_v9 = vpop.f32.mrf.mxu0  ;;  %v4132_v10 = vadd.f32 %v217_v8, %v4114_v61  ;;  %v161_v12 = vpop.f32.mrf.mxu1  ;;  %v3664_v6 = vld [vmem:[#allocation5 + $0xb4] sm:$0xf0] }
  0xa3   :  { %v4135_v11 = vadd.f32 %v132_v9, %v4098_v52  ;;  %v4138_v13 = vadd.f32 %v161_v12, %v4102_v54  ;;  %v2796_v15 = vor.u32 %v3664_v6, %v2795_v4 }
  0xa4   :  { %741 = vmatpush.bf16.msra.mxu0 %v2756_v43 }
  0xa5   :  { %765 = vmatpush.bf16.msra.mxu2 %v2796_v15  ;;  %v3649_v15 = vld [vmem:[#allocation5 + $0x44] sm:$0xf] }
  0xa9   :  { %v190_v14 = vpop.f32.mrf.mxu2  ;;  %v219_v19 = vpop.f32.mrf.mxu3  ;;  %766 = vmatpush.bf16.msra.mxu2 %v2780_v31  ;;  %v3647_v31 = vld [vmem:[#allocation5 + $0x2c] sm:$0xf0] }
  0xaa   :  { %v4141_v18 = vadd.f32 %v190_v14, %v4112_v60  ;;  %v135_v20 = vpop.f32.mrf.mxu0  ;;  %v4144_v25 = vadd.f32 %v219_v19, %v4114_v61  ;;  %v164_v27 = vpop.f32.mrf.mxu1  ;;  %v2792_v14 = vor.u32 %v3661_v51, %v2789_v1  ;;  %v2765_v1 = vld [vmem:[#allocation5 + $0x78] sm:$0xf0] }
  0xab   :  { %v4147_v26 = vadd.f32 %v135_v20, %v4098_v52  ;;  %v4150_v32 = vadd.f32 %v164_v27, %v4102_v54  ;;  %v2800_v20 = vor.u32 %v3662_v16, %v2797_v17  ;;  %v2773_v27 = vld [vmem:[#allocation5 + $0x90] sm:$0xf0]  ;;  %v2768_v6 = vor.u32 %v3654_v0, %v2765_v1  ;;  %v2707_v1 = vld [vmem:[#allocation5] sm:$0xf] }
  0xac   :  { %752 = vmatpush.bf16.msra.mxu1 %v2792_v14  ;;  %v2776_v30 = vor.u32 %v3657_v23, %v2773_v27  ;;  %v3651_v14 = vld [vmem:[#allocation5 + $0x4c] sm:$0xf0]  ;;  %v2741_v17 = vld [vmem:[#allocation5 + $0x50] sm:$0xf0]  ;;  %v2749_v27 = vld [vmem:[#allocation5 + $0x58] sm:$0xf0] }
  0xad   :  { %778 = vmatpush.bf16.msra.mxu3 %v2800_v20  ;;  %v2747_v20 = vld [vmem:[#allocation5 + $0x48] sm:$0xf]  ;;  %v2744_v22 = vor.u32 %v3649_v15, %v2741_v17  ;;  %v2752_v28 = vor.u32 %v3650_v24, %v2749_v27  ;;  %v2709_v15 = vld [vmem:[#allocation5 + $0x10] sm:$0xf0]  ;;  %v3644_v17 = vld [vmem:[#allocation5 + $0x14] sm:$0xf0]  ;;  %v126_v27 = vadd.f32 %v4091_v49, %v4098_v52 }
  0xae   :  { %v2748_v23 = vor.u32 %v3652_v21, %v2747_v20 }
  0xb0   :  { %753 = vmatpush.bf16.msra.mxu1 %v2776_v30  ;;  %v2723_v30 = vld [vmem:[#allocation5 + $0x20] sm:$0xf] }
  0xb1   :  { %v193_v46 = vpop.f32.mrf.mxu2  ;;  %v222_v58 = vpop.f32.mrf.mxu3  ;;  %779 = vmatpush.bf16.msra.mxu3 %v2784_v35  ;;  %v2724_v37 = vor.u32 %v3647_v31, %v2723_v30 }
  0xb2   :  { %v4153_v56 = vadd.f32 %v193_v46, %v4112_v60  ;;  %v137_v62 = vpop.f32.mrf.mxu0  ;;  %v4156_v8 = vadd.f32 %v222_v58, %v4114_v61  ;;  %v166_v12 = vpop.f32.mrf.mxu1  ;;  %v3656_v46 = vld [vmem:[#allocation5 + $0x74] sm:$0xf0]  ;;  %v2760_v58 = vor.u32 %v3653_v39, %v2757_v44  ;;  %v2731_v39 = vld [vmem:[#allocation5 + $0x28] sm:$0xf] }
  0xb3   :  { %v4159_v9 = vadd.f32 %v137_v62, %v4098_v52  ;;  %v4162_v19 = vadd.f32 %v166_v12, %v4102_v54  ;;  %v2764_v62 = vor.u32 %v3656_v46, %v2763_v45  ;;  %v2739_v12 = vld [vmem:[#allocation5 + $0x40] sm:$0xf]  ;;  %v2728_v45 = vor.u32 %v3645_v33, %v2725_v38 }
  0xb4   :  { %754 = vmatpush.bf16.msra.mxu1 %v2760_v58  ;;  %v2740_v16 = vor.u32 %v3651_v14, %v2739_v12  ;;  %v2733_v58 = vld [vmem:[#allocation5 + $0x38] sm:$0xf0]  ;;  %v3641_v12 = vld [vmem:[#allocation5 + $0x4] sm:$0xf] }
  0xb5   :  { %767 = vmatpush.bf16.msra.mxu2 %v2764_v62  ;;  %780 = vmatpush.bf16.msra.mxu3 %v2768_v6  ;;  %v3643_v6 = vld [vmem:[#allocation5 + $0xc] sm:$0xf0]  ;;  %v2712_v20 = vor.u32 %v3641_v12, %v2709_v15 }
  0xb6   :  { %742 = vmatpush.bf16.msra.mxu0 %v2740_v16  ;;  %v2708_v14 = vor.u32 %v3643_v6, %v2707_v1  ;;  %v2715_v16 = vld [vmem:[#allocation5 + $0x8] sm:$0xf] }
  0xb7   :  { %v2716_v21 = vor.u32 %v3644_v17, %v2715_v16 }
  0xb8   :  { %755 = vmatpush.bf16.msra.mxu1 %v2744_v22  ;;  %v3642_v22 = vld [vmem:[#allocation5 + $0xc] sm:$0xf] }
  0xb9   :  { %v195_v36 = vpop.f32.mrf.mxu2  ;;  %v224_v41 = vpop.f32.mrf.mxu3  ;;  %768 = vmatpush.bf16.msra.mxu2 %v2748_v23  ;;  %781 = vmatpush.bf16.msra.mxu3 %v2752_v28  ;;  %v2717_v23 = vld [vmem:[#allocation5 + $0x18] sm:$0xf0] }
  0xba   :  { %v4165_v40 = vadd.f32 %v195_v36, %v4112_v60  ;;  %v140_v42 = vpop.f32.mrf.mxu0  ;;  %v4168_v47 = vadd.f32 %v224_v41, %v4114_v61  ;;  %v169_v51 = vpop.f32.mrf.mxu1  ;;  %v3648_v41 = vld [vmem:[#allocation5 + $0x34] sm:$0xf0]  ;;  %743 = vmatpush.bf16.msra.mxu0 %v2724_v37  ;;  %v2720_v24 = vor.u32 %v3642_v22, %v2717_v23 }
  0xbb   :  { %v4171_v48 = vadd.f32 %v140_v42, %v4098_v52  ;;  %v4174_v4 = vadd.f32 %v169_v51, %v4102_v54  ;;  %v2732_v46 = vor.u32 %v3648_v41, %v2731_v39  ;;  %v3646_v51 = vld [vmem:[#allocation5 + $0x2c] sm:$0xf] }
  0xbc   :  { %v2736_v0 = vor.u32 %v3646_v51, %v2733_v58  ;;  %756 = vmatpush.bf16.msra.mxu1 %v2728_v45 }
  0xbd   :  { %769 = vmatpush.bf16.msra.mxu2 %v2732_v46 }
  0xbe   :  { %782 = vmatpush.bf16.msra.mxu3 %v2736_v0  ;;  %744 = vmatpush.bf16.msra.mxu0 %v2708_v14 }
  0xc0   :  { %757 = vmatpush.bf16.msra.mxu1 %v2712_v20 }
  0xc1   :  { %v198_v29 = vpop.f32.mrf.mxu2  ;;  %v227_v35 = vpop.f32.mrf.mxu3  ;;  %770 = vmatpush.bf16.msra.mxu2 %v2716_v21 }
  0xc2   :  { %v4177_v34 = vadd.f32 %v198_v29, %v4112_v60  ;;  %v142_v36 = vpop.f32.mrf.mxu0  ;;  %v4180_v42 = vadd.f32 %v227_v35, %v4114_v61  ;;  %v171_v44 = vpop.f32.mrf.mxu1  ;;  %v155_v29 = vadd.f32 %v4093_v50, %v4102_v54  ;;  %783 = vmatpush.bf16.msra.mxu3 %v2720_v24  ;;  %v213_v50 = vadd.f32 %v4104_v55, %v4114_v61 }
  0xc3   :  { %v4183_v43 = vadd.f32 %v142_v36, %v4098_v52  ;;  %v4186_v62 = vadd.f32 %v171_v44, %v4102_v54  ;;  %v184_v52 = vadd.f32 %v4100_v53, %v4112_v60 }
  0xc9   :  { %v200_v28 = vpop.f32.mrf.mxu2  ;;  %v229_v31 = vpop.f32.mrf.mxu3 }
  0xca   :  { %v4193_v30 = vadd.f32 %v200_v28, %v4112_v60  ;;  %v467_v33 = vpop.f32.mrf.mxu0  ;;  %v4196_v35 = vadd.f32 %v229_v31, %v4114_v61  ;;  %v480_v37 = vpop.f32.mrf.mxu1  ;;  %v2947_v28 = vld [vmem:[#allocation5 + $0xe0] sm:$0xf]  ;;  %v3701_v31 = vld [vmem:[#allocation5 + $0xe4] sm:$0xf] }
  0xcb   :  { %v517_v36 = vadd.f32 %v467_v33, %v126_v27  ;;  %v518_v38 = vadd.f32 %v480_v37, %v155_v29  ;;  %v3703_v29 = vld [vmem:[#allocation5 + $0xec] sm:$0xf0]  ;;  %v2955_v37 = vld [vmem:[#allocation5 + $0xe8] sm:$0xf] }
  0xcc   :  { %v2948_v33 = vor.u32 %v3703_v29, %v2947_v28  ;;  %v2899_v29 = vld [vmem:[#allocation5 + $0x80] sm:$0xf] }
  0xcd   :  { %v521_v39 = vmul.f32 0.5, %v517_v36  ;;  %v525_v49 = vmul.f32 0.5, %v518_v38  ;;  %v2949_v36 = vld [vmem:[#allocation5 + $0xf0] sm:$0xf0]  ;;  %v3704_v38 = vld [vmem:[#allocation5 + $0xf4] sm:$0xf0] }
  0xce   :  { %1017 = vmatpush.bf16.msrb.mxu0 %v2948_v33  ;;  %v3689_v33 = vld [vmem:[#allocation5 + $0x84] sm:$0xf] }
  0xcf   :  { %3872 = vtanh.f32 %v521_v39  ;;  %v2952_v39 = vor.u32 %v3701_v31, %v2949_v36  ;;  %v3691_v31 = vld [vmem:[#allocation5 + $0x8c] sm:$0xf0] }
  0xd0   :  { %3874 = vtanh.f32 %v525_v49  ;;  %v2956_v49 = vor.u32 %v3704_v38, %v2955_v37  ;;  %v2900_v36 = vor.u32 %v3691_v31, %v2899_v29  ;;  %v2901_v37 = vld [vmem:[#allocation5 + $0x90] sm:$0xf0]  ;;  %v2907_v38 = vld [vmem:[#allocation5 + $0x88] sm:$0xf]  ;;  %v2851_v31 = vld [vmem:[#allocation5 + $0x20] sm:$0xf] }
  0xd1   :  { %v493_v54 = vpop.f32.mrf.mxu2  ;;  %v506_v44 = vpop.f32.mrf.mxu3  ;;  %1030 = vmatpush.bf16.msrb.mxu1 %v2952_v39  ;;  %v3692_v39 = vld [vmem:[#allocation5 + $0x94] sm:$0xf0] }
  0xd2   :  { %v519_v41 = vadd.f32 %v493_v54, %v184_v52  ;;  %v469_v45 = vpop.f32.mrf.mxu0  ;;  %v520_v46 = vadd.f32 %v506_v44, %v213_v50  ;;  %v482_v51 = vpop.f32.mrf.mxu1  ;;  %v3702_v52 = vld [vmem:[#allocation5 + $0xec] sm:$0xf]  ;;  %v2957_v50 = vld [vmem:[#allocation5 + $0xf8] sm:$0xf0]  ;;  %1043 = vmatpush.bf16.msrb.mxu2 %v2956_v49  ;;  %v3699_v44 = vld [vmem:[#allocation5 + $0xcc] sm:$0xf0]  ;;  %v2904_v49 = vor.u32 %v3689_v33, %v2901_v37 }
  0xd3   :  { %v2960_v54 = vor.u32 %v3702_v52, %v2957_v50  ;;  %v3697_v45 = vld [vmem:[#allocation5 + $0xc4] sm:$0xf]  ;;  %v2933_v51 = vld [vmem:[#allocation5 + $0xd0] sm:$0xf0]  ;;  %v2908_v52 = vor.u32 %v3692_v39, %v2907_v38  ;;  %v3690_v50 = vld [vmem:[#allocation5 + $0x8c] sm:$0xf] }
  0xd4   :  { %3876 = vtanh.f32 %v519_v41  ;;  %v530_v0 = vmul.f32 0.5, %v520_v46  ;;  %v2931_v41 = vld [vmem:[#allocation5 + $0xc0] sm:$0xf]  ;;  %v3679_v33 = vld [vmem:[#allocation5 + $0x2c] sm:$0xf0] }
  0xd5   :  { %v3873_v58 = vpop.eup %3872  ;;  %1056 = vmatpush.bf16.msrb.mxu3 %v2960_v54  ;;  %v2932_v46 = vor.u32 %v3699_v44, %v2931_v41  ;;  %v2909_v54 = vld [vmem:[#allocation5 + $0x98] sm:$0xf0]  ;;  %v2883_v44 = vld [vmem:[#allocation5 + $0x60] sm:$0xf]  ;;  %v2852_v37 = vor.u32 %v3679_v33, %v2851_v31  ;;  %v2853_v38 = vld [vmem:[#allocation5 + $0x30] sm:$0xf0] }
  0xd6   :  { %v3875_v1 = vpop.eup %3874  ;;  %v523_v6 = vmul.f32 0.5, %v3873_v58  ;;  %3878 = vtanh.f32 %v530_v0  ;;  %v2939_v58 = vld [vmem:[#allocation5 + $0xc8] sm:$0xf]  ;;  %v3700_v0 = vld [vmem:[#allocation5 + $0xd4] sm:$0xf0]  ;;  %v2912_v41 = vor.u32 %v3690_v50, %v2909_v54 }
  0xd7   :  { %v527_v12 = vmul.f32 0.5, %v3875_v1  ;;  %v2936_v1 = vor.u32 %v3697_v45, %v2933_v51  ;;  %1018 = vmatpush.bf16.msrb.mxu0 %v2932_v46  ;;  %v3687_v45 = vld [vmem:[#allocation5 + $0x6c] sm:$0xf0]  ;;  %v3685_v46 = vld [vmem:[#allocation5 + $0x64] sm:$0xf] }
  0xd8   :  { %v524_v14 = vadd.f32 0.5, %v523_v6  ;;  %v2940_v6 = vor.u32 %v3700_v0, %v2939_v58  ;;  %v2884_v51 = vor.u32 %v3687_v45, %v2883_v44  ;;  %v2885_v58 = vld [vmem:[#allocation5 + $0x70] sm:$0xf0]  ;;  %v2891_v0 = vld [vmem:[#allocation5 + $0x68] sm:$0xf] }
  0xd9   :  { %v528_v15 = vadd.f32 0.5, %v527_v12  ;;  %v495_v53 = vpop.f32.mrf.mxu2  ;;  %v508_v16 = vpop.f32.mrf.mxu3  ;;  %v3698_v12 = vld [vmem:[#allocation5 + $0xcc] sm:$0xf]  ;;  %1031 = vmatpush.bf16.msrb.mxu1 %v2936_v1  ;;  %v3688_v1 = vld [vmem:[#allocation5 + $0x74] sm:$0xf0] }
  0xda   :  { %v3877_v60 = vpop.eup %3876  ;;  %1044 = vmatpush.bf16.msrb.mxu2 %v2940_v6  ;;  %v2915_v53 = vld [vmem:[#allocation5 + $0xa0] sm:$0xf]  ;;  %v3693_v16 = vld [vmem:[#allocation5 + $0xa4] sm:$0xf]  ;;  %v2888_v6 = vor.u32 %v3685_v46, %v2885_v58  ;;  %v2859_v39 = vld [vmem:[#allocation5 + $0x28] sm:$0xf] }
  0xdb   :  { %v535_v17 = vmul.f32 0.0, %v528_v15  ;;  %v536_v55 = vmul.f32 %v3877_v60, %v524_v14  ;;  %v2941_v14 = vld [vmem:[#allocation5 + $0xd8] sm:$0xf0]  ;;  %v3695_v60 = vld [vmem:[#allocation5 + $0xac] sm:$0xf0] }
  0xdc   :  { %v3879_v61 = vpop.eup %3878  ;;  %v2944_v15 = vor.u32 %v3698_v12, %v2941_v14  ;;  %v2892_v12 = vor.u32 %v3688_v1, %v2891_v0  ;;  %v3686_v14 = vld [vmem:[#allocation5 + $0x6c] sm:$0xf]  ;;  %v2835_v45 = vld [vmem:[#allocation5] sm:$0xf]  ;;  %v3675_v46 = vld [vmem:[#allocation5 + $0xc] sm:$0xf0] }
  0xdd   :  { %v4202_v20 = vadd.f32 %v536_v55, %v535_v17  ;;  %v532_v21 = vmul.f32 0.5, %v3879_v61  ;;  %v2916_v17 = vor.u32 %v3695_v60, %v2915_v53  ;;  %v2917_v55 = vld [vmem:[#allocation5 + $0xb0] sm:$0xf0]  ;;  %v2923_v61 = vld [vmem:[#allocation5 + $0xa8] sm:$0xf]  ;;  %v2836_v58 = vor.u32 %v3675_v46, %v2835_v45 }
  0xde   :  { %1057 = vmatpush.bf16.msrb.mxu3 %v2944_v15  ;;  %v2893_v15 = vld [vmem:[#allocation5 + $0x78] sm:$0xf0]  ;;  %v2867_v60 = vld [vmem:[#allocation5 + $0x40] sm:$0xf]  ;;  %v3678_v54 = vld [vmem:[#allocation5 + $0x2c] sm:$0xf] }
  0xdf   :  { %3880 = vtanh.f32 %v4202_v20  ;;  %v533_v22 = vadd.f32 0.5, %v532_v21  ;;  %v3696_v21 = vld [vmem:[#allocation5 + $0xb4] sm:$0xf0]  ;;  %1019 = vmatpush.bf16.msrb.mxu0 %v2916_v17  ;;  %v2896_v53 = vor.u32 %v3686_v14, %v2893_v15  ;;  %v3681_v17 = vld [vmem:[#allocation5 + $0x44] sm:$0xf] }
  0xe0   :  { %v2837_v0 = vld [vmem:[#allocation5 + $0x10] sm:$0xf0]  ;;  %v2843_v1 = vld [vmem:[#allocation5 + $0x8] sm:$0xf]  ;;  %v3674_v15 = vld [vmem:[#allocation5 + $0xc] sm:$0xf] }
  0xe3   :  { %1020 = vmatpush.bf16.msrb.mxu0 %v2900_v36  ;;  %v3677_v36 = vld [vmem:[#allocation5 + $0x24] sm:$0xf] }
  0xe5   :  { %v3881_v23 = vpop.eup %3880 }
  0xe6   :  { %v539_v24 = vmul.f32 %v3881_v23, %v533_v22  ;;  %v2920_v22 = vor.u32 %v3693_v16, %v2917_v55  ;;  %v2924_v23 = vor.u32 %v3696_v21, %v2923_v61  ;;  %v3683_v16 = vld [vmem:[#allocation5 + $0x4c] sm:$0xf0]  ;;  %v2869_v61 = vld [vmem:[#allocation5 + $0x50] sm:$0xf0]  ;;  %v2875_v21 = vld [vmem:[#allocation5 + $0x48] sm:$0xf] }
  0xe7   :  { %1021 = vmatpush.bf16.msrb.mxu0 %v2884_v51  ;;  %v2868_v55 = vor.u32 %v3683_v16, %v2867_v60  ;;  %v3673_v51 = vld [vmem:[#allocation5 + $0x4] sm:$0xf] }
  0xe8   :  { %542 = vst [vmem:[#allocation8] sm:$0xff] %v539_v24  ;;  %v544_v27 = vpack.c.bf16 %v539_v24, %v539_v24  ;;  %v3694_v24 = vld [vmem:[#allocation5 + $0xac] sm:$0xf]  ;;  %1032 = vmatpush.bf16.msrb.mxu1 %v2920_v22  ;;  %1045 = vmatpush.bf16.msrb.mxu2 %v2924_v23  ;;  %v3684_v22 = vld [vmem:[#allocation5 + $0x54] sm:$0xf0]  ;;  %v2872_v23 = vor.u32 %v3681_v17, %v2869_v61 }
  0xea   :  { %745 = vmatmul.bf16.vlgmr.msra.gmra.mxu0 %v544_v27  ;;  %758 = vmatmul.bf16.vlgmr.msra.gmra.mxu1 %v544_v27 }
  0xeb   :  { %771 = vmatmul.bf16.vlgmr.msra.gmra.mxu2 %v544_v27  ;;  %784 = vmatmul.bf16.vlgmr.msra.gmra.mxu3 %v544_v27  ;;  %v2925_v27 = vld [vmem:[#allocation5 + $0xb8] sm:$0xf0] }
  0xec   :  { %v2928_v28 = vor.u32 %v3694_v24, %v2925_v27  ;;  %1033 = vmatpush.bf16.msrb.mxu1 %v2904_v49  ;;  %1046 = vmatpush.bf16.msrb.mxu2 %v2908_v52  ;;  %v2876_v24 = vor.u32 %v3684_v22, %v2875_v21  ;;  %v3682_v27 = vld [vmem:[#allocation5 + $0x4c] sm:$0xf]  ;;  %v3680_v49 = vld [vmem:[#allocation5 + $0x34] sm:$0xf0]  ;;  %v2856_v52 = vor.u32 %v3677_v36, %v2853_v38 }
  0xed   :  { %1022 = vmatpush.bf16.msrb.mxu0 %v2868_v55  ;;  %v2860_v50 = vor.u32 %v3680_v49, %v2859_v39 }
  0xee   :  { %1058 = vmatpush.bf16.msrb.mxu3 %v2928_v28  ;;  %v2877_v28 = vld [vmem:[#allocation5 + $0x58] sm:$0xf0] }
  0xef   :  { %v2880_v29 = vor.u32 %v3682_v27, %v2877_v28 }
  0xf0   :  { %1034 = vmatpush.bf16.msrb.mxu1 %v2888_v6  ;;  %1047 = vmatpush.bf16.msrb.mxu2 %v2892_v12  ;;  %v3676_v6 = vld [vmem:[#allocation5 + $0x14] sm:$0xf0]  ;;  %v2840_v12 = vor.u32 %v3673_v51, %v2837_v0  ;;  %v3075_v0 = vld [vmem:[#allocation5 + $0xe0] sm:$0xf] }
  0xf1   :  { %1023 = vmatpush.bf16.msrb.mxu0 %v2852_v37  ;;  %v2844_v14 = vor.u32 %v3676_v6, %v2843_v1  ;;  %v3735_v1 = vld [vmem:[#allocation5 + $0xec] sm:$0xf0]  ;;  %v3733_v6 = vld [vmem:[#allocation5 + $0xe4] sm:$0xf] }
  0xf2   :  { %1059 = vmatpush.bf16.msrb.mxu3 %v2912_v41  ;;  %v2861_v41 = vld [vmem:[#allocation5 + $0x38] sm:$0xf0] }
  0xf3   :  { %v2864_v44 = vor.u32 %v3678_v54, %v2861_v41 }
  0xf4   :  { %1035 = vmatpush.bf16.msrb.mxu1 %v2872_v23  ;;  %1048 = vmatpush.bf16.msrb.mxu2 %v2876_v24 }
  0xf5   :  { %1024 = vmatpush.bf16.msrb.mxu0 %v2836_v58 }
  0xf6   :  { %1060 = vmatpush.bf16.msrb.mxu3 %v2896_v53  ;;  %v2845_v53 = vld [vmem:[#allocation5 + $0x18] sm:$0xf0] }
  0xf7   :  { %v2848_v60 = vor.u32 %v3674_v15, %v2845_v53  ;;  %v3736_v15 = vld [vmem:[#allocation5 + $0xf4] sm:$0xf0] }
  0xf8   :  { %1036 = vmatpush.bf16.msrb.mxu1 %v2856_v52  ;;  %1049 = vmatpush.bf16.msrb.mxu2 %v2860_v50 }
  0xfa   :  { %1061 = vmatpush.bf16.msrb.mxu3 %v2880_v29 }
  0xfc   :  { %1037 = vmatpush.bf16.msrb.mxu1 %v2840_v12  ;;  %1050 = vmatpush.bf16.msrb.mxu2 %v2844_v14  ;;  %v3077_v12 = vld [vmem:[#allocation5 + $0xf0] sm:$0xf0]  ;;  %v3083_v14 = vld [vmem:[#allocation5 + $0xe8] sm:$0xf] }
  0xfd   :  { %v3080_v53 = vor.u32 %v3733_v6, %v3077_v12  ;;  %v3035_v6 = vld [vmem:[#allocation5 + $0x88] sm:$0xf] }
  0xfe   :  { %1062 = vmatpush.bf16.msrb.mxu3 %v2864_v44 }
 0x100   :  { %1310 = vmatpush.bf16.msra.mxu1 %v3080_v53  ;;  %v3037_v53 = vld [vmem:[#allocation5 + $0x98] sm:$0xf0] }
 0x102   :  { %1063 = vmatpush.bf16.msrb.mxu3 %v2848_v60  ;;  %v3084_v60 = vor.u32 %v3736_v15, %v3083_v14  ;;  %v3722_v15 = vld [vmem:[#allocation5 + $0x8c] sm:$0xf] }
 0x104   :  { %1323 = vmatpush.bf16.msra.mxu2 %v3084_v60  ;;  %v3040_v60 = vor.u32 %v3722_v15, %v3037_v53  ;;  %v2963_v15 = vld [vmem:[#allocation5] sm:$0xf]  ;;  %v3707_v53 = vld [vmem:[#allocation5 + $0xc] sm:$0xf0] }
 0x167   :  { %v746_v16 = vpop.f32.mrf.mxu0  ;;  %v759_v17 = vpop.f32.mrf.mxu1 }
 0x168   :  { %v796_v55 = vadd.f32 %v746_v16, %v4107_v57  ;;  %v797_v61 = vadd.f32 %v759_v17, %v4110_v59  ;;  %v3734_v16 = vld [vmem:[#allocation5 + $0xec] sm:$0xf]  ;;  %v3085_v17 = vld [vmem:[#allocation5 + $0xf8] sm:$0xf0] }
 0x16a   :  { %v800_v21 = vmul.f32 0.5, %v796_v55  ;;  %v804_v22 = vmul.f32 0.5, %v797_v61  ;;  %v3088_v55 = vor.u32 %v3734_v16, %v3085_v17  ;;  %v3059_v61 = vld [vmem:[#allocation5 + $0xc0] sm:$0xf]  ;;  %v3719_v17 = vld [vmem:[#allocation5 + $0x6c] sm:$0xf0] }
 0x16b   :  { %v3011_v16 = vld [vmem:[#allocation5 + $0x60] sm:$0xf] }
 0x16c   :  { %3882 = vtanh.f32 %v800_v21  ;;  %v3731_v21 = vld [vmem:[#allocation5 + $0xcc] sm:$0xf0]  ;;  %1336 = vmatpush.bf16.msra.mxu3 %v3088_v55  ;;  %v3717_v55 = vld [vmem:[#allocation5 + $0x64] sm:$0xf] }
 0x16d   :  { %3884 = vtanh.f32 %v804_v22  ;;  %v3729_v22 = vld [vmem:[#allocation5 + $0xc4] sm:$0xf] }
 0x16e   :  { %v772_v23 = vpop.f32.mrf.mxu2  ;;  %v785_v24 = vpop.f32.mrf.mxu3 }
 0x16f   :  { %v798_v27 = vadd.f32 %v772_v23, %v4117_v63  ;;  %v799_v28 = vadd.f32 %v785_v24, %v4120_v2  ;;  %v748_v29 = vpop.f32.mrf.mxu0  ;;  %v761_v31 = vpop.f32.mrf.mxu1  ;;  %v3060_v23 = vor.u32 %v3731_v21, %v3059_v61  ;;  %v3061_v24 = vld [vmem:[#allocation5 + $0xd0] sm:$0xf0]  ;;  %v3012_v61 = vor.u32 %v3719_v17, %v3011_v16 }
 0x170   :  { %v3064_v29 = vor.u32 %v3729_v22, %v3061_v24  ;;  %v3013_v21 = vld [vmem:[#allocation5 + $0x70] sm:$0xf0]  ;;  %v3019_v22 = vld [vmem:[#allocation5 + $0x68] sm:$0xf]  ;;  %v2964_v16 = vor.u32 %v3707_v53, %v2963_v15  ;;  %v3203_v15 = vld [vmem:[#allocation5 + $0xe0] sm:$0xf] }
 0x171   :  { %3886 = vtanh.f32 %v798_v27  ;;  %v809_v33 = vmul.f32 0.5, %v799_v28  ;;  %v3067_v27 = vld [vmem:[#allocation5 + $0xc8] sm:$0xf]  ;;  %v3732_v28 = vld [vmem:[#allocation5 + $0xd4] sm:$0xf0]  ;;  %v3016_v24 = vor.u32 %v3717_v55, %v3013_v21 }
 0x172   :  { %v3883_v36 = vpop.eup %3882  ;;  %v3068_v31 = vor.u32 %v3732_v28, %v3067_v27  ;;  %1311 = vmatpush.bf16.msra.mxu1 %v3064_v29  ;;  %v3718_v28 = vld [vmem:[#allocation5 + $0x6c] sm:$0xf]  ;;  %v3021_v29 = vld [vmem:[#allocation5 + $0x78] sm:$0xf0]  ;;  %v2965_v17 = vld [vmem:[#allocation5 + $0x10] sm:$0xf0] }
 0x173   :  { %v3885_v37 = vpop.eup %3884  ;;  %v802_v38 = vmul.f32 0.5, %v3883_v36  ;;  %3888 = vtanh.f32 %v809_v33  ;;  %v3730_v33 = vld [vmem:[#allocation5 + $0xcc] sm:$0xf]  ;;  %v3069_v36 = vld [vmem:[#allocation5 + $0xd8] sm:$0xf0] }
 0x174   :  { %v806_v57 = vmul.f32 0.5, %v3885_v37  ;;  %v3072_v37 = vor.u32 %v3730_v33, %v3069_v36  ;;  %1324 = vmatpush.bf16.msra.mxu2 %v3068_v31  ;;  %v3024_v31 = vor.u32 %v3718_v28, %v3021_v29  ;;  %v2995_v33 = vld [vmem:[#allocation5 + $0x40] sm:$0xf]  ;;  %v3715_v36 = vld [vmem:[#allocation5 + $0x4c] sm:$0xf0] }
 0x175   :  { %v803_v59 = vadd.f32 0.5, %v802_v38  ;;  %v3043_v38 = vld [vmem:[#allocation5 + $0xa0] sm:$0xf]  ;;  %v2971_v55 = vld [vmem:[#allocation5 + $0x8] sm:$0xf] }
 0x176   :  { %v807_v39 = vadd.f32 0.5, %v806_v57  ;;  %v774_v49 = vpop.f32.mrf.mxu2  ;;  %v787_v52 = vpop.f32.mrf.mxu3  ;;  %v3727_v57 = vld [vmem:[#allocation5 + $0xac] sm:$0xf0]  ;;  %1337 = vmatpush.bf16.msra.mxu3 %v3072_v37  ;;  %v3713_v37 = vld [vmem:[#allocation5 + $0x44] sm:$0xf] }
 0x177   :  { %v3887_v50 = vpop.eup %3886  ;;  %v3045_v49 = vld [vmem:[#allocation5 + $0xb0] sm:$0xf0]  ;;  %v3051_v52 = vld [vmem:[#allocation5 + $0xa8] sm:$0xf]  ;;  %v3767_v53 = vld [vmem:[#allocation5 + $0xec] sm:$0xf0] }
 0x178   :  { %v814_v54 = vmul.f32 %v807_v39, %v4202_v20  ;;  %v815_v41 = vmul.f32 %v3887_v50, %v803_v59  ;;  %v3076_v20 = vor.u32 %v3735_v1, %v3075_v0  ;;  %v3725_v59 = vld [vmem:[#allocation5 + $0xa4] sm:$0xf]  ;;  %v3044_v39 = vor.u32 %v3727_v57, %v3043_v38  ;;  %v3728_v50 = vld [vmem:[#allocation5 + $0xb4] sm:$0xf0]  ;;  %v3029_v1 = vld [vmem:[#allocation5 + $0x90] sm:$0xf0] }
 0x179   :  { %v3889_v63 = vpop.eup %3888  ;;  %v2996_v38 = vor.u32 %v3715_v36, %v2995_v33  ;;  %v2997_v57 = vld [vmem:[#allocation5 + $0x50] sm:$0xf0] }
 0x17a   :  { %v4210_v44 = vadd.f32 %v815_v41, %v814_v54  ;;  %v811_v2 = vmul.f32 0.5, %v3889_v63  ;;  %1297 = vmatpush.bf16.msra.mxu0 %v3076_v20  ;;  %v3048_v54 = vor.u32 %v3725_v59, %v3045_v49  ;;  %v3052_v41 = vor.u32 %v3728_v50, %v3051_v52  ;;  %v3726_v63 = vld [vmem:[#allocation5 + $0xac] sm:$0xf]  ;;  %v3724_v20 = vld [vmem:[#allocation5 + $0x94] sm:$0xf0] }
 0x17b   :  { %v3036_v14 = vor.u32 %v3724_v20, %v3035_v6  ;;  %v3003_v59 = vld [vmem:[#allocation5 + $0x48] sm:$0xf]  ;;  %v3000_v49 = vor.u32 %v3713_v37, %v2997_v57  ;;  %v3714_v50 = vld [vmem:[#allocation5 + $0x4c] sm:$0xf] }
 0x17c   :  { %3890 = vtanh.f32 %v4210_v44  ;;  %v812_v45 = vadd.f32 0.5, %v811_v2  ;;  %v3053_v2 = vld [vmem:[#allocation5 + $0xb8] sm:$0xf0]  ;;  %1312 = vmatpush.bf16.msra.mxu1 %v3048_v54  ;;  %1325 = vmatpush.bf16.msra.mxu2 %v3052_v41  ;;  %v3710_v20 = vld [vmem:[#allocation5 + $0x2c] sm:$0xf] }
 0x17d   :  { %v3005_v54 = vld [vmem:[#allocation5 + $0x58] sm:$0xf0] }
 0x17e   :  { %1298 = vmatpush.bf16.msra.mxu0 %v3060_v23  ;;  %v3720_v23 = vld [vmem:[#allocation5 + $0x74] sm:$0xf0]  ;;  %v3008_v41 = vor.u32 %v3714_v50, %v3005_v54 }
 0x17f   :  { %v3020_v27 = vor.u32 %v3720_v23, %v3019_v22  ;;  %v3706_v23 = vld [vmem:[#allocation5 + $0xc] sm:$0xf] }
 0x180   :  { %1326 = vmatpush.bf16.msra.mxu2 %v3036_v14 }
 0x182   :  { %v3891_v46 = vpop.eup %3890  ;;  %1299 = vmatpush.bf16.msra.mxu0 %v3044_v39  ;;  %v3716_v39 = vld [vmem:[#allocation5 + $0x54] sm:$0xf0] }
 0x183   :  { %v818_v51 = vmul.f32 %v3891_v46, %v812_v45  ;;  %v3056_v45 = vor.u32 %v3726_v63, %v3053_v2  ;;  %v3027_v46 = vld [vmem:[#allocation5 + $0x80] sm:$0xf]  ;;  %v3004_v52 = vor.u32 %v3716_v39, %v3003_v59  ;;  %v3711_v2 = vld [vmem:[#allocation5 + $0x2c] sm:$0xf0] }
 0x184   :  { %1327 = vmatpush.bf16.msra.mxu2 %v3020_v27  ;;  %v2979_v63 = vld [vmem:[#allocation5 + $0x20] sm:$0xf] }
 0x185   :  { %822 = vst [vmem:[#allocation8 + $0x8] sm:$0xff] %v818_v51  ;;  %v824_v58 = vpack.c.bf16 %v818_v51, %v818_v51  ;;  %v3723_v51 = vld [vmem:[#allocation5 + $0x8c] sm:$0xf0]  ;;  %1338 = vmatpush.bf16.msra.mxu3 %v3056_v45  ;;  %v3709_v45 = vld [vmem:[#allocation5 + $0x24] sm:$0xf] }
 0x186   :  { %v3028_v0 = vor.u32 %v3723_v51, %v3027_v46  ;;  %v2980_v46 = vor.u32 %v3711_v2, %v2979_v63  ;;  %v2981_v51 = vld [vmem:[#allocation5 + $0x30] sm:$0xf0] }
 0x187   :  { %1025 = vmatmul.bf16.vlgmr.msrb.gmra.mxu0 %v824_v58  ;;  %1038 = vmatmul.bf16.vlgmr.msrb.gmra.mxu1 %v824_v58 }
 0x188   :  { %1051 = vmatmul.bf16.vlgmr.msrb.gmra.mxu2 %v824_v58  ;;  %1064 = vmatmul.bf16.vlgmr.msrb.gmra.mxu3 %v824_v58  ;;  %v3721_v58 = vld [vmem:[#allocation5 + $0x84] sm:$0xf] }
 0x189   :  { %v3032_v12 = vor.u32 %v3721_v58, %v3029_v1  ;;  %1300 = vmatpush.bf16.msra.mxu0 %v3028_v0  ;;  %1339 = vmatpush.bf16.msra.mxu3 %v3040_v60  ;;  %v2987_v58 = vld [vmem:[#allocation5 + $0x28] sm:$0xf]  ;;  %v3712_v0 = vld [vmem:[#allocation5 + $0x34] sm:$0xf0]  ;;  %v2984_v1 = vor.u32 %v3709_v45, %v2981_v51  ;;  %v3705_v60 = vld [vmem:[#allocation5 + $0x4] sm:$0xf] }
 0x18a   :  { %1328 = vmatpush.bf16.msra.mxu2 %v3004_v52  ;;  %v2988_v6 = vor.u32 %v3712_v0, %v2987_v58  ;;  %v2968_v21 = vor.u32 %v3705_v60, %v2965_v17  ;;  %v3765_v60 = vld [vmem:[#allocation5 + $0xe4] sm:$0xf]  ;;  %v3211_v17 = vld [vmem:[#allocation5 + $0xe8] sm:$0xf] }
 0x18b   :  { %1313 = vmatpush.bf16.msra.mxu1 %v3032_v12  ;;  %v2989_v12 = vld [vmem:[#allocation5 + $0x38] sm:$0xf0] }
 0x18c   :  { %v2992_v14 = vor.u32 %v3710_v20, %v2989_v12 }
 0x18d   :  { %1301 = vmatpush.bf16.msra.mxu0 %v3012_v61  ;;  %1340 = vmatpush.bf16.msra.mxu3 %v3024_v31  ;;  %v3708_v61 = vld [vmem:[#allocation5 + $0x14] sm:$0xf0] }
 0x18e   :  { %1329 = vmatpush.bf16.msra.mxu2 %v2988_v6  ;;  %v2972_v22 = vor.u32 %v3708_v61, %v2971_v55  ;;  %v3768_v55 = vld [vmem:[#allocation5 + $0xf4] sm:$0xf0] }
 0x18f   :  { %1314 = vmatpush.bf16.msra.mxu1 %v3016_v24  ;;  %v2973_v24 = vld [vmem:[#allocation5 + $0x18] sm:$0xf0] }
 0x190   :  { %v2976_v27 = vor.u32 %v3706_v23, %v2973_v24  ;;  %v3213_v23 = vld [vmem:[#allocation5 + $0xf8] sm:$0xf0] }
 0x191   :  { %1302 = vmatpush.bf16.msra.mxu0 %v2996_v38  ;;  %1341 = vmatpush.bf16.msra.mxu3 %v3008_v41 }
 0x192   :  { %1330 = vmatpush.bf16.msra.mxu2 %v2972_v22  ;;  %v3766_v22 = vld [vmem:[#allocation5 + $0xec] sm:$0xf] }
 0x193   :  { %1315 = vmatpush.bf16.msra.mxu1 %v3000_v49  ;;  %v3216_v24 = vor.u32 %v3766_v22, %v3213_v23  ;;  %v3141_v22 = vld [vmem:[#allocation5 + $0x70] sm:$0xf0]  ;;  %v3147_v23 = vld [vmem:[#allocation5 + $0x68] sm:$0xf] }
 0x195   :  { %1303 = vmatpush.bf16.msra.mxu0 %v2980_v46  ;;  %1342 = vmatpush.bf16.msra.mxu3 %v2992_v14 }
 0x197   :  { %1316 = vmatpush.bf16.msra.mxu1 %v2984_v1 }
 0x199   :  { %1304 = vmatpush.bf16.msra.mxu0 %v2964_v16  ;;  %1343 = vmatpush.bf16.msra.mxu3 %v2976_v27  ;;  %v3205_v16 = vld [vmem:[#allocation5 + $0xf0] sm:$0xf0]  ;;  %v3187_v27 = vld [vmem:[#allocation5 + $0xc0] sm:$0xf] }
 0x19a   :  { %v3208_v61 = vor.u32 %v3765_v60, %v3205_v16  ;;  %v3754_v60 = vld [vmem:[#allocation5 + $0x8c] sm:$0xf] }
 0x19b   :  { %1317 = vmatpush.bf16.msra.mxu1 %v2968_v21  ;;  %v3212_v21 = vor.u32 %v3768_v55, %v3211_v17  ;;  %v3139_v17 = vld [vmem:[#allocation5 + $0x60] sm:$0xf]  ;;  %v3751_v55 = vld [vmem:[#allocation5 + $0x6c] sm:$0xf0] }
 0x19d   :  { %1603 = vmatpush.bf16.msrb.mxu2 %v3212_v21  ;;  %1616 = vmatpush.bf16.msrb.mxu3 %v3216_v24  ;;  %v3140_v21 = vor.u32 %v3751_v55, %v3139_v17  ;;  %v3752_v24 = vld [vmem:[#allocation5 + $0x74] sm:$0xf0] }
 0x19f   :  { %1590 = vmatpush.bf16.msrb.mxu1 %v3208_v61  ;;  %v3749_v61 = vld [vmem:[#allocation5 + $0x64] sm:$0xf] }
 0x204   :  { %v1026_v28 = vpop.f32.mrf.mxu0  ;;  %v1039_v29 = vpop.f32.mrf.mxu1 }
 0x205   :  { %v1076_v31 = vadd.f32 %v1026_v28, %v4123_v3  ;;  %v1077_v33 = vadd.f32 %v1039_v29, %v4126_v5  ;;  %v3763_v28 = vld [vmem:[#allocation5 + $0xcc] sm:$0xf0]  ;;  %v3761_v29 = vld [vmem:[#allocation5 + $0xc4] sm:$0xf] }
 0x207   :  { %v1080_v36 = vmul.f32 0.5, %v1076_v31  ;;  %v1084_v37 = vmul.f32 0.5, %v1077_v33  ;;  %v3188_v31 = vor.u32 %v3763_v28, %v3187_v27  ;;  %v3189_v33 = vld [vmem:[#allocation5 + $0xd0] sm:$0xf0]  ;;  %v3144_v27 = vor.u32 %v3749_v61, %v3141_v22  ;;  %v3738_v61 = vld [vmem:[#allocation5 + $0xc] sm:$0xf] }
 0x208   :  { %v3148_v28 = vor.u32 %v3752_v24, %v3147_v23 }
 0x209   :  { %3892 = vtanh.f32 %v1080_v36  ;;  %v3195_v36 = vld [vmem:[#allocation5 + $0xc8] sm:$0xf] }
 0x20a   :  { %3894 = vtanh.f32 %v1084_v37  ;;  %v3764_v37 = vld [vmem:[#allocation5 + $0xd4] sm:$0xf0] }
 0x20b   :  { %v1052_v38 = vpop.f32.mrf.mxu2  ;;  %v1065_v57 = vpop.f32.mrf.mxu3 }
 0x20c   :  { %v1078_v59 = vadd.f32 %v1052_v38, %v4129_v7  ;;  %v1079_v39 = vadd.f32 %v1065_v57, %v4132_v10  ;;  %v1028_v49 = vpop.f32.mrf.mxu0  ;;  %v1041_v52 = vpop.f32.mrf.mxu1  ;;  %v3192_v38 = vor.u32 %v3761_v29, %v3189_v33  ;;  %v3196_v57 = vor.u32 %v3764_v37, %v3195_v36  ;;  %v3750_v29 = vld [vmem:[#allocation5 + $0x6c] sm:$0xf]  ;;  %v3123_v36 = vld [vmem:[#allocation5 + $0x40] sm:$0xf]  ;;  %v3747_v37 = vld [vmem:[#allocation5 + $0x4c] sm:$0xf0] }
 0x20d   :  { %v3171_v52 = vld [vmem:[#allocation5 + $0xa0] sm:$0xf] }
 0x20e   :  { %3896 = vtanh.f32 %v1078_v59  ;;  %v1089_v50 = vmul.f32 0.5, %v1079_v39  ;;  %v3762_v59 = vld [vmem:[#allocation5 + $0xcc] sm:$0xf]  ;;  %v3197_v39 = vld [vmem:[#allocation5 + $0xd8] sm:$0xf0]  ;;  %1591 = vmatpush.bf16.msrb.mxu1 %v3192_v38  ;;  %1604 = vmatpush.bf16.msrb.mxu2 %v3196_v57  ;;  %v3124_v57 = vor.u32 %v3747_v37, %v3123_v36 }
 0x20f   :  { %v3893_v54 = vpop.eup %3892  ;;  %v3200_v49 = vor.u32 %v3762_v59, %v3197_v39  ;;  %v3745_v38 = vld [vmem:[#allocation5 + $0x44] sm:$0xf]  ;;  %v3125_v59 = vld [vmem:[#allocation5 + $0x50] sm:$0xf0]  ;;  %v3131_v39 = vld [vmem:[#allocation5 + $0x48] sm:$0xf] }
 0x210   :  { %v3895_v41 = vpop.eup %3894  ;;  %v1082_v63 = vmul.f32 0.5, %v3893_v54  ;;  %3898 = vtanh.f32 %v1089_v50  ;;  %v3759_v50 = vld [vmem:[#allocation5 + $0xac] sm:$0xf0]  ;;  %v3757_v54 = vld [vmem:[#allocation5 + $0xa4] sm:$0xf] }
 0x211   :  { %v1086_v3 = vmul.f32 0.5, %v3895_v41  ;;  %1617 = vmatpush.bf16.msrb.mxu3 %v3200_v49  ;;  %v3172_v41 = vor.u32 %v3759_v50, %v3171_v52  ;;  %v3748_v49 = vld [vmem:[#allocation5 + $0x54] sm:$0xf0]  ;;  %v3128_v52 = vor.u32 %v3745_v38, %v3125_v59 }
 0x212   :  { %v1083_v5 = vadd.f32 0.5, %v1082_v63  ;;  %v3173_v63 = vld [vmem:[#allocation5 + $0xb0] sm:$0xf0]  ;;  %v3132_v50 = vor.u32 %v3748_v49, %v3131_v39 }
 0x213   :  { %v1087_v2 = vadd.f32 0.5, %v1086_v3  ;;  %v1054_v45 = vpop.f32.mrf.mxu2  ;;  %v1067_v46 = vpop.f32.mrf.mxu3  ;;  %v3179_v3 = vld [vmem:[#allocation5 + $0xa8] sm:$0xf] }
 0x214   :  { %v3897_v51 = vpop.eup %3896  ;;  %v3758_v46 = vld [vmem:[#allocation5 + $0xac] sm:$0xf] }
 0x215   :  { %v1094_v58 = vmul.f32 %v1087_v2, %v4210_v44  ;;  %v1095_v0 = vmul.f32 %v3897_v51, %v1083_v5  ;;  %v3204_v44 = vor.u32 %v3767_v53, %v3203_v15  ;;  %v3760_v5 = vld [vmem:[#allocation5 + $0xb4] sm:$0xf0]  ;;  %v3176_v2 = vor.u32 %v3757_v54, %v3173_v63  ;;  %v3181_v51 = vld [vmem:[#allocation5 + $0xb8] sm:$0xf0]  ;;  %v3746_v54 = vld [vmem:[#allocation5 + $0x4c] sm:$0xf] }
 0x216   :  { %v3899_v7 = vpop.eup %3898  ;;  %v3180_v45 = vor.u32 %v3760_v5, %v3179_v3  ;;  %v3107_v3 = vld [vmem:[#allocation5 + $0x20] sm:$0xf]  ;;  %v3743_v5 = vld [vmem:[#allocation5 + $0x2c] sm:$0xf0] }
 0x217   :  { %v4218_v1 = vadd.f32 %v1095_v0, %v1094_v58  ;;  %v1091_v10 = vmul.f32 0.5, %v3899_v7  ;;  %1577 = vmatpush.bf16.msrb.mxu0 %v3204_v44  ;;  %v3184_v58 = vor.u32 %v3758_v46, %v3181_v51  ;;  %1592 = vmatpush.bf16.msrb.mxu1 %v3176_v2  ;;  %v3155_v0 = vld [vmem:[#allocation5 + $0x80] sm:$0xf]  ;;  %v3755_v7 = vld [vmem:[#allocation5 + $0x8c] sm:$0xf0] }
 0x218   :  { %1605 = vmatpush.bf16.msrb.mxu2 %v3180_v45  ;;  %v3165_v44 = vld [vmem:[#allocation5 + $0x98] sm:$0xf0]  ;;  %v3741_v2 = vld [vmem:[#allocation5 + $0x24] sm:$0xf]  ;;  %v3108_v45 = vor.u32 %v3743_v5, %v3107_v3  ;;  %v3109_v46 = vld [vmem:[#allocation5 + $0x30] sm:$0xf0] }
 0x219   :  { %3900 = vtanh.f32 %v4218_v1  ;;  %v1092_v6 = vadd.f32 0.5, %v1091_v10  ;;  %v3753_v10 = vld [vmem:[#allocation5 + $0x84] sm:$0xf]  ;;  %1618 = vmatpush.bf16.msrb.mxu3 %v3184_v58  ;;  %v3168_v16 = vor.u32 %v3754_v60, %v3165_v44  ;;  %v3115_v51 = vld [vmem:[#allocation5 + $0x28] sm:$0xf] }
 0x21a   :  { %v3744_v58 = vld [vmem:[#allocation5 + $0x34] sm:$0xf0]  ;;  %v3093_v60 = vld [vmem:[#allocation5 + $0x10] sm:$0xf0]  ;;  %v3099_v44 = vld [vmem:[#allocation5 + $0x8] sm:$0xf] }
 0x21b   :  { %1578 = vmatpush.bf16.msrb.mxu0 %v3188_v31  ;;  %v3149_v31 = vld [vmem:[#allocation5 + $0x78] sm:$0xf0] }
 0x21c   :  { %v3152_v33 = vor.u32 %v3750_v29, %v3149_v31 }
 0x21d   :  { %1619 = vmatpush.bf16.msrb.mxu3 %v3168_v16  ;;  %v3740_v16 = vld [vmem:[#allocation5 + $0x14] sm:$0xf0] }
 0x21e   :  { %v3100_v55 = vor.u32 %v3740_v16, %v3099_v44  ;;  %v3341_v44 = vld [vmem:[#allocation5 + $0xf8] sm:$0xf0] }
 0x21f   :  { %v3901_v20 = vpop.eup %3900  ;;  %1579 = vmatpush.bf16.msrb.mxu0 %v3172_v41  ;;  %v3133_v41 = vld [vmem:[#allocation5 + $0x58] sm:$0xf0] }
 0x220   :  { %v1098_v12 = vmul.f32 %v3901_v20, %v1092_v6  ;;  %v3156_v6 = vor.u32 %v3755_v7, %v3155_v0  ;;  %v3157_v20 = vld [vmem:[#allocation5 + $0x90] sm:$0xf0]  ;;  %v3136_v63 = vor.u32 %v3746_v54, %v3133_v41  ;;  %v3112_v0 = vor.u32 %v3741_v2, %v3109_v46 }
 0x221   :  { %v3160_v15 = vor.u32 %v3753_v10, %v3157_v20  ;;  %1620 = vmatpush.bf16.msrb.mxu3 %v3152_v33  ;;  %v3116_v7 = vor.u32 %v3744_v58, %v3115_v51  ;;  %v3742_v10 = vld [vmem:[#allocation5 + $0x2c] sm:$0xf] }
 0x222   :  { %1102 = vst [vmem:[#allocation8 + $0x10] sm:$0xff] %v1098_v12  ;;  %v1104_v14 = vpack.c.bf16 %v1098_v12, %v1098_v12  ;;  %v3163_v12 = vld [vmem:[#allocation5 + $0x88] sm:$0xf] }
 0x223   :  { %1580 = vmatpush.bf16.msrb.mxu0 %v3156_v6  ;;  %1593 = vmatpush.bf16.msrb.mxu1 %v3160_v15  ;;  %v3117_v6 = vld [vmem:[#allocation5 + $0x38] sm:$0xf0]  ;;  %v3737_v15 = vld [vmem:[#allocation5 + $0x4] sm:$0xf] }
 0x224   :  { %1305 = vmatmul.bf16.vlgmr.msra.gmra.mxu0 %v1104_v14  ;;  %1318 = vmatmul.bf16.vlgmr.msra.gmra.mxu1 %v1104_v14  ;;  %v3120_v20 = vor.u32 %v3742_v10, %v3117_v6  ;;  %v3096_v17 = vor.u32 %v3737_v15, %v3093_v60  ;;  %v3799_v10 = vld [vmem:[#allocation5 + $0xec] sm:$0xf0]  ;;  %v3797_v6 = vld [vmem:[#allocation5 + $0xe4] sm:$0xf]  ;;  %v3798_v60 = vld [vmem:[#allocation5 + $0xec] sm:$0xf] }
 0x225   :  { %1331 = vmatmul.bf16.vlgmr.msra.gmra.mxu2 %v1104_v14  ;;  %1344 = vmatmul.bf16.vlgmr.msra.gmra.mxu3 %v1104_v14  ;;  %v3756_v14 = vld [vmem:[#allocation5 + $0x94] sm:$0xf0]  ;;  %v3344_v16 = vor.u32 %v3798_v60, %v3341_v44  ;;  %v3782_v44 = vld [vmem:[#allocation5 + $0x6c] sm:$0xf] }
 0x226   :  { %v3164_v53 = vor.u32 %v3756_v14, %v3163_v12  ;;  %1621 = vmatpush.bf16.msrb.mxu3 %v3136_v63  ;;  %v3091_v12 = vld [vmem:[#allocation5] sm:$0xf]  ;;  %v3739_v14 = vld [vmem:[#allocation5 + $0xc] sm:$0xf0] }
 0x227   :  { %1581 = vmatpush.bf16.msrb.mxu0 %v3140_v21  ;;  %1594 = vmatpush.bf16.msrb.mxu1 %v3144_v27  ;;  %v3101_v21 = vld [vmem:[#allocation5 + $0x18] sm:$0xf0] }
 0x228   :  { %1606 = vmatpush.bf16.msrb.mxu2 %v3164_v53  ;;  %v3092_v53 = vor.u32 %v3739_v14, %v3091_v12  ;;  %v3104_v22 = vor.u32 %v3738_v61, %v3101_v21  ;;  %v3339_v12 = vld [vmem:[#allocation5 + $0xe8] sm:$0xf]  ;;  %v3800_v14 = vld [vmem:[#allocation5 + $0xf4] sm:$0xf0]  ;;  %v3793_v61 = vld [vmem:[#allocation5 + $0xc4] sm:$0xf] }
 0x22a   :  { %1622 = vmatpush.bf16.msrb.mxu3 %v3120_v20  ;;  %v3333_v20 = vld [vmem:[#allocation5 + $0xf0] sm:$0xf0] }
 0x22b   :  { %1582 = vmatpush.bf16.msrb.mxu0 %v3124_v57  ;;  %1595 = vmatpush.bf16.msrb.mxu1 %v3128_v52  ;;  %v3336_v15 = vor.u32 %v3797_v6, %v3333_v20  ;;  %v3783_v6 = vld [vmem:[#allocation5 + $0x6c] sm:$0xf0] }
 0x22c   :  { %1607 = vmatpush.bf16.msrb.mxu2 %v3148_v28 }
 0x22e   :  { %1623 = vmatpush.bf16.msrb.mxu3 %v3104_v22  ;;  %v3317_v22 = vld [vmem:[#allocation5 + $0xd0] sm:$0xf0] }
 0x22f   :  { %1583 = vmatpush.bf16.msrb.mxu0 %v3108_v45  ;;  %1596 = vmatpush.bf16.msrb.mxu1 %v3112_v0 }
 0x230   :  { %1608 = vmatpush.bf16.msrb.mxu2 %v3132_v50 }
 0x232   :  { %1896 = vmatpush.bf16.msra.mxu3 %v3344_v16  ;;  %v3277_v16 = vld [vmem:[#allocation5 + $0x78] sm:$0xf0] }
 0x233   :  { %1584 = vmatpush.bf16.msrb.mxu0 %v3092_v53  ;;  %1597 = vmatpush.bf16.msrb.mxu1 %v3096_v17  ;;  %v3340_v53 = vor.u32 %v3800_v14, %v3339_v12  ;;  %v3315_v17 = vld [vmem:[#allocation5 + $0xc0] sm:$0xf]  ;;  %v3269_v12 = vld [vmem:[#allocation5 + $0x70] sm:$0xf0]  ;;  %v3275_v14 = vld [vmem:[#allocation5 + $0x68] sm:$0xf] }
 0x234   :  { %1609 = vmatpush.bf16.msrb.mxu2 %v3116_v7  ;;  %v3331_v7 = vld [vmem:[#allocation5 + $0xe0] sm:$0xf] }
 0x237   :  { %1870 = vmatpush.bf16.msra.mxu1 %v3336_v15  ;;  %v3784_v15 = vld [vmem:[#allocation5 + $0x74] sm:$0xf0] }
 0x238   :  { %1610 = vmatpush.bf16.msrb.mxu2 %v3100_v55  ;;  %v3795_v55 = vld [vmem:[#allocation5 + $0xcc] sm:$0xf0]  ;;  %v3276_v60 = vor.u32 %v3784_v15, %v3275_v14 }
 0x239   :  { %v3316_v21 = vor.u32 %v3795_v55, %v3315_v17  ;;  %v3280_v17 = vor.u32 %v3782_v44, %v3277_v16  ;;  %v3251_v55 = vld [vmem:[#allocation5 + $0x40] sm:$0xf] }
 0x23c   :  { %1883 = vmatpush.bf16.msra.mxu2 %v3340_v53 }
 0x2a1   :  { %v1306_v23 = vpop.f32.mrf.mxu0  ;;  %v1319_v24 = vpop.f32.mrf.mxu1 }
 0x2a2   :  { %v1356_v27 = vadd.f32 %v1306_v23, %v4135_v11  ;;  %v1357_v28 = vadd.f32 %v1319_v24, %v4138_v13  ;;  %v3323_v23 = vld [vmem:[#allocation5 + $0xc8] sm:$0xf]  ;;  %v3796_v24 = vld [vmem:[#allocation5 + $0xd4] sm:$0xf0] }
 0x2a4   :  { %v1360_v29 = vmul.f32 0.5, %v1356_v27  ;;  %v1364_v31 = vmul.f32 0.5, %v1357_v28  ;;  %v3320_v27 = vor.u32 %v3793_v61, %v3317_v22  ;;  %v3324_v28 = vor.u32 %v3796_v24, %v3323_v23  ;;  %v3779_v61 = vld [vmem:[#allocation5 + $0x4c] sm:$0xf0]  ;;  %v3253_v23 = vld [vmem:[#allocation5 + $0x50] sm:$0xf0] }
 0x2a5   :  { %v3252_v22 = vor.u32 %v3779_v61, %v3251_v55  ;;  %v3259_v24 = vld [vmem:[#allocation5 + $0x48] sm:$0xf] }
 0x2a6   :  { %3902 = vtanh.f32 %v1360_v29  ;;  %v3794_v29 = vld [vmem:[#allocation5 + $0xcc] sm:$0xf]  ;;  %1871 = vmatpush.bf16.msra.mxu1 %v3320_v27  ;;  %1884 = vmatpush.bf16.msra.mxu2 %v3324_v28  ;;  %v3780_v27 = vld [vmem:[#allocation5 + $0x54] sm:$0xf0] }
 0x2a7   :  { %3904 = vtanh.f32 %v1364_v31  ;;  %v3325_v31 = vld [vmem:[#allocation5 + $0xd8] sm:$0xf0] }
 0x2a8   :  { %v1332_v33 = vpop.f32.mrf.mxu2  ;;  %v1345_v36 = vpop.f32.mrf.mxu3 }
 0x2a9   :  { %v1358_v37 = vadd.f32 %v1332_v33, %v4141_v18  ;;  %v1359_v38 = vadd.f32 %v1345_v36, %v4144_v25  ;;  %v1308_v57 = vpop.f32.mrf.mxu0  ;;  %v1321_v59 = vpop.f32.mrf.mxu1  ;;  %v3328_v33 = vor.u32 %v3794_v29, %v3325_v31  ;;  %v3299_v36 = vld [vmem:[#allocation5 + $0xa0] sm:$0xf]  ;;  %v3260_v29 = vor.u32 %v3780_v27, %v3259_v24  ;;  %v3778_v31 = vld [vmem:[#allocation5 + $0x4c] sm:$0xf] }
 0x2aa   :  { %v3301_v59 = vld [vmem:[#allocation5 + $0xb0] sm:$0xf0] }
 0x2ab   :  { %3906 = vtanh.f32 %v1358_v37  ;;  %v1369_v39 = vmul.f32 0.5, %v1359_v38  ;;  %v3791_v37 = vld [vmem:[#allocation5 + $0xac] sm:$0xf0]  ;;  %v3789_v38 = vld [vmem:[#allocation5 + $0xa4] sm:$0xf]  ;;  %1897 = vmatpush.bf16.msra.mxu3 %v3328_v33 }
 0x2ac   :  { %v3903_v49 = vpop.eup %3902  ;;  %v3300_v57 = vor.u32 %v3791_v37, %v3299_v36  ;;  %v3261_v33 = vld [vmem:[#allocation5 + $0x58] sm:$0xf0]  ;;  %v3235_v37 = vld [vmem:[#allocation5 + $0x20] sm:$0xf] }
 0x2ad   :  { %v3905_v52 = vpop.eup %3904  ;;  %v1362_v50 = vmul.f32 0.5, %v3903_v49  ;;  %3908 = vtanh.f32 %v1369_v39  ;;  %v3307_v39 = vld [vmem:[#allocation5 + $0xa8] sm:$0xf]  ;;  %v3792_v49 = vld [vmem:[#allocation5 + $0xb4] sm:$0xf0]  ;;  %v3264_v36 = vor.u32 %v3778_v31, %v3261_v33 }
 0x2ae   :  { %v1366_v11 = vmul.f32 0.5, %v3905_v52  ;;  %v3304_v52 = vor.u32 %v3789_v38, %v3301_v59  ;;  %v3775_v38 = vld [vmem:[#allocation5 + $0x2c] sm:$0xf0] }
 0x2af   :  { %v1363_v13 = vadd.f32 0.5, %v1362_v50  ;;  %v3308_v50 = vor.u32 %v3792_v49, %v3307_v39  ;;  %v3236_v59 = vor.u32 %v3775_v38, %v3235_v37  ;;  %v3237_v39 = vld [vmem:[#allocation5 + $0x30] sm:$0xf0]  ;;  %v3243_v49 = vld [vmem:[#allocation5 + $0x28] sm:$0xf] }
 0x2b0   :  { %v1367_v54 = vadd.f32 0.5, %v1366_v11  ;;  %v1334_v41 = vpop.f32.mrf.mxu2  ;;  %v1347_v63 = vpop.f32.mrf.mxu3  ;;  %v3790_v11 = vld [vmem:[#allocation5 + $0xac] sm:$0xf]  ;;  %1872 = vmatpush.bf16.msra.mxu1 %v3304_v52  ;;  %v3776_v52 = vld [vmem:[#allocation5 + $0x34] sm:$0xf0] }
 0x2b1   :  { %v3907_v3 = vpop.eup %3906  ;;  %1885 = vmatpush.bf16.msra.mxu2 %v3308_v50  ;;  %v3283_v41 = vld [vmem:[#allocation5 + $0x80] sm:$0xf]  ;;  %v3787_v63 = vld [vmem:[#allocation5 + $0x8c] sm:$0xf0] }
 0x2b2   :  { %v1374_v5 = vmul.f32 %v1367_v54, %v4218_v1  ;;  %v1375_v2 = vmul.f32 %v3907_v3, %v1363_v13  ;;  %v3332_v1 = vor.u32 %v3799_v10, %v3331_v7  ;;  %v3309_v13 = vld [vmem:[#allocation5 + $0xb8] sm:$0xf0]  ;;  %v3785_v3 = vld [vmem:[#allocation5 + $0x84] sm:$0xf]  ;;  %v3267_v10 = vld [vmem:[#allocation5 + $0x60] sm:$0xf] }
 0x2b3   :  { %v3909_v18 = vpop.eup %3908  ;;  %v3312_v54 = vor.u32 %v3790_v11, %v3309_v13  ;;  %v3268_v20 = vor.u32 %v3783_v6, %v3267_v10  ;;  %v3244_v11 = vor.u32 %v3776_v52, %v3243_v49  ;;  %v3774_v13 = vld [vmem:[#allocation5 + $0x2c] sm:$0xf]  ;;  %v3831_v49 = vld [vmem:[#allocation5 + $0xec] sm:$0xf0]  ;;  %v3829_v52 = vld [vmem:[#allocation5 + $0xe4] sm:$0xf] }
 0x2b4   :  { %v4226_v45 = vadd.f32 %v1375_v2, %v1374_v5  ;;  %v1371_v25 = vmul.f32 0.5, %v3909_v18  ;;  %1857 = vmatpush.bf16.msra.mxu0 %v3332_v1  ;;  %v3284_v5 = vor.u32 %v3787_v63, %v3283_v41  ;;  %v3285_v2 = vld [vmem:[#allocation5 + $0x90] sm:$0xf0]  ;;  %v3291_v18 = vld [vmem:[#allocation5 + $0x88] sm:$0xf] }
 0x2b5   :  { %1898 = vmatpush.bf16.msra.mxu3 %v3312_v54  ;;  %v3781_v1 = vld [vmem:[#allocation5 + $0x64] sm:$0xf]  ;;  %v3245_v54 = vld [vmem:[#allocation5 + $0x38] sm:$0xf0]  ;;  %v3219_v63 = vld [vmem:[#allocation5] sm:$0xf] }
 0x2b6   :  { %3910 = vtanh.f32 %v4226_v45  ;;  %v1372_v46 = vadd.f32 0.5, %v1371_v25  ;;  %v3788_v25 = vld [vmem:[#allocation5 + $0x94] sm:$0xf0]  ;;  %v3272_v53 = vor.u32 %v3781_v1, %v3269_v12  ;;  %v3248_v41 = vor.u32 %v3774_v13, %v3245_v54 }
 0x2b7   :  { %v3832_v13 = vld [vmem:[#allocation5 + $0xf4] sm:$0xf0] }
 0x2b8   :  { %1858 = vmatpush.bf16.msra.mxu0 %v3316_v21  ;;  %v3777_v21 = vld [vmem:[#allocation5 + $0x44] sm:$0xf] }
 0x2b9   :  { %v3256_v28 = vor.u32 %v3777_v21, %v3253_v23 }
 0x2bc   :  { %v3911_v51 = vpop.eup %3910  ;;  %1859 = vmatpush.bf16.msra.mxu0 %v3300_v57  ;;  %v3773_v57 = vld [vmem:[#allocation5 + $0x24] sm:$0xf] }
 0x2bd   :  { %v1378_v58 = vmul.f32 %v3911_v51, %v1372_v46  ;;  %v3288_v46 = vor.u32 %v3785_v3, %v3285_v2  ;;  %v3292_v51 = vor.u32 %v3788_v25, %v3291_v18  ;;  %v3240_v50 = vor.u32 %v3773_v57, %v3237_v39  ;;  %v3771_v3 = vld [vmem:[#allocation5 + $0xc] sm:$0xf0]  ;;  %v3221_v18 = vld [vmem:[#allocation5 + $0x10] sm:$0xf0]  ;;  %v3227_v25 = vld [vmem:[#allocation5 + $0x8] sm:$0xf] }
 0x2be   :  { %v3220_v2 = vor.u32 %v3771_v3, %v3219_v63  ;;  %v3459_v39 = vld [vmem:[#allocation5 + $0xe0] sm:$0xf]  ;;  %v3830_v63 = vld [vmem:[#allocation5 + $0xec] sm:$0xf]  ;;  %v3469_v3 = vld [vmem:[#allocation5 + $0xf8] sm:$0xf0] }
 0x2bf   :  { %1382 = vst [vmem:[#allocation8 + $0x18] sm:$0xff] %v1378_v58  ;;  %v1384_v0 = vpack.c.bf16 %v1378_v58, %v1378_v58  ;;  %v3786_v58 = vld [vmem:[#allocation5 + $0x8c] sm:$0xf]  ;;  %1873 = vmatpush.bf16.msra.mxu1 %v3288_v46  ;;  %1886 = vmatpush.bf16.msra.mxu2 %v3292_v51  ;;  %v3772_v46 = vld [vmem:[#allocation5 + $0x14] sm:$0xf0] }
 0x2c0   :  { %1860 = vmatpush.bf16.msra.mxu0 %v3284_v5  ;;  %v3769_v5 = vld [vmem:[#allocation5 + $0x4] sm:$0xf] }
 0x2c1   :  { %1585 = vmatmul.bf16.vlgmr.msrb.gmra.mxu0 %v1384_v0  ;;  %1598 = vmatmul.bf16.vlgmr.msrb.gmra.mxu1 %v1384_v0  ;;  %v3224_v51 = vor.u32 %v3769_v5, %v3221_v18  ;;  %v3472_v5 = vor.u32 %v3830_v63, %v3469_v3  ;;  %v3827_v18 = vld [vmem:[#allocation5 + $0xcc] sm:$0xf0]  ;;  %v3379_v63 = vld [vmem:[#allocation5 + $0x40] sm:$0xf] }
 0x2c2   :  { %1611 = vmatmul.bf16.vlgmr.msrb.gmra.mxu2 %v1384_v0  ;;  %1624 = vmatmul.bf16.vlgmr.msrb.gmra.mxu3 %v1384_v0  ;;  %v3293_v0 = vld [vmem:[#allocation5 + $0x98] sm:$0xf0]  ;;  %v3811_v3 = vld [vmem:[#allocation5 + $0x4c] sm:$0xf0] }
 0x2c3   :  { %v3296_v7 = vor.u32 %v3786_v58, %v3293_v0  ;;  %1874 = vmatpush.bf16.msra.mxu1 %v3272_v53  ;;  %1887 = vmatpush.bf16.msra.mxu2 %v3276_v60  ;;  %v3228_v58 = vor.u32 %v3772_v46, %v3227_v25  ;;  %v3770_v0 = vld [vmem:[#allocation5 + $0xc] sm:$0xf]  ;;  %v3825_v25 = vld [vmem:[#allocation5 + $0xc4] sm:$0xf] }
 0x2c4   :  { %1861 = vmatpush.bf16.msra.mxu0 %v3268_v20 }
 0x2c5   :  { %1899 = vmatpush.bf16.msra.mxu3 %v3296_v7  ;;  %v3229_v7 = vld [vmem:[#allocation5 + $0x18] sm:$0xf0] }
 0x2c6   :  { %v3232_v10 = vor.u32 %v3770_v0, %v3229_v7  ;;  %v3828_v0 = vld [vmem:[#allocation5 + $0xd4] sm:$0xf0] }
 0x2c7   :  { %1875 = vmatpush.bf16.msra.mxu1 %v3256_v28  ;;  %1888 = vmatpush.bf16.msra.mxu2 %v3260_v29 }
 0x2c8   :  { %1862 = vmatpush.bf16.msra.mxu0 %v3252_v22 }
 0x2c9   :  { %1900 = vmatpush.bf16.msra.mxu3 %v3280_v17 }
 0x2cb   :  { %1876 = vmatpush.bf16.msra.mxu1 %v3240_v50  ;;  %1889 = vmatpush.bf16.msra.mxu2 %v3244_v11  ;;  %v3461_v50 = vld [vmem:[#allocation5 + $0xf0] sm:$0xf0]  ;;  %v3467_v11 = vld [vmem:[#allocation5 + $0xe8] sm:$0xf] }
 0x2cc   :  { %1863 = vmatpush.bf16.msra.mxu0 %v3236_v59  ;;  %v3464_v54 = vor.u32 %v3829_v52, %v3461_v50  ;;  %v3403_v52 = vld [vmem:[#allocation5 + $0x68] sm:$0xf] }
 0x2cd   :  { %1901 = vmatpush.bf16.msra.mxu3 %v3264_v36 }
 0x2cf   :  { %1877 = vmatpush.bf16.msra.mxu1 %v3224_v51  ;;  %1890 = vmatpush.bf16.msra.mxu2 %v3228_v58  ;;  %v3445_v51 = vld [vmem:[#allocation5 + $0xd0] sm:$0xf0]  ;;  %v3451_v58 = vld [vmem:[#allocation5 + $0xc8] sm:$0xf] }
 0x2d0   :  { %1864 = vmatpush.bf16.msra.mxu0 %v3220_v2  ;;  %v3443_v2 = vld [vmem:[#allocation5 + $0xc0] sm:$0xf]  ;;  %v3448_v7 = vor.u32 %v3825_v25, %v3445_v51  ;;  %v3387_v25 = vld [vmem:[#allocation5 + $0x48] sm:$0xf] }
 0x2d1   :  { %1902 = vmatpush.bf16.msra.mxu3 %v3248_v41  ;;  %v3468_v41 = vor.u32 %v3832_v13, %v3467_v11  ;;  %v3444_v46 = vor.u32 %v3827_v18, %v3443_v2  ;;  %v3814_v13 = vld [vmem:[#allocation5 + $0x6c] sm:$0xf]  ;;  %v3380_v2 = vor.u32 %v3811_v3, %v3379_v63  ;;  %v3381_v18 = vld [vmem:[#allocation5 + $0x50] sm:$0xf0] }
 0x2d3   :  { %2150 = vmatpush.bf16.msrb.mxu1 %v3464_v54  ;;  %2163 = vmatpush.bf16.msrb.mxu2 %v3468_v41  ;;  %v3405_v54 = vld [vmem:[#allocation5 + $0x78] sm:$0xf0] }
 0x2d4   :  { %v3408_v41 = vor.u32 %v3814_v13, %v3405_v54 }
 0x2d5   :  { %1903 = vmatpush.bf16.msra.mxu3 %v3232_v10  ;;  %v3452_v10 = vor.u32 %v3828_v0, %v3451_v58  ;;  %v3810_v0 = vld [vmem:[#allocation5 + $0x4c] sm:$0xf] }
 0x2d7   :  { %2151 = vmatpush.bf16.msrb.mxu1 %v3448_v7  ;;  %2164 = vmatpush.bf16.msrb.mxu2 %v3452_v10  ;;  %v3389_v7 = vld [vmem:[#allocation5 + $0x58] sm:$0xf0] }
 0x2d8   :  { %v3392_v10 = vor.u32 %v3810_v0, %v3389_v7 }
 0x2d9   :  { %2176 = vmatpush.bf16.msrb.mxu3 %v3472_v5  ;;  %v3809_v5 = vld [vmem:[#allocation5 + $0x44] sm:$0xf] }
 0x2da   :  { %v3384_v51 = vor.u32 %v3809_v5, %v3381_v18 }
 0x33e   :  { %v1586_v6 = vpop.f32.mrf.mxu0  ;;  %v1599_v1 = vpop.f32.mrf.mxu1 }
 0x33f   :  { %v1636_v20 = vadd.f32 %v1586_v6, %v4147_v26  ;;  %v1637_v12 = vadd.f32 %v1599_v1, %v4150_v32  ;;  %v3826_v6 = vld [vmem:[#allocation5 + $0xcc] sm:$0xf]  ;;  %v3453_v1 = vld [vmem:[#allocation5 + $0xd8] sm:$0xf0] }
 0x341   :  { %v1640_v14 = vmul.f32 0.5, %v1636_v20  ;;  %v1644_v15 = vmul.f32 0.5, %v1637_v12  ;;  %v3456_v20 = vor.u32 %v3826_v6, %v3453_v1  ;;  %v3427_v12 = vld [vmem:[#allocation5 + $0xa0] sm:$0xf]  ;;  %v3807_v1 = vld [vmem:[#allocation5 + $0x2c] sm:$0xf0] }
 0x342   :  { %v3363_v6 = vld [vmem:[#allocation5 + $0x20] sm:$0xf] }
 0x343   :  { %3912 = vtanh.f32 %v1640_v14  ;;  %v3823_v14 = vld [vmem:[#allocation5 + $0xac] sm:$0xf0]  ;;  %2177 = vmatpush.bf16.msrb.mxu3 %v3456_v20  ;;  %v3805_v20 = vld [vmem:[#allocation5 + $0x24] sm:$0xf] }
 0x344   :  { %3914 = vtanh.f32 %v1644_v15  ;;  %v3821_v15 = vld [vmem:[#allocation5 + $0xa4] sm:$0xf] }
 0x345   :  { %v1612_v53 = vpop.f32.mrf.mxu2  ;;  %v1625_v60 = vpop.f32.mrf.mxu3 }
 0x346   :  { %v1638_v44 = vadd.f32 %v1612_v53, %v4153_v56  ;;  %v1639_v16 = vadd.f32 %v1625_v60, %v4156_v8  ;;  %v1588_v17 = vpop.f32.mrf.mxu0  ;;  %v1601_v55 = vpop.f32.mrf.mxu1  ;;  %v3428_v53 = vor.u32 %v3823_v14, %v3427_v12  ;;  %v3429_v60 = vld [vmem:[#allocation5 + $0xb0] sm:$0xf0]  ;;  %v3364_v12 = vor.u32 %v3807_v1, %v3363_v6  ;;  %v3587_v6 = vld [vmem:[#allocation5 + $0xe0] sm:$0xf]  ;;  %v3863_v1 = vld [vmem:[#allocation5 + $0xec] sm:$0xf0] }
 0x347   :  { %v3432_v17 = vor.u32 %v3821_v15, %v3429_v60  ;;  %v3365_v14 = vld [vmem:[#allocation5 + $0x30] sm:$0xf0]  ;;  %v3371_v15 = vld [vmem:[#allocation5 + $0x28] sm:$0xf] }
 0x348   :  { %3916 = vtanh.f32 %v1638_v44  ;;  %v1649_v61 = vmul.f32 0.5, %v1639_v16  ;;  %v3435_v44 = vld [vmem:[#allocation5 + $0xa8] sm:$0xf]  ;;  %v3824_v16 = vld [vmem:[#allocation5 + $0xb4] sm:$0xf0]  ;;  %v3368_v60 = vor.u32 %v3805_v20, %v3365_v14 }
 0x349   :  { %v3913_v21 = vpop.eup %3912  ;;  %v3436_v55 = vor.u32 %v3824_v16, %v3435_v44  ;;  %2152 = vmatpush.bf16.msrb.mxu1 %v3432_v17  ;;  %v3806_v16 = vld [vmem:[#allocation5 + $0x2c] sm:$0xf]  ;;  %v3373_v17 = vld [vmem:[#allocation5 + $0x38] sm:$0xf0]  ;;  %v3861_v20 = vld [vmem:[#allocation5 + $0xe4] sm:$0xf] }
 0x34a   :  { %v3915_v22 = vpop.eup %3914  ;;  %v1642_v23 = vmul.f32 0.5, %v3913_v21  ;;  %3918 = vtanh.f32 %v1649_v61  ;;  %v3822_v61 = vld [vmem:[#allocation5 + $0xac] sm:$0xf]  ;;  %v3437_v21 = vld [vmem:[#allocation5 + $0xb8] sm:$0xf0] }
 0x34b   :  { %v1646_v26 = vmul.f32 0.5, %v3915_v22  ;;  %v3440_v22 = vor.u32 %v3822_v61, %v3437_v21  ;;  %2165 = vmatpush.bf16.msrb.mxu2 %v3436_v55  ;;  %v3376_v55 = vor.u32 %v3806_v16, %v3373_v17  ;;  %v3347_v61 = vld [vmem:[#allocation5] sm:$0xf]  ;;  %v3803_v21 = vld [vmem:[#allocation5 + $0xc] sm:$0xf0] }
 0x34c   :  { %v1643_v32 = vadd.f32 0.5, %v1642_v23  ;;  %v3411_v23 = vld [vmem:[#allocation5 + $0x80] sm:$0xf]  ;;  %v3595_v14 = vld [vmem:[#allocation5 + $0xe8] sm:$0xf] }
 0x34d   :  { %v1647_v24 = vadd.f32 0.5, %v1646_v26  ;;  %v1614_v27 = vpop.f32.mrf.mxu2  ;;  %v1627_v28 = vpop.f32.mrf.mxu3  ;;  %v3819_v26 = vld [vmem:[#allocation5 + $0x8c] sm:$0xf0]  ;;  %2178 = vmatpush.bf16.msrb.mxu3 %v3440_v22  ;;  %v3801_v22 = vld [vmem:[#allocation5 + $0x4] sm:$0xf] }
 0x34e   :  { %v3917_v29 = vpop.eup %3916  ;;  %v3413_v27 = vld [vmem:[#allocation5 + $0x90] sm:$0xf0]  ;;  %v3419_v28 = vld [vmem:[#allocation5 + $0x88] sm:$0xf]  ;;  %v3597_v16 = vld [vmem:[#allocation5 + $0xf8] sm:$0xf0] }
 0x34f   :  { %v1654_v31 = vmul.f32 %v1647_v24, %v4226_v45  ;;  %v1655_v33 = vmul.f32 %v3917_v29, %v1643_v32  ;;  %v3460_v45 = vor.u32 %v3831_v49, %v3459_v39  ;;  %v3817_v32 = vld [vmem:[#allocation5 + $0x84] sm:$0xf]  ;;  %v3412_v24 = vor.u32 %v3819_v26, %v3411_v23  ;;  %v3820_v29 = vld [vmem:[#allocation5 + $0x94] sm:$0xf0]  ;;  %v3397_v49 = vld [vmem:[#allocation5 + $0x70] sm:$0xf0] }
 0x350   :  { %v3919_v56 = vpop.eup %3918  ;;  %v3348_v23 = vor.u32 %v3803_v21, %v3347_v61  ;;  %v3349_v26 = vld [vmem:[#allocation5 + $0x10] sm:$0xf0]  ;;  %v3859_v61 = vld [vmem:[#allocation5 + $0xcc] sm:$0xf0]  ;;  %v3857_v21 = vld [vmem:[#allocation5 + $0xc4] sm:$0xf] }
 0x351   :  { %v4234_v36 = vadd.f32 %v1655_v33, %v1654_v31  ;;  %v1651_v8 = vmul.f32 0.5, %v3919_v56  ;;  %2137 = vmatpush.bf16.msrb.mxu0 %v3460_v45  ;;  %v3416_v31 = vor.u32 %v3817_v32, %v3413_v27  ;;  %v3420_v33 = vor.u32 %v3820_v29, %v3419_v28  ;;  %v3818_v56 = vld [vmem:[#allocation5 + $0x8c] sm:$0xf]  ;;  %v3816_v45 = vld [vmem:[#allocation5 + $0x74] sm:$0xf0] }
 0x352   :  { %v3404_v11 = vor.u32 %v3816_v45, %v3403_v52  ;;  %v3355_v32 = vld [vmem:[#allocation5 + $0x8] sm:$0xf]  ;;  %v3352_v27 = vor.u32 %v3801_v22, %v3349_v26  ;;  %v3802_v29 = vld [vmem:[#allocation5 + $0xc] sm:$0xf] }
 0x353   :  { %3920 = vtanh.f32 %v4234_v36  ;;  %v1652_v37 = vadd.f32 0.5, %v1651_v8  ;;  %v3421_v8 = vld [vmem:[#allocation5 + $0x98] sm:$0xf0]  ;;  %2153 = vmatpush.bf16.msrb.mxu1 %v3416_v31  ;;  %2166 = vmatpush.bf16.msrb.mxu2 %v3420_v33  ;;  %v3579_v26 = vld [vmem:[#allocation5 + $0xc8] sm:$0xf] }
 0x354   :  { %v3357_v31 = vld [vmem:[#allocation5 + $0x18] sm:$0xf0] }
 0x355   :  { %2138 = vmatpush.bf16.msrb.mxu0 %v3444_v46  ;;  %v3812_v46 = vld [vmem:[#allocation5 + $0x54] sm:$0xf0]  ;;  %v3360_v33 = vor.u32 %v3802_v29, %v3357_v31  ;;  %v3581_v29 = vld [vmem:[#allocation5 + $0xd8] sm:$0xf0] }
 0x356   :  { %v3388_v58 = vor.u32 %v3812_v46, %v3387_v25 }
 0x357   :  { %2167 = vmatpush.bf16.msrb.mxu2 %v3404_v11 }
 0x359   :  { %v3921_v38 = vpop.eup %3920  ;;  %2139 = vmatpush.bf16.msrb.mxu0 %v3428_v53  ;;  %v3808_v53 = vld [vmem:[#allocation5 + $0x34] sm:$0xf0] }
 0x35a   :  { %v1658_v57 = vmul.f32 %v3921_v38, %v1652_v37  ;;  %v3424_v37 = vor.u32 %v3818_v56, %v3421_v8  ;;  %v3395_v38 = vld [vmem:[#allocation5 + $0x60] sm:$0xf]  ;;  %v3372_v44 = vor.u32 %v3808_v53, %v3371_v15  ;;  %v3864_v15 = vld [vmem:[#allocation5 + $0xf4] sm:$0xf0] }
 0x35b   :  { %2168 = vmatpush.bf16.msrb.mxu2 %v3388_v58 }
 0x35c   :  { %1662 = vst [vmem:[#allocation8 + $0x20] sm:$0xff] %v1658_v57  ;;  %v1664_v59 = vpack.c.bf16 %v1658_v57, %v1658_v57  ;;  %v3815_v57 = vld [vmem:[#allocation5 + $0x6c] sm:$0xf0]  ;;  %2179 = vmatpush.bf16.msrb.mxu3 %v3424_v37 }
 0x35d   :  { %2140 = vmatpush.bf16.msrb.mxu0 %v3412_v24  ;;  %v3396_v39 = vor.u32 %v3815_v57, %v3395_v38  ;;  %v3804_v24 = vld [vmem:[#allocation5 + $0x14] sm:$0xf0] }
 0x35e   :  { %1865 = vmatmul.bf16.vlgmr.msra.gmra.mxu0 %v1664_v59  ;;  %1878 = vmatmul.bf16.vlgmr.msra.gmra.mxu1 %v1664_v59  ;;  %v3356_v28 = vor.u32 %v3804_v24, %v3355_v32  ;;  %v3860_v32 = vld [vmem:[#allocation5 + $0xd4] sm:$0xf0] }
 0x35f   :  { %1891 = vmatmul.bf16.vlgmr.msra.gmra.mxu2 %v1664_v59  ;;  %1904 = vmatmul.bf16.vlgmr.msra.gmra.mxu3 %v1664_v59  ;;  %v3813_v59 = vld [vmem:[#allocation5 + $0x64] sm:$0xf] }
 0x360   :  { %v3400_v50 = vor.u32 %v3813_v59, %v3397_v49  ;;  %2180 = vmatpush.bf16.msrb.mxu3 %v3408_v41  ;;  %2169 = vmatpush.bf16.msrb.mxu2 %v3372_v44  ;;  %v3862_v44 = vld [vmem:[#allocation5 + $0xec] sm:$0xf] }
 0x361   :  { %2141 = vmatpush.bf16.msrb.mxu0 %v3396_v39  ;;  %v3600_v17 = vor.u32 %v3862_v44, %v3597_v16  ;;  %v3509_v44 = vld [vmem:[#allocation5 + $0x50] sm:$0xf0]  ;;  %v3515_v16 = vld [vmem:[#allocation5 + $0x48] sm:$0xf] }
 0x362   :  { %2154 = vmatpush.bf16.msrb.mxu1 %v3400_v50 }
 0x364   :  { %2181 = vmatpush.bf16.msrb.mxu3 %v3392_v10  ;;  %2170 = vmatpush.bf16.msrb.mxu2 %v3356_v28  ;;  %v3858_v28 = vld [vmem:[#allocation5 + $0xcc] sm:$0xf] }
 0x365   :  { %2142 = vmatpush.bf16.msrb.mxu0 %v3380_v2  ;;  %v3584_v31 = vor.u32 %v3858_v28, %v3581_v29  ;;  %v3493_v28 = vld [vmem:[#allocation5 + $0x30] sm:$0xf0]  ;;  %v3499_v29 = vld [vmem:[#allocation5 + $0x28] sm:$0xf] }
 0x366   :  { %2155 = vmatpush.bf16.msrb.mxu1 %v3384_v51 }
 0x368   :  { %2182 = vmatpush.bf16.msrb.mxu3 %v3376_v55  ;;  %v3571_v55 = vld [vmem:[#allocation5 + $0xc0] sm:$0xf] }
 0x369   :  { %2143 = vmatpush.bf16.msrb.mxu0 %v3364_v12  ;;  %v3589_v12 = vld [vmem:[#allocation5 + $0xf0] sm:$0xf0]  ;;  %v3572_v22 = vor.u32 %v3859_v61, %v3571_v55 }
 0x36a   :  { %2156 = vmatpush.bf16.msrb.mxu1 %v3368_v60  ;;  %v3592_v53 = vor.u32 %v3861_v20, %v3589_v12  ;;  %v3596_v60 = vor.u32 %v3864_v15, %v3595_v14  ;;  %v3846_v20 = vld [vmem:[#allocation5 + $0x6c] sm:$0xf]  ;;  %v3507_v14 = vld [vmem:[#allocation5 + $0x40] sm:$0xf]  ;;  %v3843_v15 = vld [vmem:[#allocation5 + $0x4c] sm:$0xf0] }
 0x36c   :  { %2183 = vmatpush.bf16.msrb.mxu3 %v3360_v33  ;;  %2443 = vmatpush.bf16.msra.mxu2 %v3596_v60  ;;  %v3555_v33 = vld [vmem:[#allocation5 + $0xa0] sm:$0xf]  ;;  %v3508_v60 = vor.u32 %v3843_v15, %v3507_v14 }
 0x36d   :  { %2144 = vmatpush.bf16.msrb.mxu0 %v3348_v23  ;;  %v3573_v23 = vld [vmem:[#allocation5 + $0xd0] sm:$0xf0] }
 0x36e   :  { %2157 = vmatpush.bf16.msrb.mxu1 %v3352_v27  ;;  %v3576_v24 = vor.u32 %v3857_v21, %v3573_v23  ;;  %v3580_v27 = vor.u32 %v3860_v32, %v3579_v26  ;;  %v3842_v21 = vld [vmem:[#allocation5 + $0x4c] sm:$0xf]  ;;  %v3491_v26 = vld [vmem:[#allocation5 + $0x20] sm:$0xf]  ;;  %v3839_v32 = vld [vmem:[#allocation5 + $0x2c] sm:$0xf0] }
 0x370   :  { %2456 = vmatpush.bf16.msra.mxu3 %v3600_v17  ;;  %2444 = vmatpush.bf16.msra.mxu2 %v3580_v27  ;;  %v3844_v17 = vld [vmem:[#allocation5 + $0x54] sm:$0xf0]  ;;  %v3492_v27 = vor.u32 %v3839_v32, %v3491_v26 }
 0x371   :  { %v3516_v61 = vor.u32 %v3844_v17, %v3515_v16 }
 0x372   :  { %2430 = vmatpush.bf16.msra.mxu1 %v3592_v53  ;;  %v3841_v53 = vld [vmem:[#allocation5 + $0x44] sm:$0xf] }
 0x373   :  { %v3512_v55 = vor.u32 %v3841_v53, %v3509_v44 }
 0x374   :  { %2457 = vmatpush.bf16.msra.mxu3 %v3584_v31  ;;  %v3840_v31 = vld [vmem:[#allocation5 + $0x34] sm:$0xf0] }
 0x376   :  { %2431 = vmatpush.bf16.msra.mxu1 %v3576_v24  ;;  %v3837_v24 = vld [vmem:[#allocation5 + $0x24] sm:$0xf] }
 0x3db   :  { %v1866_v56 = vpop.f32.mrf.mxu0  ;;  %v1879_v8 = vpop.f32.mrf.mxu1 }
 0x3dc   :  { %v1916_v37 = vadd.f32 %v1866_v56, %v4159_v9  ;;  %v1917_v38 = vadd.f32 %v1879_v8, %v4162_v19  ;;  %v3855_v56 = vld [vmem:[#allocation5 + $0xac] sm:$0xf0]  ;;  %v3853_v8 = vld [vmem:[#allocation5 + $0xa4] sm:$0xf] }
 0x3de   :  { %v1920_v57 = vmul.f32 0.5, %v1916_v37  ;;  %v1924_v59 = vmul.f32 0.5, %v1917_v38  ;;  %v3556_v37 = vor.u32 %v3855_v56, %v3555_v33  ;;  %v3557_v38 = vld [vmem:[#allocation5 + $0xb0] sm:$0xf0]  ;;  %v3496_v33 = vor.u32 %v3837_v24, %v3493_v28 }
 0x3df   :  { %v3500_v56 = vor.u32 %v3840_v31, %v3499_v29 }
 0x3e0   :  { %3922 = vtanh.f32 %v1920_v57  ;;  %v3563_v57 = vld [vmem:[#allocation5 + $0xa8] sm:$0xf] }
 0x3e1   :  { %3924 = vtanh.f32 %v1924_v59  ;;  %v3856_v59 = vld [vmem:[#allocation5 + $0xb4] sm:$0xf0] }
 0x3e2   :  { %v1892_v39 = vpop.f32.mrf.mxu2  ;;  %v1905_v49 = vpop.f32.mrf.mxu3 }
 0x3e3   :  { %v1918_v52 = vadd.f32 %v1892_v39, %v4165_v40  ;;  %v1919_v45 = vadd.f32 %v1905_v49, %v4168_v47  ;;  %v1868_v50 = vpop.f32.mrf.mxu0  ;;  %v1881_v11 = vpop.f32.mrf.mxu1  ;;  %v3560_v39 = vor.u32 %v3853_v8, %v3557_v38  ;;  %v3564_v49 = vor.u32 %v3856_v59, %v3563_v57  ;;  %v3838_v8 = vld [vmem:[#allocation5 + $0x2c] sm:$0xf]  ;;  %v3475_v57 = vld [vmem:[#allocation5] sm:$0xf]  ;;  %v3835_v59 = vld [vmem:[#allocation5 + $0xc] sm:$0xf0] }
 0x3e4   :  { %v3539_v11 = vld [vmem:[#allocation5 + $0x80] sm:$0xf] }
 0x3e5   :  { %3926 = vtanh.f32 %v1918_v52  ;;  %v1929_v13 = vmul.f32 0.5, %v1919_v45  ;;  %v3854_v52 = vld [vmem:[#allocation5 + $0xac] sm:$0xf]  ;;  %v3565_v45 = vld [vmem:[#allocation5 + $0xb8] sm:$0xf0]  ;;  %2432 = vmatpush.bf16.msra.mxu1 %v3560_v39  ;;  %2445 = vmatpush.bf16.msra.mxu2 %v3564_v49  ;;  %v3476_v49 = vor.u32 %v3835_v59, %v3475_v57 }
 0x3e6   :  { %v3923_v54 = vpop.eup %3922  ;;  %v3568_v50 = vor.u32 %v3854_v52, %v3565_v45  ;;  %v3833_v39 = vld [vmem:[#allocation5 + $0x4] sm:$0xf]  ;;  %v3477_v52 = vld [vmem:[#allocation5 + $0x10] sm:$0xf0]  ;;  %v3483_v45 = vld [vmem:[#allocation5 + $0x8] sm:$0xf] }
 0x3e7   :  { %v3925_v41 = vpop.eup %3924  ;;  %v1922_v63 = vmul.f32 0.5, %v3923_v54  ;;  %3928 = vtanh.f32 %v1929_v13  ;;  %v3851_v13 = vld [vmem:[#allocation5 + $0x8c] sm:$0xf0]  ;;  %v3849_v54 = vld [vmem:[#allocation5 + $0x84] sm:$0xf] }
 0x3e8   :  { %v1926_v9 = vmul.f32 0.5, %v3925_v41  ;;  %2458 = vmatpush.bf16.msra.mxu3 %v3568_v50  ;;  %v3540_v41 = vor.u32 %v3851_v13, %v3539_v11  ;;  %v3836_v50 = vld [vmem:[#allocation5 + $0x14] sm:$0xf0]  ;;  %v3480_v11 = vor.u32 %v3833_v39, %v3477_v52 }
 0x3e9   :  { %v1923_v19 = vadd.f32 0.5, %v1922_v63  ;;  %v3541_v63 = vld [vmem:[#allocation5 + $0x90] sm:$0xf0]  ;;  %v3484_v13 = vor.u32 %v3836_v50, %v3483_v45 }
 0x3ea   :  { %v1927_v3 = vadd.f32 0.5, %v1926_v9  ;;  %v1894_v5 = vpop.f32.mrf.mxu2  ;;  %v1907_v2 = vpop.f32.mrf.mxu3  ;;  %v3547_v9 = vld [vmem:[#allocation5 + $0x88] sm:$0xf] }
 0x3eb   :  { %v3927_v18 = vpop.eup %3926  ;;  %v3850_v2 = vld [vmem:[#allocation5 + $0x8c] sm:$0xf] }
 0x3ec   :  { %v1934_v25 = vmul.f32 %v1927_v3, %v4234_v36  ;;  %v1935_v46 = vmul.f32 %v3927_v18, %v1923_v19  ;;  %v3588_v36 = vor.u32 %v3863_v1, %v3587_v6  ;;  %v3852_v19 = vld [vmem:[#allocation5 + $0x94] sm:$0xf0]  ;;  %v3544_v3 = vor.u32 %v3849_v54, %v3541_v63  ;;  %v3549_v18 = vld [vmem:[#allocation5 + $0x98] sm:$0xf0]  ;;  %v3834_v54 = vld [vmem:[#allocation5 + $0xc] sm:$0xf] }
 0x3ed   :  { %v3929_v40 = vpop.eup %3928  ;;  %v3548_v5 = vor.u32 %v3852_v19, %v3547_v9 }
 0x3ee   :  { %v4242_v51 = vadd.f32 %v1935_v46, %v1934_v25  ;;  %v1931_v47 = vmul.f32 0.5, %v3929_v40  ;;  %2417 = vmatpush.bf16.msra.mxu0 %v3588_v36  ;;  %v3552_v25 = vor.u32 %v3850_v2, %v3549_v18  ;;  %2433 = vmatpush.bf16.msra.mxu1 %v3544_v3  ;;  %v3523_v46 = vld [vmem:[#allocation5 + $0x60] sm:$0xf]  ;;  %v3847_v40 = vld [vmem:[#allocation5 + $0x6c] sm:$0xf0] }
 0x3ef   :  { %2446 = vmatpush.bf16.msra.mxu2 %v3548_v5  ;;  %v3533_v36 = vld [vmem:[#allocation5 + $0x78] sm:$0xf0] }
 0x3f0   :  { %3930 = vtanh.f32 %v4242_v51  ;;  %v1932_v58 = vadd.f32 0.5, %v1931_v47  ;;  %v3845_v47 = vld [vmem:[#allocation5 + $0x64] sm:$0xf]  ;;  %2459 = vmatpush.bf16.msra.mxu3 %v3552_v25  ;;  %v3536_v12 = vor.u32 %v3846_v20, %v3533_v36 }
 0x3f2   :  { %2418 = vmatpush.bf16.msra.mxu0 %v3572_v22  ;;  %v3517_v22 = vld [vmem:[#allocation5 + $0x58] sm:$0xf0] }
 0x3f3   :  { %v3520_v23 = vor.u32 %v3842_v21, %v3517_v22 }
 0x3f4   :  { %2460 = vmatpush.bf16.msra.mxu3 %v3536_v12 }
 0x3f6   :  { %v3931_v0 = vpop.eup %3930  ;;  %2419 = vmatpush.bf16.msra.mxu0 %v3556_v37  ;;  %v3501_v37 = vld [vmem:[#allocation5 + $0x38] sm:$0xf0] }
 0x3f7   :  { %v1938_v7 = vmul.f32 %v3931_v0, %v1932_v58  ;;  %v3524_v58 = vor.u32 %v3847_v40, %v3523_v46  ;;  %v3525_v0 = vld [vmem:[#allocation5 + $0x70] sm:$0xf0]  ;;  %v3504_v38 = vor.u32 %v3838_v8, %v3501_v37 }
 0x3f8   :  { %v3528_v6 = vor.u32 %v3845_v47, %v3525_v0  ;;  %2461 = vmatpush.bf16.msra.mxu3 %v3520_v23 }
 0x3f9   :  { %1942 = vst [vmem:[#allocation8 + $0x28] sm:$0xff] %v1938_v7  ;;  %v1944_v10 = vpack.c.bf16 %v1938_v7, %v1938_v7  ;;  %v3531_v7 = vld [vmem:[#allocation5 + $0x68] sm:$0xf] }
 0x3fa   :  { %2420 = vmatpush.bf16.msra.mxu0 %v3540_v41  ;;  %2434 = vmatpush.bf16.msra.mxu1 %v3528_v6  ;;  %v3485_v41 = vld [vmem:[#allocation5 + $0x18] sm:$0xf0] }
 0x3fb   :  { %2145 = vmatmul.bf16.vlgmr.msrb.gmra.mxu0 %v1944_v10  ;;  %2158 = vmatmul.bf16.vlgmr.msrb.gmra.mxu1 %v1944_v10  ;;  %v3488_v63 = vor.u32 %v3834_v54, %v3485_v41 }
 0x3fc   :  { %2171 = vmatmul.bf16.vlgmr.msrb.gmra.mxu2 %v1944_v10  ;;  %2184 = vmatmul.bf16.vlgmr.msrb.gmra.mxu3 %v1944_v10  ;;  %v3848_v10 = vld [vmem:[#allocation5 + $0x74] sm:$0xf0] }
 0x3fd   :  { %v3532_v1 = vor.u32 %v3848_v10, %v3531_v7  ;;  %2462 = vmatpush.bf16.msra.mxu3 %v3504_v38 }
 0x3fe   :  { %2421 = vmatpush.bf16.msra.mxu0 %v3524_v58  ;;  %2435 = vmatpush.bf16.msra.mxu1 %v3512_v55 }
 0x3ff   :  { %2447 = vmatpush.bf16.msra.mxu2 %v3532_v1 }
 0x401   :  { %2463 = vmatpush.bf16.msra.mxu3 %v3488_v63 }
 0x402   :  { %2422 = vmatpush.bf16.msra.mxu0 %v3508_v60  ;;  %2436 = vmatpush.bf16.msra.mxu1 %v3496_v33 }
 0x403   :  { %2448 = vmatpush.bf16.msra.mxu2 %v3516_v61 }
 0x406   :  { %2423 = vmatpush.bf16.msra.mxu0 %v3492_v27  ;;  %2437 = vmatpush.bf16.msra.mxu1 %v3480_v11 }
 0x407   :  { %2449 = vmatpush.bf16.msra.mxu2 %v3500_v56 }
 0x40a   :  { %2424 = vmatpush.bf16.msra.mxu0 %v3476_v49 }
 0x40b   :  { %2450 = vmatpush.bf16.msra.mxu2 %v3484_v13 }
 0x478   :  { %v2146_v9 = vpop.f32.mrf.mxu0  ;;  %v2159_v19 = vpop.f32.mrf.mxu1 }
 0x479   :  { %v2196_v3 = vadd.f32 %v2146_v9, %v4171_v48  ;;  %v2197_v5 = vadd.f32 %v2159_v19, %v4174_v4 }
 0x47b   :  { %v2200_v2 = vmul.f32 0.5, %v2196_v3  ;;  %v2204_v18 = vmul.f32 0.5, %v2197_v5 }
 0x47d   :  { %3932 = vtanh.f32 %v2200_v2 }
 0x47e   :  { %3934 = vtanh.f32 %v2204_v18 }
 0x47f   :  { %v2172_v25 = vpop.f32.mrf.mxu2  ;;  %v2185_v46 = vpop.f32.mrf.mxu3 }
 0x480   :  { %v2198_v40 = vadd.f32 %v2172_v25, %v4177_v34  ;;  %v2199_v47 = vadd.f32 %v2185_v46, %v4180_v42  ;;  %v2148_v58 = vpop.f32.mrf.mxu0  ;;  %v2161_v0 = vpop.f32.mrf.mxu1 }
 0x482   :  { %3936 = vtanh.f32 %v2198_v40  ;;  %v2209_v7 = vmul.f32 0.5, %v2199_v47 }
 0x483   :  { %v3933_v10 = vpop.eup %3932 }
 0x484   :  { %v3935_v6 = vpop.eup %3934  ;;  %v2202_v1 = vmul.f32 0.5, %v3933_v10  ;;  %3938 = vtanh.f32 %v2209_v7 }
 0x485   :  { %v2206_v48 = vmul.f32 0.5, %v3935_v6 }
 0x486   :  { %v2203_v4 = vadd.f32 0.5, %v2202_v1 }
 0x487   :  { %v2207_v20 = vadd.f32 0.5, %v2206_v48  ;;  %v2174_v36 = vpop.f32.mrf.mxu2  ;;  %v2187_v12 = vpop.f32.mrf.mxu3 }
 0x488   :  { %v3937_v14 = vpop.eup %3936 }
 0x489   :  { %v2214_v15 = vmul.f32 %v2207_v20, %v4242_v51  ;;  %v2215_v53 = vmul.f32 %v3937_v14, %v2203_v4 }
 0x48a   :  { %v3939_v34 = vpop.eup %3938 }
 0x48b   :  { %v2216_v60 = vadd.f32 %v2215_v53, %v2214_v15  ;;  %v2211_v42 = vmul.f32 0.5, %v3939_v34 }
 0x48d   :  { %3940 = vtanh.f32 %v2216_v60  ;;  %v2212_v44 = vadd.f32 0.5, %v2211_v42 }
 0x493   :  { %v3941_v16 = vpop.eup %3940 }
 0x494   :  { %v2218_v17 = vmul.f32 %v3941_v16, %v2212_v44 }
 0x496   :  { %2222 = vst [vmem:[#allocation8 + $0x30] sm:$0xff] %v2218_v17  ;;  %v2224_v55 = vpack.c.bf16 %v2218_v17, %v2218_v17 }
 0x498   :  { %2425 = vmatmul.bf16.vlgmr.msra.gmra.mxu0 %v2224_v55  ;;  %2438 = vmatmul.bf16.vlgmr.msra.gmra.mxu1 %v2224_v55 }
 0x499   :  { %2451 = vmatmul.bf16.vlgmr.msra.gmra.mxu2 %v2224_v55  ;;  %2464 = vmatmul.bf16.vlgmr.msra.gmra.mxu3 %v2224_v55 }
 0x515   :  { %v2426_v61 = vpop.f32.mrf.mxu0  ;;  %v2439_v21 = vpop.f32.mrf.mxu1 }
 0x516   :  { %v2476_v22 = vadd.f32 %v2426_v61, %v4183_v43  ;;  %v2477_v51 = vadd.f32 %v2439_v21, %v4186_v62 }
 0x518   :  { %v2480_v23 = vmul.f32 0.5, %v2476_v22  ;;  %v2484_v26 = vmul.f32 0.5, %v2477_v51 }
 0x51a   :  { %3942 = vtanh.f32 %v2480_v23 }
 0x51b   :  { %3944 = vtanh.f32 %v2484_v26 }
 0x51c   :  { %v2452_v32 = vpop.f32.mrf.mxu2  ;;  %v2465_v24 = vpop.f32.mrf.mxu3 }
 0x51d   :  { %v2478_v27 = vadd.f32 %v2452_v32, %v4193_v30  ;;  %v2479_v28 = vadd.f32 %v2465_v24, %v4196_v35  ;;  %v2428_v29 = vpop.f32.mrf.mxu0  ;;  %v2441_v31 = vpop.f32.mrf.mxu1 }
 0x51f   :  { %3946 = vtanh.f32 %v2478_v27  ;;  %v2489_v33 = vmul.f32 0.5, %v2479_v28 }
 0x520   :  { %v3943_v56 = vpop.eup %3942 }
 0x521   :  { %v3945_v8 = vpop.eup %3944  ;;  %v2482_v37 = vmul.f32 0.5, %v3943_v56  ;;  %3948 = vtanh.f32 %v2489_v33 }
 0x522   :  { %v2486_v43 = vmul.f32 0.5, %v3945_v8 }
 0x523   :  { %v2483_v62 = vadd.f32 0.5, %v2482_v37 }
 0x524   :  { %v2487_v38 = vadd.f32 0.5, %v2486_v43  ;;  %v2454_v57 = vpop.f32.mrf.mxu2  ;;  %v2467_v59 = vpop.f32.mrf.mxu3 }
 0x525   :  { %v3947_v39 = vpop.eup %3946 }
 0x526   :  { %v2494_v49 = vmul.f32 %v2487_v38, %v2216_v60  ;;  %v2495_v52 = vmul.f32 %v3947_v39, %v2483_v62 }
 0x527   :  { %v3949_v45 = vpop.eup %3948 }
 0x528   :  { %v2496_v30 = vadd.f32 %v2495_v52, %v2494_v49  ;;  %v2491_v35 = vmul.f32 0.5, %v3949_v45 }
 0x52a   :  { %3950 = vtanh.f32 %v2496_v30  ;;  %v2492_v50 = vadd.f32 0.5, %v2491_v35 }
 0x530   :  { %v3951_v11 = vpop.eup %3950 }
 0x531   :  { %v2498_v13 = vmul.f32 %v3951_v11, %v2492_v50 }
 0x533   :  { %2502 = vst [vmem:[#allocation8 + $0x38] sm:$0xff] %v2498_v13 }
 0x534   :  { %2515 = dma.vmem_to_hbm [thread:$0]  %s2508_s3, 1024, %s2510_s22, [#allocation7], %s4009_s23, %s4009_s23, %s4010_s24  }
 0x535   :  { %4002 = dma.done.wait [#allocation7], 1024  }
 0x536   :  { %4003 = vsyncadd [#allocation7], 4294966272 }
 0x537   :  { %2520 = vsyncpa [#allocation6], 1 }
 0x538   :  { %2521 = vsyncpa [#allocation7], 1 }

</bundles_post_ra>
